<compile_context>
chip_gen: v7x
topology: tpu7x:2x2x1
jax: 0.10.0
libtpu: 0.0.40
codegen_flags: <defaults>
</compile_context>

<pallas_src>
import functools

import jax
import jax.numpy as jnp
from jax.experimental import pallas as pl
from jax.experimental.pallas import tpu as pltpu


def _round_up(n, m):
    return ((n + m - 1) // m) * m


def _vmem_budget_bytes():
    """Generation-aware VMEM budget (v5e/v6e: 128 MiB physical, v7x: 64 MiB)."""
    try:
        info = pltpu.get_tpu_info()
        cap = None
        for name in ("vmem_capacity_bytes", "vmem_bytes", "vmem_size_bytes"):
            cap = getattr(info, name, None)
            if cap:
                break
        if cap:
            return int(min(int(cap) * 7 // 10, 100 * 1024 * 1024))
    except Exception:
        pass
    return 48 * 1024 * 1024  # safe default: leaves headroom on v7x's 64 MiB VMEM


def _choose_time_chunk(t, bp, hp_max, num_dirs, budget_bytes, target):
    """Largest time-chunk whose double-buffered gate/out chunks fit the VMEM budget."""
    gate_bytes, out_bytes = 2, 4                              # bf16 gates, f32 worst-case out
    fixed = num_dirs * hp_max * hp_max * 2 * 2                # W_hh (bf16, double-buffered)
    fixed += num_dirs * bp * hp_max * 4 * 5                   # h0 + h_last (2 bufs) + scratch
    fixed += 2 * 1024 * 1024                                  # compiler scratch slack
    per_step = num_dirs * bp * hp_max * (gate_bytes + out_bytes) * 2
    tc = (budget_bytes - fixed) // per_step if budget_bytes > fixed else 1
    return int(max(1, min(tc, target, t)))


# ---------------------------------------------------------------------------
# Pallas kernel: one time-chunk of the serial recurrence, BOTH directions fused.
#   grid = (num_chunks,)   ["arbitrary" -- carries the recurrence]
#   refs  = gates_d0[, gates_d1], h0, w_hh, out_d0[, out_d1], h_last, h_scratch
#     gates_d : (TC, Bp, Hp)  bf16   precomputed x @ W_ih + b, this direction's chunk
#     h0      : (D, Bp, Hp)   f32
#     w_hh    : (D, Hp, Hp)   bf16
#     out_d   : (TC, Bp, Hp)  bf16/f32  per-step hidden outputs
#     h_last  : (D, Bp, Hp)   f32    (constant block index -> flushed once at the end)
#     h_scratch: (D, Bp, Hp)  f32    persists across grid steps
# ---------------------------------------------------------------------------
def _rnn_chunk_kernel(*refs, num_dirs, chunk, n_chunks, t_real, t_padded,
                      unroll, compute_dtype):
    gates_refs = refs[:num_dirs]
    h0_ref = refs[num_dirs]
    whh_ref = refs[num_dirs + 1]
    out_refs = refs[num_dirs + 2: 2 * num_dirs + 2]
    hlast_ref = refs[2 * num_dirs + 2]
    h_scratch = refs[2 * num_dirs + 3]

    c = pl.program_id(0)

    @pl.when(c == 0)
    def _():
        h_scratch[...] = h0_ref[...]

    need_mask = t_padded != t_real   # static

    def step(i, carry):
        new_carry = []
        for d in range(num_dirs):
            h = carry[d]
            if d == 0:                              # forward: natural order within chunk
                t_in = i
                t_glob = c * chunk + i
            else:                                   # backward: reversed within chunk,
                t_in = chunk - 1 - i                # chunks walked back-to-front via BlockSpec
                t_glob = (n_chunks - 1 - c) * chunk + t_in
            g = gates_refs[d][t_in].astype(jnp.float32)
            # TODO(synk): keep W_hh resident in the MXU across the chunk via
            #             pltpu.matmul_push_rhs / matmul_acc_lhs instead of re-streaming it.
            h_new = jnp.tanh(
                g + jnp.dot(h.astype(compute_dtype), whh_ref[d],
                            preferred_element_type=jnp.float32))
            if need_mask:
                # Padded-tail timesteps: freeze the carried state (keeps h_last exact).
                h_new = jnp.where(t_glob < t_real, h_new, h)
            out_refs[d][t_in] = h_new.astype(out_refs[d].dtype)
            new_carry.append(h_new)
        return tuple(new_carry)

    carry = jax.lax.fori_loop(
        0, chunk, step, tuple(h_scratch[d] for d in range(num_dirs)),
        unroll=unroll)

    for d in range(num_dirs):
        h_scratch[d] = carry[d]
        hlast_ref[d] = carry[d]   # constant-index output block: cheap VMEM store each chunk


def _rnn_layer(gates, h0_p, whh_p, *, num_dirs, chunk, t_real, out_dtype,
               compute_dtype, vmem_limit):
    """Serial part of one layer (both directions fused). gates: (Tp, Bp, D*Hp)."""
    tp, bp, dhp = gates.shape
    hp = dhp // num_dirs
    n_chunks = tp // chunk
    unroll = int(min(chunk, 8))     # partial unroll: LLO visibility without vreg blow-up

    kernel = functools.partial(
        _rnn_chunk_kernel, num_dirs=num_dirs, chunk=chunk, n_chunks=n_chunks,
        t_real=t_real, t_padded=tp, unroll=unroll, compute_dtype=compute_dtype)

    gate_specs, out_specs = [], []
    for d in range(num_dirs):
        if d == 0:
            gate_specs.append(pl.BlockSpec((chunk, bp, hp), lambda c: (c, 0, 0)))
            out_specs.append(pl.BlockSpec((chunk, bp, hp), lambda c: (c, 0, 0)))
        else:
            # backward direction walks time-chunks in reverse; its gate window is the
            # second Hp-block of the last dim (lane-aligned, no transpose needed).
            gate_specs.append(pl.BlockSpec(
                (chunk, bp, hp), lambda c, _n=n_chunks: (_n - 1 - c, 0, 1)))
            out_specs.append(pl.BlockSpec(
                (chunk, bp, hp), lambda c, _n=n_chunks: (_n - 1 - c, 0, 0)))

    in_specs = gate_specs + [
        pl.BlockSpec((num_dirs, bp, hp), lambda c: (0, 0, 0)),
        pl.BlockSpec((num_dirs, hp, hp), lambda c: (0, 0, 0)),
    ]
    out_specs = out_specs + [pl.BlockSpec((num_dirs, bp, hp), lambda c: (0, 0, 0))]

    out_shapes = tuple(jax.ShapeDtypeStruct((tp, bp, hp), out_dtype)
                       for _ in range(num_dirs)) + (
        jax.ShapeDtypeStruct((num_dirs, bp, hp), jnp.float32),)

    results = pl.pallas_call(
        kernel,
        out_shape=out_shapes,
        grid_spec=pltpu.PrefetchScalarGridSpec(
            num_scalar_prefetch=0,
            grid=(n_chunks,),
            in_specs=in_specs,
            out_specs=out_specs,
            scratch_shapes=[pltpu.VMEM((num_dirs, bp, hp), jnp.float32)]),
        compiler_params=pltpu.CompilerParams(
            dimension_semantics=("arbitrary",),   # sequential recurrence axis
            vmem_limit_bytes=int(vmem_limit)),
    )(*([gates] * num_dirs), h0_p, whh_p)

    return results[:num_dirs], results[num_dirs]


# ---------------------------------------------------------------------------
# RNNFrame.forward (uniform-length / unpacked path, for_lstm=False)
# ---------------------------------------------------------------------------
def rnn_frame_forward(x, params, *, num_layers, bidirectional, batch_first=False,
                      init_state=None, time_chunk=128, compute_dtype=jnp.bfloat16):
    """params[layer][direction] = (w_ih (in, H), w_hh (H, H), b (H,)) with b = b_ih + b_hh."""
    # TODO(synk): PackedSequence / ragged lengths, for_lstm=True, training-mode dropout.
    if batch_first:
        x = jnp.transpose(x, (1, 0, 2))
    num_dirs = 2 if bidirectional else 1
    t_real, batch, _ = x.shape

    hidden = [params[l][0][1].shape[0] for l in range(num_layers)]
    hidden_p = [_round_up(h, 128) for h in hidden]   # lane-dense (unmasked vst)
    bp = _round_up(batch, 8)                         # sublane-dense

    budget = _vmem_budget_bytes()
    chunk = _choose_time_chunk(t_real, bp, max(hidden_p), num_dirs, budget, time_chunk)
    tp = _round_up(t_real, chunk)

    # Pad ONCE (time + batch); hidden/feature padding is folded into the weights.
    x_p = jnp.pad(x, ((0, tp - t_real), (0, bp - batch), (0, 0))).astype(compute_dtype)

    segments = [x_p]            # per-direction feature segments of the current layer input
    seg_real = [x.shape[2]]     # real feature widths of each segment (torch W_ih row order)
    direction_last = []
    output = None

    for layer_idx in range(num_layers):
        lp = params[layer_idx]
        h, hp = hidden[layer_idx], hidden_p[layer_idx]
        last_layer = layer_idx == num_layers - 1

        # Hoisted input projection: gates = sum_s seg_s @ W_s + b  (both directions in the
        # column dim, zero-padded to Hp so the gates tensor is born lane-dense in bf16).
        acc = None
        row0 = 0
        for seg, rs in zip(segments, seg_real):
            ps = seg.shape[-1]
            w_cols = []
            for d in range(num_dirs):
                w = lp[d][0][row0:row0 + rs, :]                        # (rs, H)
                w_cols.append(jnp.pad(w, ((0, ps - rs), (0, hp - h))))
            w_seg = jnp.concatenate(w_cols, axis=1).astype(compute_dtype)   # (ps, D*Hp)
            part = jnp.dot(seg.reshape(tp * bp, ps), w_seg,
                           preferred_element_type=jnp.float32)
            acc = part if acc is None else acc + part
            row0 += rs
        b_cat = jnp.concatenate(
            [jnp.pad(lp[d][2], (0, hp - h)) for d in range(num_dirs)], axis=0)
        gates = (acc + b_cat).reshape(tp, bp, num_dirs * hp).astype(compute_dtype)

        # Recurrent weights / initial state (tiny; zero padding keeps pad columns at 0).
        whh_p = jnp.stack(
            [jnp.pad(lp[d][1], ((0, hp - h), (0, hp - h))) for d in range(num_dirs)],
            axis=0).astype(compute_dtype)
        if init_state is None:
            h0_p = jnp.zeros((num_dirs, bp, hp), jnp.float32)
        else:
            h0_p = jnp.stack(
                [jnp.pad(init_state[layer_idx * num_dirs + d].astype(jnp.float32),
                         ((0, bp - batch), (0, hp - h))) for d in range(num_dirs)],
                axis=0)

        out_dtype = jnp.float32 if last_layer else compute_dtype
        dir_outs, h_last = _rnn_layer(
            gates, h0_p, whh_p, num_dirs=num_dirs, chunk=chunk, t_real=t_real,
            out_dtype=out_dtype, compute_dtype=compute_dtype, vmem_limit=budget)

        for d in range(num_dirs):
            direction_last.append(h_last[d, :batch, :h])

        if last_layer:
            # torch.stack(dim=2).view(T, B, -1): fwd/bwd interleave, only at the very end.
            reals = [o[:t_real, :batch, :h] for o in dir_outs]
            if num_dirs == 2:
                output = jnp.stack(reals, axis=2).reshape(t_real, batch, num_dirs * h)
            else:
                output = reals[0]
        else:
            # Next layer consumes the padded per-direction outputs directly (split matmul);
            # no concat / transpose / slice between layers.
            segments = list(dir_outs)
            seg_real = [h] * num_dirs

    last_state = jnp.stack(direction_last, axis=0)
    if batch_first:
        output = jnp.transpose(output, (1, 0, 2))
    return output, last_state


# ---------------------------------------------------------------------------
# Pure-JAX reference (lax.scan) with matching bf16/f32 rounding points
# ---------------------------------------------------------------------------
def ref_forward(x, params, *, num_layers, bidirectional, compute_dtype=jnp.bfloat16):
    num_dirs = 2 if bidirectional else 1
    t, b, _ = x.shape
    layer_input = x.astype(jnp.float32)
    last_states = []
    output = None
    for layer_idx in range(num_layers):
        lp = params[layer_idx]
        h_size = lp[0][1].shape[0]
        outs = []
        for d in range(num_dirs):
            w_ih, w_hh, bias = lp[d]
            g = jnp.dot(layer_input.reshape(t * b, -1).astype(compute_dtype),
                        w_ih.astype(compute_dtype),
                        preferred_element_type=jnp.float32) + bias
            g = g.astype(compute_dtype).astype(jnp.float32).reshape(t, b, h_size)  # bf16 HBM
            whh_c = w_hh.astype(compute_dtype)

            def step(hc, g_t, whh_c=whh_c):
                h_new = jnp.tanh(g_t + jnp.dot(hc.astype(compute_dtype), whh_c,
                                               preferred_element_type=jnp.float32))
                return h_new, h_new

            h_last, o = jax.lax.scan(step, jnp.zeros((b, h_size), jnp.float32), g,
                                     reverse=(d == 1))
            outs.append(o)
            last_states.append(h_last)
        layer_out = (jnp.stack(outs, axis=2).reshape(t, b, num_dirs * h_size)
                     if num_dirs == 2 else outs[0])
        if layer_idx == num_layers - 1:
            output = layer_out
        else:
            layer_input = layer_out.astype(compute_dtype).astype(jnp.float32)  # bf16 HBM
    return output, jnp.stack(last_states, axis=0)


# ---------------------------------------------------------------------------
# Deterministic parameter construction (RNNCell-style: tanh cells)
# ---------------------------------------------------------------------------
def make_params(key, input_size, hidden_size, num_layers, bidirectional):
    num_dirs = 2 if bidirectional else 1
    params = []
    for layer_idx in range(num_layers):
        in_size = input_size if layer_idx == 0 else hidden_size * num_dirs
        layer_params = []
        for _ in range(num_dirs):
            key, k1, k2, k3 = jax.random.split(key, 4)
            w_ih = 0.1 * jax.random.normal(k1, (in_size, hidden_size), jnp.float32)
            w_hh = 0.1 * jax.random.normal(k2, (hidden_size, hidden_size), jnp.float32)
            b = 0.1 * jax.random.normal(k3, (hidden_size,), jnp.float32)  # b_ih + b_hh folded
            layer_params.append((w_ih, w_hh, b))
        params.append(layer_params)
    return params


if __name__ == "__main__":
    key = jax.random.PRNGKey(0)

    configs = [
        # (seq not divisible by chunk -> exercises T-padding + in-kernel masking, nC=2, D=2)
        dict(seq=12, batch=3, inp=20, hidden=32, layers=2, bidir=True, chunk=8),
        # (unidirectional, nC=4 -> exercises h_last residency across many chunks, D=1)
        dict(seq=16, batch=2, inp=16, hidden=32, layers=1, bidir=False, chunk=4),
    ]

    for cfg in configs:
        key, kx, kp = jax.random.split(key, 3)
        x = jax.random.normal(kx, (cfg["seq"], cfg["batch"], cfg["inp"]), jnp.float32)
        params = make_params(kp, cfg["inp"], cfg["hidden"], cfg["layers"], cfg["bidir"])

        fwd = functools.partial(
            rnn_frame_forward, num_layers=cfg["layers"], bidirectional=cfg["bidir"],
            batch_first=False, time_chunk=cfg["chunk"], compute_dtype=jnp.bfloat16)
        output, last_state = jax.jit(fwd)(x, params)
        output = jax.block_until_ready(output)
        last_state = jax.block_until_ready(last_state)

        num_dirs = 2 if cfg["bidir"] else 1
        assert output.shape == (cfg["seq"], cfg["batch"], num_dirs * cfg["hidden"])
        assert last_state.shape == (cfg["layers"] * num_dirs, cfg["batch"], cfg["hidden"])

        ref_out, ref_last = ref_forward(x, params, num_layers=cfg["layers"],
                                        bidirectional=cfg["bidir"],
                                        compute_dtype=jnp.bfloat16)
        assert jnp.allclose(output, ref_out, atol=1e-2, rtol=1e-2), \
            float(jnp.max(jnp.abs(output - ref_out)))
        assert jnp.allclose(last_state, ref_last, atol=1e-2, rtol=1e-2), \
            float(jnp.max(jnp.abs(last_state - ref_last)))

    print("KERNEL_OK")
</pallas_src>

<mosaic_0001>
module attributes {stable_mosaic.version = 11 : i64} {
  func.func @_rnn_chunk_kernel(%arg0: i32, %arg1: memref<8x8x128xbf16, #tpu.memory_space<vmem>>, %arg2: memref<8x8x128xbf16, #tpu.memory_space<vmem>>, %arg3: memref<2x8x128xf32, #tpu.memory_space<vmem>>, %arg4: memref<2x128x128xbf16, #tpu.memory_space<vmem>>, %arg5: memref<8x8x128xbf16, #tpu.memory_space<vmem>>, %arg6: memref<8x8x128xbf16, #tpu.memory_space<vmem>>, %arg7: memref<2x8x128xf32, #tpu.memory_space<vmem>>, %arg8: memref<2x8x128xf32, #tpu.memory_space<vmem>>) attributes {dimension_semantics = [#tpu.dimension_semantics<arbitrary>], iteration_bounds = array<i64: 2>, scalar_prefetch = 0 : i64, scratch_operands = 1 : i64, tpu.core_type = #tpu.core_type<tc>, window_params = [{transform_indices = @transform_0, window_bounds = array<i64: 8, 8, 128>}, {transform_indices = @transform_1, window_bounds = array<i64: 8, 8, 128>}, {pipeline_mode = #tpu.pipeline_mode<synchronous>, transform_indices = @transform_2, window_bounds = array<i64: 2, 8, 128>}, {pipeline_mode = #tpu.pipeline_mode<synchronous>, transform_indices = @transform_3, window_bounds = array<i64: 2, 128, 128>}, {transform_indices = @transform_4, window_bounds = array<i64: 8, 8, 128>}, {transform_indices = @transform_5, window_bounds = array<i64: 8, 8, 128>}, {pipeline_mode = #tpu.pipeline_mode<synchronous>, transform_indices = @transform_6, window_bounds = array<i64: 2, 8, 128>}]} {
    %c0_i32 = arith.constant 0 : i32
    %0 = arith.cmpi eq, %arg0, %c0_i32 : i32
    %1 = arith.extui %0 : i1 to i32
    %c0_i32_0 = arith.constant 0 : i32
    %2 = arith.cmpi ne, %1, %c0_i32_0 : i32
    scf.if %2 {
      %c0_192 = arith.constant 0 : index
      %c0_193 = arith.constant 0 : index
      %c0_194 = arith.constant 0 : index
      %339 = vector.load %arg3[%c0_192, %c0_193, %c0_194] : memref<2x8x128xf32, #tpu.memory_space<vmem>>, vector<2x8x128xf32>
      %c0_195 = arith.constant 0 : index
      %c0_196 = arith.constant 0 : index
      %c0_197 = arith.constant 0 : index
      %340 = vector.load %arg8[%c0_195, %c0_196, %c0_197] : memref<2x8x128xf32, #tpu.memory_space<vmem>>, vector<2x8x128xf32>
      tpu.vector_store %arg8[%c0_195, %c0_196, %c0_197], %339 {strides = array<i32>} : memref<2x8x128xf32, #tpu.memory_space<vmem>>, vector<2x8x128xf32>,
    } else {
    }
    %c0 = arith.constant 0 : index
    %c0_1 = arith.constant 0 : index
    %c0_2 = arith.constant 0 : index
    %3 = vector.load %arg8[%c0, %c0_1, %c0_2] : memref<2x8x128xf32, #tpu.memory_space<vmem>>, vector<1x8x128xf32>
    %4 = vector.shape_cast %3 : vector<1x8x128xf32> to vector<8x128xf32>
    %c1 = arith.constant 1 : index
    %c0_3 = arith.constant 0 : index
    %c0_4 = arith.constant 0 : index
    %5 = vector.load %arg8[%c1, %c0_3, %c0_4] : memref<2x8x128xf32, #tpu.memory_space<vmem>>, vector<1x8x128xf32>
    %6 = vector.shape_cast %5 : vector<1x8x128xf32> to vector<8x128xf32>
    %c0_i32_5 = arith.constant 0 : i32
    %c8_i32 = arith.constant 8 : i32
    %7 = arith.muli %arg0, %c8_i32 : i32
    %8 = arith.addi %7, %c0_i32_5 : i32
    %9 = arith.index_cast %c0_i32_5 : i32 to index
    %c0_6 = arith.constant 0 : index
    %c0_7 = arith.constant 0 : index
    %10 = vector.load %arg1[%9, %c0_6, %c0_7] : memref<8x8x128xbf16, #tpu.memory_space<vmem>>, vector<1x8x128xbf16>
    %11 = vector.shape_cast %10 : vector<1x8x128xbf16> to vector<8x128xbf16>
    %12 = arith.extf %11 : vector<8x128xbf16> to vector<8x128xf32>
    %13 = arith.truncf %4 : vector<8x128xf32> to vector<8x128xbf16>
    %c0_8 = arith.constant 0 : index
    %c0_9 = arith.constant 0 : index
    %c0_10 = arith.constant 0 : index
    %14 = vector.load %arg4[%c0_8, %c0_9, %c0_10] : memref<2x128x128xbf16, #tpu.memory_space<vmem>>, vector<1x128x128xbf16>
    %15 = vector.shape_cast %14 : vector<1x128x128xbf16> to vector<128x128xbf16>
    %cst = arith.constant dense<0.000000e+00> : vector<8x128xf32>
    %16 = tpu.matmul %13, %15, %cst {dimension_numbers = #tpu.dot_dimension_numbers<[1], [0], [0], [1], [0, 0, 1, 1], [], []>} : vector<8x128xbf16>, vector<128x128xbf16>, vector<8x128xf32> -> vector<8x128xf32>
    %17 = arith.addf %12, %16 : vector<8x128xf32>
    %18 = math.tanh %17 : vector<8x128xf32>
    %c12_i32 = arith.constant 12 : i32
    %19 = arith.cmpi slt, %8, %c12_i32 : i32
    %20 = arith.select %19, %18, %4 : vector<8x128xf32>
    %21 = arith.truncf %20 : vector<8x128xf32> to vector<8x128xbf16>
    %22 = arith.index_cast %c0_i32_5 : i32 to index
    %c0_11 = arith.constant 0 : index
    %c0_12 = arith.constant 0 : index
    %23 = vector.load %arg5[%22, %c0_11, %c0_12] : memref<8x8x128xbf16, #tpu.memory_space<vmem>>, vector<1x8x128xbf16>
    %24 = vector.shape_cast %23 : vector<1x8x128xbf16> to vector<8x128xbf16>
    %25 = vector.shape_cast %21 : vector<8x128xbf16> to vector<1x8x128xbf16>
    tpu.vector_store %arg5[%22, %c0_11, %c0_12], %25 {strides = array<i32>} : memref<8x8x128xbf16, #tpu.memory_space<vmem>>, vector<1x8x128xbf16>,
    %c7_i32 = arith.constant 7 : i32
    %26 = arith.subi %c7_i32, %c0_i32_5 : i32
    %c1_i32 = arith.constant 1 : i32
    %27 = arith.subi %c1_i32, %arg0 : i32
    %c8_i32_13 = arith.constant 8 : i32
    %28 = arith.muli %27, %c8_i32_13 : i32
    %29 = arith.addi %28, %26 : i32
    %30 = arith.index_cast %26 : i32 to index
    %c0_14 = arith.constant 0 : index
    %c0_15 = arith.constant 0 : index
    %31 = vector.load %arg2[%30, %c0_14, %c0_15] : memref<8x8x128xbf16, #tpu.memory_space<vmem>>, vector<1x8x128xbf16>
    %32 = vector.shape_cast %31 : vector<1x8x128xbf16> to vector<8x128xbf16>
    %33 = arith.extf %32 : vector<8x128xbf16> to vector<8x128xf32>
    %34 = arith.truncf %6 : vector<8x128xf32> to vector<8x128xbf16>
    %c1_16 = arith.constant 1 : index
    %c0_17 = arith.constant 0 : index
    %c0_18 = arith.constant 0 : index
    %35 = vector.load %arg4[%c1_16, %c0_17, %c0_18] : memref<2x128x128xbf16, #tpu.memory_space<vmem>>, vector<1x128x128xbf16>
    %36 = vector.shape_cast %35 : vector<1x128x128xbf16> to vector<128x128xbf16>
    %cst_19 = arith.constant dense<0.000000e+00> : vector<8x128xf32>
    %37 = tpu.matmul %34, %36, %cst_19 {dimension_numbers = #tpu.dot_dimension_numbers<[1], [0], [0], [1], [0, 0, 1, 1], [], []>} : vector<8x128xbf16>, vector<128x128xbf16>, vector<8x128xf32> -> vector<8x128xf32>
    %38 = arith.addf %33, %37 : vector<8x128xf32>
    %39 = math.tanh %38 : vector<8x128xf32>
    %c12_i32_20 = arith.constant 12 : i32
    %40 = arith.cmpi slt, %29, %c12_i32_20 : i32
    %41 = arith.select %40, %39, %6 : vector<8x128xf32>
    %42 = arith.truncf %41 : vector<8x128xf32> to vector<8x128xbf16>
    %43 = arith.index_cast %26 : i32 to index
    %c0_21 = arith.constant 0 : index
    %c0_22 = arith.constant 0 : index
    %44 = vector.load %arg6[%43, %c0_21, %c0_22] : memref<8x8x128xbf16, #tpu.memory_space<vmem>>, vector<1x8x128xbf16>
    %45 = vector.shape_cast %44 : vector<1x8x128xbf16> to vector<8x128xbf16>
    %46 = vector.shape_cast %42 : vector<8x128xbf16> to vector<1x8x128xbf16>
    tpu.vector_store %arg6[%43, %c0_21, %c0_22], %46 {strides = array<i32>} : memref<8x8x128xbf16, #tpu.memory_space<vmem>>, vector<1x8x128xbf16>,
    %c1_i32_23 = arith.constant 1 : i32
    %c8_i32_24 = arith.constant 8 : i32
    %47 = arith.muli %arg0, %c8_i32_24 : i32
    %48 = arith.addi %47, %c1_i32_23 : i32
    %49 = arith.index_cast %c1_i32_23 : i32 to index
    %c0_25 = arith.constant 0 : index
    %c0_26 = arith.constant 0 : index
    %50 = vector.load %arg1[%49, %c0_25, %c0_26] : memref<8x8x128xbf16, #tpu.memory_space<vmem>>, vector<1x8x128xbf16>
    %51 = vector.shape_cast %50 : vector<1x8x128xbf16> to vector<8x128xbf16>
    %52 = arith.extf %51 : vector<8x128xbf16> to vector<8x128xf32>
    %53 = arith.truncf %20 : vector<8x128xf32> to vector<8x128xbf16>
    %c0_27 = arith.constant 0 : index
    %c0_28 = arith.constant 0 : index
    %c0_29 = arith.constant 0 : index
    %54 = vector.load %arg4[%c0_27, %c0_28, %c0_29] : memref<2x128x128xbf16, #tpu.memory_space<vmem>>, vector<1x128x128xbf16>
    %55 = vector.shape_cast %54 : vector<1x128x128xbf16> to vector<128x128xbf16>
    %cst_30 = arith.constant dense<0.000000e+00> : vector<8x128xf32>
    %56 = tpu.matmul %53, %55, %cst_30 {dimension_numbers = #tpu.dot_dimension_numbers<[1], [0], [0], [1], [0, 0, 1, 1], [], []>} : vector<8x128xbf16>, vector<128x128xbf16>, vector<8x128xf32> -> vector<8x128xf32>
    %57 = arith.addf %52, %56 : vector<8x128xf32>
    %58 = math.tanh %57 : vector<8x128xf32>
    %c12_i32_31 = arith.constant 12 : i32
    %59 = arith.cmpi slt, %48, %c12_i32_31 : i32
    %60 = arith.select %59, %58, %20 : vector<8x128xf32>
    %61 = arith.truncf %60 : vector<8x128xf32> to vector<8x128xbf16>
    %62 = arith.index_cast %c1_i32_23 : i32 to index
    %c0_32 = arith.constant 0 : index
    %c0_33 = arith.constant 0 : index
    %63 = vector.load %arg5[%62, %c0_32, %c0_33] : memref<8x8x128xbf16, #tpu.memory_space<vmem>>, vector<1x8x128xbf16>
    %64 = vector.shape_cast %63 : vector<1x8x128xbf16> to vector<8x128xbf16>
    %65 = vector.shape_cast %61 : vector<8x128xbf16> to vector<1x8x128xbf16>
    tpu.vector_store %arg5[%62, %c0_32, %c0_33], %65 {strides = array<i32>} : memref<8x8x128xbf16, #tpu.memory_space<vmem>>, vector<1x8x128xbf16>,
    %c7_i32_34 = arith.constant 7 : i32
    %66 = arith.subi %c7_i32_34, %c1_i32_23 : i32
    %c1_i32_35 = arith.constant 1 : i32
    %67 = arith.subi %c1_i32_35, %arg0 : i32
    %c8_i32_36 = arith.constant 8 : i32
    %68 = arith.muli %67, %c8_i32_36 : i32
    %69 = arith.addi %68, %66 : i32
    %70 = arith.index_cast %66 : i32 to index
    %c0_37 = arith.constant 0 : index
    %c0_38 = arith.constant 0 : index
    %71 = vector.load %arg2[%70, %c0_37, %c0_38] : memref<8x8x128xbf16, #tpu.memory_space<vmem>>, vector<1x8x128xbf16>
    %72 = vector.shape_cast %71 : vector<1x8x128xbf16> to vector<8x128xbf16>
    %73 = arith.extf %72 : vector<8x128xbf16> to vector<8x128xf32>
    %74 = arith.truncf %41 : vector<8x128xf32> to vector<8x128xbf16>
    %c1_39 = arith.constant 1 : index
    %c0_40 = arith.constant 0 : index
    %c0_41 = arith.constant 0 : index
    %75 = vector.load %arg4[%c1_39, %c0_40, %c0_41] : memref<2x128x128xbf16, #tpu.memory_space<vmem>>, vector<1x128x128xbf16>
    %76 = vector.shape_cast %75 : vector<1x128x128xbf16> to vector<128x128xbf16>
    %cst_42 = arith.constant dense<0.000000e+00> : vector<8x128xf32>
    %77 = tpu.matmul %74, %76, %cst_42 {dimension_numbers = #tpu.dot_dimension_numbers<[1], [0], [0], [1], [0, 0, 1, 1], [], []>} : vector<8x128xbf16>, vector<128x128xbf16>, vector<8x128xf32> -> vector<8x128xf32>
    %78 = arith.addf %73, %77 : vector<8x128xf32>
    %79 = math.tanh %78 : vector<8x128xf32>
    %c12_i32_43 = arith.constant 12 : i32
    %80 = arith.cmpi slt, %69, %c12_i32_43 : i32
    %81 = arith.select %80, %79, %41 : vector<8x128xf32>
    %82 = arith.truncf %81 : vector<8x128xf32> to vector<8x128xbf16>
    %83 = arith.index_cast %66 : i32 to index
    %c0_44 = arith.constant 0 : index
    %c0_45 = arith.constant 0 : index
    %84 = vector.load %arg6[%83, %c0_44, %c0_45] : memref<8x8x128xbf16, #tpu.memory_space<vmem>>, vector<1x8x128xbf16>
    %85 = vector.shape_cast %84 : vector<1x8x128xbf16> to vector<8x128xbf16>
    %86 = vector.shape_cast %82 : vector<8x128xbf16> to vector<1x8x128xbf16>
    tpu.vector_store %arg6[%83, %c0_44, %c0_45], %86 {strides = array<i32>} : memref<8x8x128xbf16, #tpu.memory_space<vmem>>, vector<1x8x128xbf16>,
    %c2_i32 = arith.constant 2 : i32
    %c8_i32_46 = arith.constant 8 : i32
    %87 = arith.muli %arg0, %c8_i32_46 : i32
    %88 = arith.addi %87, %c2_i32 : i32
    %89 = arith.index_cast %c2_i32 : i32 to index
    %c0_47 = arith.constant 0 : index
    %c0_48 = arith.constant 0 : index
    %90 = vector.load %arg1[%89, %c0_47, %c0_48] : memref<8x8x128xbf16, #tpu.memory_space<vmem>>, vector<1x8x128xbf16>
    %91 = vector.shape_cast %90 : vector<1x8x128xbf16> to vector<8x128xbf16>
    %92 = arith.extf %91 : vector<8x128xbf16> to vector<8x128xf32>
    %93 = arith.truncf %60 : vector<8x128xf32> to vector<8x128xbf16>
    %c0_49 = arith.constant 0 : index
    %c0_50 = arith.constant 0 : index
    %c0_51 = arith.constant 0 : index
    %94 = vector.load %arg4[%c0_49, %c0_50, %c0_51] : memref<2x128x128xbf16, #tpu.memory_space<vmem>>, vector<1x128x128xbf16>
    %95 = vector.shape_cast %94 : vector<1x128x128xbf16> to vector<128x128xbf16>
    %cst_52 = arith.constant dense<0.000000e+00> : vector<8x128xf32>
    %96 = tpu.matmul %93, %95, %cst_52 {dimension_numbers = #tpu.dot_dimension_numbers<[1], [0], [0], [1], [0, 0, 1, 1], [], []>} : vector<8x128xbf16>, vector<128x128xbf16>, vector<8x128xf32> -> vector<8x128xf32>
    %97 = arith.addf %92, %96 : vector<8x128xf32>
    %98 = math.tanh %97 : vector<8x128xf32>
    %c12_i32_53 = arith.constant 12 : i32
    %99 = arith.cmpi slt, %88, %c12_i32_53 : i32
    %100 = arith.select %99, %98, %60 : vector<8x128xf32>
    %101 = arith.truncf %100 : vector<8x128xf32> to vector<8x128xbf16>
    %102 = arith.index_cast %c2_i32 : i32 to index
    %c0_54 = arith.constant 0 : index
    %c0_55 = arith.constant 0 : index
    %103 = vector.load %arg5[%102, %c0_54, %c0_55] : memref<8x8x128xbf16, #tpu.memory_space<vmem>>, vector<1x8x128xbf16>
    %104 = vector.shape_cast %103 : vector<1x8x128xbf16> to vector<8x128xbf16>
    %105 = vector.shape_cast %101 : vector<8x128xbf16> to vector<1x8x128xbf16>
    tpu.vector_store %arg5[%102, %c0_54, %c0_55], %105 {strides = array<i32>} : memref<8x8x128xbf16, #tpu.memory_space<vmem>>, vector<1x8x128xbf16>,
    %c7_i32_56 = arith.constant 7 : i32
    %106 = arith.subi %c7_i32_56, %c2_i32 : i32
    %c1_i32_57 = arith.constant 1 : i32
    %107 = arith.subi %c1_i32_57, %arg0 : i32
    %c8_i32_58 = arith.constant 8 : i32
    %108 = arith.muli %107, %c8_i32_58 : i32
    %109 = arith.addi %108, %106 : i32
    %110 = arith.index_cast %106 : i32 to index
    %c0_59 = arith.constant 0 : index
    %c0_60 = arith.constant 0 : index
    %111 = vector.load %arg2[%110, %c0_59, %c0_60] : memref<8x8x128xbf16, #tpu.memory_space<vmem>>, vector<1x8x128xbf16>
    %112 = vector.shape_cast %111 : vector<1x8x128xbf16> to vector<8x128xbf16>
    %113 = arith.extf %112 : vector<8x128xbf16> to vector<8x128xf32>
    %114 = arith.truncf %81 : vector<8x128xf32> to vector<8x128xbf16>
    %c1_61 = arith.constant 1 : index
    %c0_62 = arith.constant 0 : index
    %c0_63 = arith.constant 0 : index
    %115 = vector.load %arg4[%c1_61, %c0_62, %c0_63] : memref<2x128x128xbf16, #tpu.memory_space<vmem>>, vector<1x128x128xbf16>
    %116 = vector.shape_cast %115 : vector<1x128x128xbf16> to vector<128x128xbf16>
    %cst_64 = arith.constant dense<0.000000e+00> : vector<8x128xf32>
    %117 = tpu.matmul %114, %116, %cst_64 {dimension_numbers = #tpu.dot_dimension_numbers<[1], [0], [0], [1], [0, 0, 1, 1], [], []>} : vector<8x128xbf16>, vector<128x128xbf16>, vector<8x128xf32> -> vector<8x128xf32>
    %118 = arith.addf %113, %117 : vector<8x128xf32>
    %119 = math.tanh %118 : vector<8x128xf32>
    %c12_i32_65 = arith.constant 12 : i32
    %120 = arith.cmpi slt, %109, %c12_i32_65 : i32
    %121 = arith.select %120, %119, %81 : vector<8x128xf32>
    %122 = arith.truncf %121 : vector<8x128xf32> to vector<8x128xbf16>
    %123 = arith.index_cast %106 : i32 to index
    %c0_66 = arith.constant 0 : index
    %c0_67 = arith.constant 0 : index
    %124 = vector.load %arg6[%123, %c0_66, %c0_67] : memref<8x8x128xbf16, #tpu.memory_space<vmem>>, vector<1x8x128xbf16>
    %125 = vector.shape_cast %124 : vector<1x8x128xbf16> to vector<8x128xbf16>
    %126 = vector.shape_cast %122 : vector<8x128xbf16> to vector<1x8x128xbf16>
    tpu.vector_store %arg6[%123, %c0_66, %c0_67], %126 {strides = array<i32>} : memref<8x8x128xbf16, #tpu.memory_space<vmem>>, vector<1x8x128xbf16>,
    %c3_i32 = arith.constant 3 : i32
    %c8_i32_68 = arith.constant 8 : i32
    %127 = arith.muli %arg0, %c8_i32_68 : i32
    %128 = arith.addi %127, %c3_i32 : i32
    %129 = arith.index_cast %c3_i32 : i32 to index
    %c0_69 = arith.constant 0 : index
    %c0_70 = arith.constant 0 : index
    %130 = vector.load %arg1[%129, %c0_69, %c0_70] : memref<8x8x128xbf16, #tpu.memory_space<vmem>>, vector<1x8x128xbf16>
    %131 = vector.shape_cast %130 : vector<1x8x128xbf16> to vector<8x128xbf16>
    %132 = arith.extf %131 : vector<8x128xbf16> to vector<8x128xf32>
    %133 = arith.truncf %100 : vector<8x128xf32> to vector<8x128xbf16>
    %c0_71 = arith.constant 0 : index
    %c0_72 = arith.constant 0 : index
    %c0_73 = arith.constant 0 : index
    %134 = vector.load %arg4[%c0_71, %c0_72, %c0_73] : memref<2x128x128xbf16, #tpu.memory_space<vmem>>, vector<1x128x128xbf16>
    %135 = vector.shape_cast %134 : vector<1x128x128xbf16> to vector<128x128xbf16>
    %cst_74 = arith.constant dense<0.000000e+00> : vector<8x128xf32>
    %136 = tpu.matmul %133, %135, %cst_74 {dimension_numbers = #tpu.dot_dimension_numbers<[1], [0], [0], [1], [0, 0, 1, 1], [], []>} : vector<8x128xbf16>, vector<128x128xbf16>, vector<8x128xf32> -> vector<8x128xf32>
    %137 = arith.addf %132, %136 : vector<8x128xf32>
    %138 = math.tanh %137 : vector<8x128xf32>
    %c12_i32_75 = arith.constant 12 : i32
    %139 = arith.cmpi slt, %128, %c12_i32_75 : i32
    %140 = arith.select %139, %138, %100 : vector<8x128xf32>
    %141 = arith.truncf %140 : vector<8x128xf32> to vector<8x128xbf16>
    %142 = arith.index_cast %c3_i32 : i32 to index
    %c0_76 = arith.constant 0 : index
    %c0_77 = arith.constant 0 : index
    %143 = vector.load %arg5[%142, %c0_76, %c0_77] : memref<8x8x128xbf16, #tpu.memory_space<vmem>>, vector<1x8x128xbf16>
    %144 = vector.shape_cast %143 : vector<1x8x128xbf16> to vector<8x128xbf16>
    %145 = vector.shape_cast %141 : vector<8x128xbf16> to vector<1x8x128xbf16>
    tpu.vector_store %arg5[%142, %c0_76, %c0_77], %145 {strides = array<i32>} : memref<8x8x128xbf16, #tpu.memory_space<vmem>>, vector<1x8x128xbf16>,
    %c7_i32_78 = arith.constant 7 : i32
    %146 = arith.subi %c7_i32_78, %c3_i32 : i32
    %c1_i32_79 = arith.constant 1 : i32
    %147 = arith.subi %c1_i32_79, %arg0 : i32
    %c8_i32_80 = arith.constant 8 : i32
    %148 = arith.muli %147, %c8_i32_80 : i32
    %149 = arith.addi %148, %146 : i32
    %150 = arith.index_cast %146 : i32 to index
    %c0_81 = arith.constant 0 : index
    %c0_82 = arith.constant 0 : index
    %151 = vector.load %arg2[%150, %c0_81, %c0_82] : memref<8x8x128xbf16, #tpu.memory_space<vmem>>, vector<1x8x128xbf16>
    %152 = vector.shape_cast %151 : vector<1x8x128xbf16> to vector<8x128xbf16>
    %153 = arith.extf %152 : vector<8x128xbf16> to vector<8x128xf32>
    %154 = arith.truncf %121 : vector<8x128xf32> to vector<8x128xbf16>
    %c1_83 = arith.constant 1 : index
    %c0_84 = arith.constant 0 : index
    %c0_85 = arith.constant 0 : index
    %155 = vector.load %arg4[%c1_83, %c0_84, %c0_85] : memref<2x128x128xbf16, #tpu.memory_space<vmem>>, vector<1x128x128xbf16>
    %156 = vector.shape_cast %155 : vector<1x128x128xbf16> to vector<128x128xbf16>
    %cst_86 = arith.constant dense<0.000000e+00> : vector<8x128xf32>
    %157 = tpu.matmul %154, %156, %cst_86 {dimension_numbers = #tpu.dot_dimension_numbers<[1], [0], [0], [1], [0, 0, 1, 1], [], []>} : vector<8x128xbf16>, vector<128x128xbf16>, vector<8x128xf32> -> vector<8x128xf32>
    %158 = arith.addf %153, %157 : vector<8x128xf32>
    %159 = math.tanh %158 : vector<8x128xf32>
    %c12_i32_87 = arith.constant 12 : i32
    %160 = arith.cmpi slt, %149, %c12_i32_87 : i32
    %161 = arith.select %160, %159, %121 : vector<8x128xf32>
    %162 = arith.truncf %161 : vector<8x128xf32> to vector<8x128xbf16>
    %163 = arith.index_cast %146 : i32 to index
    %c0_88 = arith.constant 0 : index
    %c0_89 = arith.constant 0 : index
    %164 = vector.load %arg6[%163, %c0_88, %c0_89] : memref<8x8x128xbf16, #tpu.memory_space<vmem>>, vector<1x8x128xbf16>
    %165 = vector.shape_cast %164 : vector<1x8x128xbf16> to vector<8x128xbf16>
    %166 = vector.shape_cast %162 : vector<8x128xbf16> to vector<1x8x128xbf16>
    tpu.vector_store %arg6[%163, %c0_88, %c0_89], %166 {strides = array<i32>} : memref<8x8x128xbf16, #tpu.memory_space<vmem>>, vector<1x8x128xbf16>,
    %c4_i32 = arith.constant 4 : i32
    %c8_i32_90 = arith.constant 8 : i32
    %167 = arith.muli %arg0, %c8_i32_90 : i32
    %168 = arith.addi %167, %c4_i32 : i32
    %169 = arith.index_cast %c4_i32 : i32 to index
    %c0_91 = arith.constant 0 : index
    %c0_92 = arith.constant 0 : index
    %170 = vector.load %arg1[%169, %c0_91, %c0_92] : memref<8x8x128xbf16, #tpu.memory_space<vmem>>, vector<1x8x128xbf16>
    %171 = vector.shape_cast %170 : vector<1x8x128xbf16> to vector<8x128xbf16>
    %172 = arith.extf %171 : vector<8x128xbf16> to vector<8x128xf32>
    %173 = arith.truncf %140 : vector<8x128xf32> to vector<8x128xbf16>
    %c0_93 = arith.constant 0 : index
    %c0_94 = arith.constant 0 : index
    %c0_95 = arith.constant 0 : index
    %174 = vector.load %arg4[%c0_93, %c0_94, %c0_95] : memref<2x128x128xbf16, #tpu.memory_space<vmem>>, vector<1x128x128xbf16>
    %175 = vector.shape_cast %174 : vector<1x128x128xbf16> to vector<128x128xbf16>
    %cst_96 = arith.constant dense<0.000000e+00> : vector<8x128xf32>
    %176 = tpu.matmul %173, %175, %cst_96 {dimension_numbers = #tpu.dot_dimension_numbers<[1], [0], [0], [1], [0, 0, 1, 1], [], []>} : vector<8x128xbf16>, vector<128x128xbf16>, vector<8x128xf32> -> vector<8x128xf32>
    %177 = arith.addf %172, %176 : vector<8x128xf32>
    %178 = math.tanh %177 : vector<8x128xf32>
    %c12_i32_97 = arith.constant 12 : i32
    %179 = arith.cmpi slt, %168, %c12_i32_97 : i32
    %180 = arith.select %179, %178, %140 : vector<8x128xf32>
    %181 = arith.truncf %180 : vector<8x128xf32> to vector<8x128xbf16>
    %182 = arith.index_cast %c4_i32 : i32 to index
    %c0_98 = arith.constant 0 : index
    %c0_99 = arith.constant 0 : index
    %183 = vector.load %arg5[%182, %c0_98, %c0_99] : memref<8x8x128xbf16, #tpu.memory_space<vmem>>, vector<1x8x128xbf16>
    %184 = vector.shape_cast %183 : vector<1x8x128xbf16> to vector<8x128xbf16>
    %185 = vector.shape_cast %181 : vector<8x128xbf16> to vector<1x8x128xbf16>
    tpu.vector_store %arg5[%182, %c0_98, %c0_99], %185 {strides = array<i32>} : memref<8x8x128xbf16, #tpu.memory_space<vmem>>, vector<1x8x128xbf16>,
    %c7_i32_100 = arith.constant 7 : i32
    %186 = arith.subi %c7_i32_100, %c4_i32 : i32
    %c1_i32_101 = arith.constant 1 : i32
    %187 = arith.subi %c1_i32_101, %arg0 : i32
    %c8_i32_102 = arith.constant 8 : i32
    %188 = arith.muli %187, %c8_i32_102 : i32
    %189 = arith.addi %188, %186 : i32
    %190 = arith.index_cast %186 : i32 to index
    %c0_103 = arith.constant 0 : index
    %c0_104 = arith.constant 0 : index
    %191 = vector.load %arg2[%190, %c0_103, %c0_104] : memref<8x8x128xbf16, #tpu.memory_space<vmem>>, vector<1x8x128xbf16>
    %192 = vector.shape_cast %191 : vector<1x8x128xbf16> to vector<8x128xbf16>
    %193 = arith.extf %192 : vector<8x128xbf16> to vector<8x128xf32>
    %194 = arith.truncf %161 : vector<8x128xf32> to vector<8x128xbf16>
    %c1_105 = arith.constant 1 : index
    %c0_106 = arith.constant 0 : index
    %c0_107 = arith.constant 0 : index
    %195 = vector.load %arg4[%c1_105, %c0_106, %c0_107] : memref<2x128x128xbf16, #tpu.memory_space<vmem>>, vector<1x128x128xbf16>
    %196 = vector.shape_cast %195 : vector<1x128x128xbf16> to vector<128x128xbf16>
    %cst_108 = arith.constant dense<0.000000e+00> : vector<8x128xf32>
    %197 = tpu.matmul %194, %196, %cst_108 {dimension_numbers = #tpu.dot_dimension_numbers<[1], [0], [0], [1], [0, 0, 1, 1], [], []>} : vector<8x128xbf16>, vector<128x128xbf16>, vector<8x128xf32> -> vector<8x128xf32>
    %198 = arith.addf %193, %197 : vector<8x128xf32>
    %199 = math.tanh %198 : vector<8x128xf32>
    %c12_i32_109 = arith.constant 12 : i32
    %200 = arith.cmpi slt, %189, %c12_i32_109 : i32
    %201 = arith.select %200, %199, %161 : vector<8x128xf32>
    %202 = arith.truncf %201 : vector<8x128xf32> to vector<8x128xbf16>
    %203 = arith.index_cast %186 : i32 to index
    %c0_110 = arith.constant 0 : index
    %c0_111 = arith.constant 0 : index
    %204 = vector.load %arg6[%203, %c0_110, %c0_111] : memref<8x8x128xbf16, #tpu.memory_space<vmem>>, vector<1x8x128xbf16>
    %205 = vector.shape_cast %204 : vector<1x8x128xbf16> to vector<8x128xbf16>
    %206 = vector.shape_cast %202 : vector<8x128xbf16> to vector<1x8x128xbf16>
    tpu.vector_store %arg6[%203, %c0_110, %c0_111], %206 {strides = array<i32>} : memref<8x8x128xbf16, #tpu.memory_space<vmem>>, vector<1x8x128xbf16>,
    %c5_i32 = arith.constant 5 : i32
    %c8_i32_112 = arith.constant 8 : i32
    %207 = arith.muli %arg0, %c8_i32_112 : i32
    %208 = arith.addi %207, %c5_i32 : i32
    %209 = arith.index_cast %c5_i32 : i32 to index
    %c0_113 = arith.constant 0 : index
    %c0_114 = arith.constant 0 : index
    %210 = vector.load %arg1[%209, %c0_113, %c0_114] : memref<8x8x128xbf16, #tpu.memory_space<vmem>>, vector<1x8x128xbf16>
    %211 = vector.shape_cast %210 : vector<1x8x128xbf16> to vector<8x128xbf16>
    %212 = arith.extf %211 : vector<8x128xbf16> to vector<8x128xf32>
    %213 = arith.truncf %180 : vector<8x128xf32> to vector<8x128xbf16>
    %c0_115 = arith.constant 0 : index
    %c0_116 = arith.constant 0 : index
    %c0_117 = arith.constant 0 : index
    %214 = vector.load %arg4[%c0_115, %c0_116, %c0_117] : memref<2x128x128xbf16, #tpu.memory_space<vmem>>, vector<1x128x128xbf16>
    %215 = vector.shape_cast %214 : vector<1x128x128xbf16> to vector<128x128xbf16>
    %cst_118 = arith.constant dense<0.000000e+00> : vector<8x128xf32>
    %216 = tpu.matmul %213, %215, %cst_118 {dimension_numbers = #tpu.dot_dimension_numbers<[1], [0], [0], [1], [0, 0, 1, 1], [], []>} : vector<8x128xbf16>, vector<128x128xbf16>, vector<8x128xf32> -> vector<8x128xf32>
    %217 = arith.addf %212, %216 : vector<8x128xf32>
    %218 = math.tanh %217 : vector<8x128xf32>
    %c12_i32_119 = arith.constant 12 : i32
    %219 = arith.cmpi slt, %208, %c12_i32_119 : i32
    %220 = arith.select %219, %218, %180 : vector<8x128xf32>
    %221 = arith.truncf %220 : vector<8x128xf32> to vector<8x128xbf16>
    %222 = arith.index_cast %c5_i32 : i32 to index
    %c0_120 = arith.constant 0 : index
    %c0_121 = arith.constant 0 : index
    %223 = vector.load %arg5[%222, %c0_120, %c0_121] : memref<8x8x128xbf16, #tpu.memory_space<vmem>>, vector<1x8x128xbf16>
    %224 = vector.shape_cast %223 : vector<1x8x128xbf16> to vector<8x128xbf16>
    %225 = vector.shape_cast %221 : vector<8x128xbf16> to vector<1x8x128xbf16>
    tpu.vector_store %arg5[%222, %c0_120, %c0_121], %225 {strides = array<i32>} : memref<8x8x128xbf16, #tpu.memory_space<vmem>>, vector<1x8x128xbf16>,
    %c7_i32_122 = arith.constant 7 : i32
    %226 = arith.subi %c7_i32_122, %c5_i32 : i32
    %c1_i32_123 = arith.constant 1 : i32
    %227 = arith.subi %c1_i32_123, %arg0 : i32
    %c8_i32_124 = arith.constant 8 : i32
    %228 = arith.muli %227, %c8_i32_124 : i32
    %229 = arith.addi %228, %226 : i32
    %230 = arith.index_cast %226 : i32 to index
    %c0_125 = arith.constant 0 : index
    %c0_126 = arith.constant 0 : index
    %231 = vector.load %arg2[%230, %c0_125, %c0_126] : memref<8x8x128xbf16, #tpu.memory_space<vmem>>, vector<1x8x128xbf16>
    %232 = vector.shape_cast %231 : vector<1x8x128xbf16> to vector<8x128xbf16>
    %233 = arith.extf %232 : vector<8x128xbf16> to vector<8x128xf32>
    %234 = arith.truncf %201 : vector<8x128xf32> to vector<8x128xbf16>
    %c1_127 = arith.constant 1 : index
    %c0_128 = arith.constant 0 : index
    %c0_129 = arith.constant 0 : index
    %235 = vector.load %arg4[%c1_127, %c0_128, %c0_129] : memref<2x128x128xbf16, #tpu.memory_space<vmem>>, vector<1x128x128xbf16>
    %236 = vector.shape_cast %235 : vector<1x128x128xbf16> to vector<128x128xbf16>
    %cst_130 = arith.constant dense<0.000000e+00> : vector<8x128xf32>
    %237 = tpu.matmul %234, %236, %cst_130 {dimension_numbers = #tpu.dot_dimension_numbers<[1], [0], [0], [1], [0, 0, 1, 1], [], []>} : vector<8x128xbf16>, vector<128x128xbf16>, vector<8x128xf32> -> vector<8x128xf32>
    %238 = arith.addf %233, %237 : vector<8x128xf32>
    %239 = math.tanh %238 : vector<8x128xf32>
    %c12_i32_131 = arith.constant 12 : i32
    %240 = arith.cmpi slt, %229, %c12_i32_131 : i32
    %241 = arith.select %240, %239, %201 : vector<8x128xf32>
    %242 = arith.truncf %241 : vector<8x128xf32> to vector<8x128xbf16>
    %243 = arith.index_cast %226 : i32 to index
    %c0_132 = arith.constant 0 : index
    %c0_133 = arith.constant 0 : index
    %244 = vector.load %arg6[%243, %c0_132, %c0_133] : memref<8x8x128xbf16, #tpu.memory_space<vmem>>, vector<1x8x128xbf16>
    %245 = vector.shape_cast %244 : vector<1x8x128xbf16> to vector<8x128xbf16>
    %246 = vector.shape_cast %242 : vector<8x128xbf16> to vector<1x8x128xbf16>
    tpu.vector_store %arg6[%243, %c0_132, %c0_133], %246 {strides = array<i32>} : memref<8x8x128xbf16, #tpu.memory_space<vmem>>, vector<1x8x128xbf16>,
    %c6_i32 = arith.constant 6 : i32
    %c8_i32_134 = arith.constant 8 : i32
    %247 = arith.muli %arg0, %c8_i32_134 : i32
    %248 = arith.addi %247, %c6_i32 : i32
    %249 = arith.index_cast %c6_i32 : i32 to index
    %c0_135 = arith.constant 0 : index
    %c0_136 = arith.constant 0 : index
    %250 = vector.load %arg1[%249, %c0_135, %c0_136] : memref<8x8x128xbf16, #tpu.memory_space<vmem>>, vector<1x8x128xbf16>
    %251 = vector.shape_cast %250 : vector<1x8x128xbf16> to vector<8x128xbf16>
    %252 = arith.extf %251 : vector<8x128xbf16> to vector<8x128xf32>
    %253 = arith.truncf %220 : vector<8x128xf32> to vector<8x128xbf16>
    %c0_137 = arith.constant 0 : index
    %c0_138 = arith.constant 0 : index
    %c0_139 = arith.constant 0 : index
    %254 = vector.load %arg4[%c0_137, %c0_138, %c0_139] : memref<2x128x128xbf16, #tpu.memory_space<vmem>>, vector<1x128x128xbf16>
    %255 = vector.shape_cast %254 : vector<1x128x128xbf16> to vector<128x128xbf16>
    %cst_140 = arith.constant dense<0.000000e+00> : vector<8x128xf32>
    %256 = tpu.matmul %253, %255, %cst_140 {dimension_numbers = #tpu.dot_dimension_numbers<[1], [0], [0], [1], [0, 0, 1, 1], [], []>} : vector<8x128xbf16>, vector<128x128xbf16>, vector<8x128xf32> -> vector<8x128xf32>
    %257 = arith.addf %252, %256 : vector<8x128xf32>
    %258 = math.tanh %257 : vector<8x128xf32>
    %c12_i32_141 = arith.constant 12 : i32
    %259 = arith.cmpi slt, %248, %c12_i32_141 : i32
    %260 = arith.select %259, %258, %220 : vector<8x128xf32>
    %261 = arith.truncf %260 : vector<8x128xf32> to vector<8x128xbf16>
    %262 = arith.index_cast %c6_i32 : i32 to index
    %c0_142 = arith.constant 0 : index
    %c0_143 = arith.constant 0 : index
    %263 = vector.load %arg5[%262, %c0_142, %c0_143] : memref<8x8x128xbf16, #tpu.memory_space<vmem>>, vector<1x8x128xbf16>
    %264 = vector.shape_cast %263 : vector<1x8x128xbf16> to vector<8x128xbf16>
    %265 = vector.shape_cast %261 : vector<8x128xbf16> to vector<1x8x128xbf16>
    tpu.vector_store %arg5[%262, %c0_142, %c0_143], %265 {strides = array<i32>} : memref<8x8x128xbf16, #tpu.memory_space<vmem>>, vector<1x8x128xbf16>,
    %c7_i32_144 = arith.constant 7 : i32
    %266 = arith.subi %c7_i32_144, %c6_i32 : i32
    %c1_i32_145 = arith.constant 1 : i32
    %267 = arith.subi %c1_i32_145, %arg0 : i32
    %c8_i32_146 = arith.constant 8 : i32
    %268 = arith.muli %267, %c8_i32_146 : i32
    %269 = arith.addi %268, %266 : i32
    %270 = arith.index_cast %266 : i32 to index
    %c0_147 = arith.constant 0 : index
    %c0_148 = arith.constant 0 : index
    %271 = vector.load %arg2[%270, %c0_147, %c0_148] : memref<8x8x128xbf16, #tpu.memory_space<vmem>>, vector<1x8x128xbf16>
    %272 = vector.shape_cast %271 : vector<1x8x128xbf16> to vector<8x128xbf16>
    %273 = arith.extf %272 : vector<8x128xbf16> to vector<8x128xf32>
    %274 = arith.truncf %241 : vector<8x128xf32> to vector<8x128xbf16>
    %c1_149 = arith.constant 1 : index
    %c0_150 = arith.constant 0 : index
    %c0_151 = arith.constant 0 : index
    %275 = vector.load %arg4[%c1_149, %c0_150, %c0_151] : memref<2x128x128xbf16, #tpu.memory_space<vmem>>, vector<1x128x128xbf16>
    %276 = vector.shape_cast %275 : vector<1x128x128xbf16> to vector<128x128xbf16>
    %cst_152 = arith.constant dense<0.000000e+00> : vector<8x128xf32>
    %277 = tpu.matmul %274, %276, %cst_152 {dimension_numbers = #tpu.dot_dimension_numbers<[1], [0], [0], [1], [0, 0, 1, 1], [], []>} : vector<8x128xbf16>, vector<128x128xbf16>, vector<8x128xf32> -> vector<8x128xf32>
    %278 = arith.addf %273, %277 : vector<8x128xf32>
    %279 = math.tanh %278 : vector<8x128xf32>
    %c12_i32_153 = arith.constant 12 : i32
    %280 = arith.cmpi slt, %269, %c12_i32_153 : i32
    %281 = arith.select %280, %279, %241 : vector<8x128xf32>
    %282 = arith.truncf %281 : vector<8x128xf32> to vector<8x128xbf16>
    %283 = arith.index_cast %266 : i32 to index
    %c0_154 = arith.constant 0 : index
    %c0_155 = arith.constant 0 : index
    %284 = vector.load %arg6[%283, %c0_154, %c0_155] : memref<8x8x128xbf16, #tpu.memory_space<vmem>>, vector<1x8x128xbf16>
    %285 = vector.shape_cast %284 : vector<1x8x128xbf16> to vector<8x128xbf16>
    %286 = vector.shape_cast %282 : vector<8x128xbf16> to vector<1x8x128xbf16>
    tpu.vector_store %arg6[%283, %c0_154, %c0_155], %286 {strides = array<i32>} : memref<8x8x128xbf16, #tpu.memory_space<vmem>>, vector<1x8x128xbf16>,
    %c7_i32_156 = arith.constant 7 : i32
    %c8_i32_157 = arith.constant 8 : i32
    %287 = arith.muli %arg0, %c8_i32_157 : i32
    %288 = arith.addi %287, %c7_i32_156 : i32
    %289 = arith.index_cast %c7_i32_156 : i32 to index
    %c0_158 = arith.constant 0 : index
    %c0_159 = arith.constant 0 : index
    %290 = vector.load %arg1[%289, %c0_158, %c0_159] : memref<8x8x128xbf16, #tpu.memory_space<vmem>>, vector<1x8x128xbf16>
    %291 = vector.shape_cast %290 : vector<1x8x128xbf16> to vector<8x128xbf16>
    %292 = arith.extf %291 : vector<8x128xbf16> to vector<8x128xf32>
    %293 = arith.truncf %260 : vector<8x128xf32> to vector<8x128xbf16>
    %c0_160 = arith.constant 0 : index
    %c0_161 = arith.constant 0 : index
    %c0_162 = arith.constant 0 : index
    %294 = vector.load %arg4[%c0_160, %c0_161, %c0_162] : memref<2x128x128xbf16, #tpu.memory_space<vmem>>, vector<1x128x128xbf16>
    %295 = vector.shape_cast %294 : vector<1x128x128xbf16> to vector<128x128xbf16>
    %cst_163 = arith.constant dense<0.000000e+00> : vector<8x128xf32>
    %296 = tpu.matmul %293, %295, %cst_163 {dimension_numbers = #tpu.dot_dimension_numbers<[1], [0], [0], [1], [0, 0, 1, 1], [], []>} : vector<8x128xbf16>, vector<128x128xbf16>, vector<8x128xf32> -> vector<8x128xf32>
    %297 = arith.addf %292, %296 : vector<8x128xf32>
    %298 = math.tanh %297 : vector<8x128xf32>
    %c12_i32_164 = arith.constant 12 : i32
    %299 = arith.cmpi slt, %288, %c12_i32_164 : i32
    %300 = arith.select %299, %298, %260 : vector<8x128xf32>
    %301 = arith.truncf %300 : vector<8x128xf32> to vector<8x128xbf16>
    %302 = arith.index_cast %c7_i32_156 : i32 to index
    %c0_165 = arith.constant 0 : index
    %c0_166 = arith.constant 0 : index
    %303 = vector.load %arg5[%302, %c0_165, %c0_166] : memref<8x8x128xbf16, #tpu.memory_space<vmem>>, vector<1x8x128xbf16>
    %304 = vector.shape_cast %303 : vector<1x8x128xbf16> to vector<8x128xbf16>
    %305 = vector.shape_cast %301 : vector<8x128xbf16> to vector<1x8x128xbf16>
    tpu.vector_store %arg5[%302, %c0_165, %c0_166], %305 {strides = array<i32>} : memref<8x8x128xbf16, #tpu.memory_space<vmem>>, vector<1x8x128xbf16>,
    %c7_i32_167 = arith.constant 7 : i32
    %306 = arith.subi %c7_i32_167, %c7_i32_156 : i32
    %c1_i32_168 = arith.constant 1 : i32
    %307 = arith.subi %c1_i32_168, %arg0 : i32
    %c8_i32_169 = arith.constant 8 : i32
    %308 = arith.muli %307, %c8_i32_169 : i32
    %309 = arith.addi %308, %306 : i32
    %310 = arith.index_cast %306 : i32 to index
    %c0_170 = arith.constant 0 : index
    %c0_171 = arith.constant 0 : index
    %311 = vector.load %arg2[%310, %c0_170, %c0_171] : memref<8x8x128xbf16, #tpu.memory_space<vmem>>, vector<1x8x128xbf16>
    %312 = vector.shape_cast %311 : vector<1x8x128xbf16> to vector<8x128xbf16>
    %313 = arith.extf %312 : vector<8x128xbf16> to vector<8x128xf32>
    %314 = arith.truncf %281 : vector<8x128xf32> to vector<8x128xbf16>
    %c1_172 = arith.constant 1 : index
    %c0_173 = arith.constant 0 : index
    %c0_174 = arith.constant 0 : index
    %315 = vector.load %arg4[%c1_172, %c0_173, %c0_174] : memref<2x128x128xbf16, #tpu.memory_space<vmem>>, vector<1x128x128xbf16>
    %316 = vector.shape_cast %315 : vector<1x128x128xbf16> to vector<128x128xbf16>
    %cst_175 = arith.constant dense<0.000000e+00> : vector<8x128xf32>
    %317 = tpu.matmul %314, %316, %cst_175 {dimension_numbers = #tpu.dot_dimension_numbers<[1], [0], [0], [1], [0, 0, 1, 1], [], []>} : vector<8x128xbf16>, vector<128x128xbf16>, vector<8x128xf32> -> vector<8x128xf32>
    %318 = arith.addf %313, %317 : vector<8x128xf32>
    %319 = math.tanh %318 : vector<8x128xf32>
    %c12_i32_176 = arith.constant 12 : i32
    %320 = arith.cmpi slt, %309, %c12_i32_176 : i32
    %321 = arith.select %320, %319, %281 : vector<8x128xf32>
    %322 = arith.truncf %321 : vector<8x128xf32> to vector<8x128xbf16>
    %323 = arith.index_cast %306 : i32 to index
    %c0_177 = arith.constant 0 : index
    %c0_178 = arith.constant 0 : index
    %324 = vector.load %arg6[%323, %c0_177, %c0_178] : memref<8x8x128xbf16, #tpu.memory_space<vmem>>, vector<1x8x128xbf16>
    %325 = vector.shape_cast %324 : vector<1x8x128xbf16> to vector<8x128xbf16>
    %326 = vector.shape_cast %322 : vector<8x128xbf16> to vector<1x8x128xbf16>
    tpu.vector_store %arg6[%323, %c0_177, %c0_178], %326 {strides = array<i32>} : memref<8x8x128xbf16, #tpu.memory_space<vmem>>, vector<1x8x128xbf16>,
    %c8_i32_179 = arith.constant 8 : i32
    %c0_180 = arith.constant 0 : index
    %c0_181 = arith.constant 0 : index
    %c0_182 = arith.constant 0 : index
    %327 = vector.load %arg8[%c0_180, %c0_181, %c0_182] : memref<2x8x128xf32, #tpu.memory_space<vmem>>, vector<1x8x128xf32>
    %328 = vector.shape_cast %327 : vector<1x8x128xf32> to vector<8x128xf32>
    %329 = vector.shape_cast %300 : vector<8x128xf32> to vector<1x8x128xf32>
    tpu.vector_store %arg8[%c0_180, %c0_181, %c0_182], %329 {strides = array<i32>} : memref<2x8x128xf32, #tpu.memory_space<vmem>>, vector<1x8x128xf32>,
    %c0_183 = arith.constant 0 : index
    %c0_184 = arith.constant 0 : index
    %c0_185 = arith.constant 0 : index
    %330 = vector.load %arg7[%c0_183, %c0_184, %c0_185] : memref<2x8x128xf32, #tpu.memory_space<vmem>>, vector<1x8x128xf32>
    %331 = vector.shape_cast %330 : vector<1x8x128xf32> to vector<8x128xf32>
    %332 = vector.shape_cast %300 : vector<8x128xf32> to vector<1x8x128xf32>
    tpu.vector_store %arg7[%c0_183, %c0_184, %c0_185], %332 {strides = array<i32>} : memref<2x8x128xf32, #tpu.memory_space<vmem>>, vector<1x8x128xf32>,
    %c1_186 = arith.constant 1 : index
    %c0_187 = arith.constant 0 : index
    %c0_188 = arith.constant 0 : index
    %333 = vector.load %arg8[%c1_186, %c0_187, %c0_188] : memref<2x8x128xf32, #tpu.memory_space<vmem>>, vector<1x8x128xf32>
    %334 = vector.shape_cast %333 : vector<1x8x128xf32> to vector<8x128xf32>
    %335 = vector.shape_cast %321 : vector<8x128xf32> to vector<1x8x128xf32>
    tpu.vector_store %arg8[%c1_186, %c0_187, %c0_188], %335 {strides = array<i32>} : memref<2x8x128xf32, #tpu.memory_space<vmem>>, vector<1x8x128xf32>,
    %c1_189 = arith.constant 1 : index
    %c0_190 = arith.constant 0 : index
    %c0_191 = arith.constant 0 : index
    %336 = vector.load %arg7[%c1_189, %c0_190, %c0_191] : memref<2x8x128xf32, #tpu.memory_space<vmem>>, vector<1x8x128xf32>
    %337 = vector.shape_cast %336 : vector<1x8x128xf32> to vector<8x128xf32>
    %338 = vector.shape_cast %321 : vector<8x128xf32> to vector<1x8x128xf32>
    tpu.vector_store %arg7[%c1_189, %c0_190, %c0_191], %338 {strides = array<i32>} : memref<2x8x128xf32, #tpu.memory_space<vmem>>, vector<1x8x128xf32>,
    return
  }
  func.func @transform_0(%arg0: i32) -> (i32, i32, i32) {
    %c0_i32 = arith.constant 0 : i32
    %c0_i32_0 = arith.constant 0 : i32
    %c0_i32_1 = arith.constant 0 : i32
    return %arg0, %c0_i32, %c0_i32_0 : i32, i32, i32
  }
  func.func @transform_1(%arg0: i32) -> (i32, i32, i32) {
    %c1_i32 = arith.constant 1 : i32
    %0 = arith.subi %c1_i32, %arg0 : i32
    %c0_i32 = arith.constant 0 : i32
    %c1_i32_0 = arith.constant 1 : i32
    %c0_i32_1 = arith.constant 0 : i32
    return %0, %c0_i32, %c1_i32_0 : i32, i32, i32
  }
  func.func @transform_2(%arg0: i32) -> (i32, i32, i32) {
    %c0_i32 = arith.constant 0 : i32
    %c0_i32_0 = arith.constant 0 : i32
    %c0_i32_1 = arith.constant 0 : i32
    %c0_i32_2 = arith.constant 0 : i32
    return %c0_i32, %c0_i32_0, %c0_i32_1 : i32, i32, i32
  }
  func.func @transform_3(%arg0: i32) -> (i32, i32, i32) {
    %c0_i32 = arith.constant 0 : i32
    %c0_i32_0 = arith.constant 0 : i32
    %c0_i32_1 = arith.constant 0 : i32
    %c0_i32_2 = arith.constant 0 : i32
    return %c0_i32, %c0_i32_0, %c0_i32_1 : i32, i32, i32
  }
  func.func @transform_4(%arg0: i32) -> (i32, i32, i32) {
    %c0_i32 = arith.constant 0 : i32
    %c0_i32_0 = arith.constant 0 : i32
    %c0_i32_1 = arith.constant 0 : i32
    return %arg0, %c0_i32, %c0_i32_0 : i32, i32, i32
  }
  func.func @transform_5(%arg0: i32) -> (i32, i32, i32) {
    %c1_i32 = arith.constant 1 : i32
    %0 = arith.subi %c1_i32, %arg0 : i32
    %c0_i32 = arith.constant 0 : i32
    %c0_i32_0 = arith.constant 0 : i32
    %c0_i32_1 = arith.constant 0 : i32
    return %0, %c0_i32, %c0_i32_0 : i32, i32, i32
  }
  func.func @transform_6(%arg0: i32) -> (i32, i32, i32) {
    %c0_i32 = arith.constant 0 : i32
    %c0_i32_0 = arith.constant 0 : i32
    %c0_i32_1 = arith.constant 0 : i32
    %c0_i32_2 = arith.constant 0 : i32
    return %c0_i32, %c0_i32_0, %c0_i32_1 : i32, i32, i32
  }
}

module attributes {stable_mosaic.version = 11 : i64} {
  func.func @_rnn_chunk_kernel(%arg0: i32, %arg1: memref<8x8x128xbf16, #tpu.memory_space<vmem>>, %arg2: memref<8x8x128xbf16, #tpu.memory_space<vmem>>, %arg3: memref<2x8x128xf32, #tpu.memory_space<vmem>>, %arg4: memref<2x128x128xbf16, #tpu.memory_space<vmem>>, %arg5: memref<8x8x128xf32, #tpu.memory_space<vmem>>, %arg6: memref<8x8x128xf32, #tpu.memory_space<vmem>>, %arg7: memref<2x8x128xf32, #tpu.memory_space<vmem>>, %arg8: memref<2x8x128xf32, #tpu.memory_space<vmem>>) attributes {dimension_semantics = [#tpu.dimension_semantics<arbitrary>], iteration_bounds = array<i64: 2>, scalar_prefetch = 0 : i64, scratch_operands = 1 : i64, tpu.core_type = #tpu.core_type<tc>, window_params = [{transform_indices = @transform_0, window_bounds = array<i64: 8, 8, 128>}, {transform_indices = @transform_1, window_bounds = array<i64: 8, 8, 128>}, {pipeline_mode = #tpu.pipeline_mode<synchronous>, transform_indices = @transform_2, window_bounds = array<i64: 2, 8, 128>}, {pipeline_mode = #tpu.pipeline_mode<synchronous>, transform_indices = @transform_3, window_bounds = array<i64: 2, 128, 128>}, {transform_indices = @transform_4, window_bounds = array<i64: 8, 8, 128>}, {transform_indices = @transform_5, window_bounds = array<i64: 8, 8, 128>}, {pipeline_mode = #tpu.pipeline_mode<synchronous>, transform_indices = @transform_6, window_bounds = array<i64: 2, 8, 128>}]} {
    %c0_i32 = arith.constant 0 : i32
    %0 = arith.cmpi eq, %arg0, %c0_i32 : i32
    %1 = arith.extui %0 : i1 to i32
    %c0_i32_0 = arith.constant 0 : i32
    %2 = arith.cmpi ne, %1, %c0_i32_0 : i32
    scf.if %2 {
      %c0_192 = arith.constant 0 : index
      %c0_193 = arith.constant 0 : index
      %c0_194 = arith.constant 0 : index
      %323 = vector.load %arg3[%c0_192, %c0_193, %c0_194] : memref<2x8x128xf32, #tpu.memory_space<vmem>>, vector<2x8x128xf32>
      %c0_195 = arith.constant 0 : index
      %c0_196 = arith.constant 0 : index
      %c0_197 = arith.constant 0 : index
      %324 = vector.load %arg8[%c0_195, %c0_196, %c0_197] : memref<2x8x128xf32, #tpu.memory_space<vmem>>, vector<2x8x128xf32>
      tpu.vector_store %arg8[%c0_195, %c0_196, %c0_197], %323 {strides = array<i32>} : memref<2x8x128xf32, #tpu.memory_space<vmem>>, vector<2x8x128xf32>,
    } else {
    }
    %c0 = arith.constant 0 : index
    %c0_1 = arith.constant 0 : index
    %c0_2 = arith.constant 0 : index
    %3 = vector.load %arg8[%c0, %c0_1, %c0_2] : memref<2x8x128xf32, #tpu.memory_space<vmem>>, vector<1x8x128xf32>
    %4 = vector.shape_cast %3 : vector<1x8x128xf32> to vector<8x128xf32>
    %c1 = arith.constant 1 : index
    %c0_3 = arith.constant 0 : index
    %c0_4 = arith.constant 0 : index
    %5 = vector.load %arg8[%c1, %c0_3, %c0_4] : memref<2x8x128xf32, #tpu.memory_space<vmem>>, vector<1x8x128xf32>
    %6 = vector.shape_cast %5 : vector<1x8x128xf32> to vector<8x128xf32>
    %c0_i32_5 = arith.constant 0 : i32
    %c8_i32 = arith.constant 8 : i32
    %7 = arith.muli %arg0, %c8_i32 : i32
    %8 = arith.addi %7, %c0_i32_5 : i32
    %9 = arith.index_cast %c0_i32_5 : i32 to index
    %c0_6 = arith.constant 0 : index
    %c0_7 = arith.constant 0 : index
    %10 = vector.load %arg1[%9, %c0_6, %c0_7] : memref<8x8x128xbf16, #tpu.memory_space<vmem>>, vector<1x8x128xbf16>
    %11 = vector.shape_cast %10 : vector<1x8x128xbf16> to vector<8x128xbf16>
    %12 = arith.extf %11 : vector<8x128xbf16> to vector<8x128xf32>
    %13 = arith.truncf %4 : vector<8x128xf32> to vector<8x128xbf16>
    %c0_8 = arith.constant 0 : index
    %c0_9 = arith.constant 0 : index
    %c0_10 = arith.constant 0 : index
    %14 = vector.load %arg4[%c0_8, %c0_9, %c0_10] : memref<2x128x128xbf16, #tpu.memory_space<vmem>>, vector<1x128x128xbf16>
    %15 = vector.shape_cast %14 : vector<1x128x128xbf16> to vector<128x128xbf16>
    %cst = arith.constant dense<0.000000e+00> : vector<8x128xf32>
    %16 = tpu.matmul %13, %15, %cst {dimension_numbers = #tpu.dot_dimension_numbers<[1], [0], [0], [1], [0, 0, 1, 1], [], []>} : vector<8x128xbf16>, vector<128x128xbf16>, vector<8x128xf32> -> vector<8x128xf32>
    %17 = arith.addf %12, %16 : vector<8x128xf32>
    %18 = math.tanh %17 : vector<8x128xf32>
    %c12_i32 = arith.constant 12 : i32
    %19 = arith.cmpi slt, %8, %c12_i32 : i32
    %20 = arith.select %19, %18, %4 : vector<8x128xf32>
    %21 = arith.index_cast %c0_i32_5 : i32 to index
    %c0_11 = arith.constant 0 : index
    %c0_12 = arith.constant 0 : index
    %22 = vector.load %arg5[%21, %c0_11, %c0_12] : memref<8x8x128xf32, #tpu.memory_space<vmem>>, vector<1x8x128xf32>
    %23 = vector.shape_cast %22 : vector<1x8x128xf32> to vector<8x128xf32>
    %24 = vector.shape_cast %20 : vector<8x128xf32> to vector<1x8x128xf32>
    tpu.vector_store %arg5[%21, %c0_11, %c0_12], %24 {strides = array<i32>} : memref<8x8x128xf32, #tpu.memory_space<vmem>>, vector<1x8x128xf32>,
    %c7_i32 = arith.constant 7 : i32
    %25 = arith.subi %c7_i32, %c0_i32_5 : i32
    %c1_i32 = arith.constant 1 : i32
    %26 = arith.subi %c1_i32, %arg0 : i32
    %c8_i32_13 = arith.constant 8 : i32
    %27 = arith.muli %26, %c8_i32_13 : i32
    %28 = arith.addi %27, %25 : i32
    %29 = arith.index_cast %25 : i32 to index
    %c0_14 = arith.constant 0 : index
    %c0_15 = arith.constant 0 : index
    %30 = vector.load %arg2[%29, %c0_14, %c0_15] : memref<8x8x128xbf16, #tpu.memory_space<vmem>>, vector<1x8x128xbf16>
    %31 = vector.shape_cast %30 : vector<1x8x128xbf16> to vector<8x128xbf16>
    %32 = arith.extf %31 : vector<8x128xbf16> to vector<8x128xf32>
    %33 = arith.truncf %6 : vector<8x128xf32> to vector<8x128xbf16>
    %c1_16 = arith.constant 1 : index
    %c0_17 = arith.constant 0 : index
    %c0_18 = arith.constant 0 : index
    %34 = vector.load %arg4[%c1_16, %c0_17, %c0_18] : memref<2x128x128xbf16, #tpu.memory_space<vmem>>, vector<1x128x128xbf16>
    %35 = vector.shape_cast %34 : vector<1x128x128xbf16> to vector<128x128xbf16>
    %cst_19 = arith.constant dense<0.000000e+00> : vector<8x128xf32>
    %36 = tpu.matmul %33, %35, %cst_19 {dimension_numbers = #tpu.dot_dimension_numbers<[1], [0], [0], [1], [0, 0, 1, 1], [], []>} : vector<8x128xbf16>, vector<128x128xbf16>, vector<8x128xf32> -> vector<8x128xf32>
    %37 = arith.addf %32, %36 : vector<8x128xf32>
    %38 = math.tanh %37 : vector<8x128xf32>
    %c12_i32_20 = arith.constant 12 : i32
    %39 = arith.cmpi slt, %28, %c12_i32_20 : i32
    %40 = arith.select %39, %38, %6 : vector<8x128xf32>
    %41 = arith.index_cast %25 : i32 to index
    %c0_21 = arith.constant 0 : index
    %c0_22 = arith.constant 0 : index
    %42 = vector.load %arg6[%41, %c0_21, %c0_22] : memref<8x8x128xf32, #tpu.memory_space<vmem>>, vector<1x8x128xf32>
    %43 = vector.shape_cast %42 : vector<1x8x128xf32> to vector<8x128xf32>
    %44 = vector.shape_cast %40 : vector<8x128xf32> to vector<1x8x128xf32>
    tpu.vector_store %arg6[%41, %c0_21, %c0_22], %44 {strides = array<i32>} : memref<8x8x128xf32, #tpu.memory_space<vmem>>, vector<1x8x128xf32>,
    %c1_i32_23 = arith.constant 1 : i32
    %c8_i32_24 = arith.constant 8 : i32
    %45 = arith.muli %arg0, %c8_i32_24 : i32
    %46 = arith.addi %45, %c1_i32_23 : i32
    %47 = arith.index_cast %c1_i32_23 : i32 to index
    %c0_25 = arith.constant 0 : index
    %c0_26 = arith.constant 0 : index
    %48 = vector.load %arg1[%47, %c0_25, %c0_26] : memref<8x8x128xbf16, #tpu.memory_space<vmem>>, vector<1x8x128xbf16>
    %49 = vector.shape_cast %48 : vector<1x8x128xbf16> to vector<8x128xbf16>
    %50 = arith.extf %49 : vector<8x128xbf16> to vector<8x128xf32>
    %51 = arith.truncf %20 : vector<8x128xf32> to vector<8x128xbf16>
    %c0_27 = arith.constant 0 : index
    %c0_28 = arith.constant 0 : index
    %c0_29 = arith.constant 0 : index
    %52 = vector.load %arg4[%c0_27, %c0_28, %c0_29] : memref<2x128x128xbf16, #tpu.memory_space<vmem>>, vector<1x128x128xbf16>
    %53 = vector.shape_cast %52 : vector<1x128x128xbf16> to vector<128x128xbf16>
    %cst_30 = arith.constant dense<0.000000e+00> : vector<8x128xf32>
    %54 = tpu.matmul %51, %53, %cst_30 {dimension_numbers = #tpu.dot_dimension_numbers<[1], [0], [0], [1], [0, 0, 1, 1], [], []>} : vector<8x128xbf16>, vector<128x128xbf16>, vector<8x128xf32> -> vector<8x128xf32>
    %55 = arith.addf %50, %54 : vector<8x128xf32>
    %56 = math.tanh %55 : vector<8x128xf32>
    %c12_i32_31 = arith.constant 12 : i32
    %57 = arith.cmpi slt, %46, %c12_i32_31 : i32
    %58 = arith.select %57, %56, %20 : vector<8x128xf32>
    %59 = arith.index_cast %c1_i32_23 : i32 to index
    %c0_32 = arith.constant 0 : index
    %c0_33 = arith.constant 0 : index
    %60 = vector.load %arg5[%59, %c0_32, %c0_33] : memref<8x8x128xf32, #tpu.memory_space<vmem>>, vector<1x8x128xf32>
    %61 = vector.shape_cast %60 : vector<1x8x128xf32> to vector<8x128xf32>
    %62 = vector.shape_cast %58 : vector<8x128xf32> to vector<1x8x128xf32>
    tpu.vector_store %arg5[%59, %c0_32, %c0_33], %62 {strides = array<i32>} : memref<8x8x128xf32, #tpu.memory_space<vmem>>, vector<1x8x128xf32>,
    %c7_i32_34 = arith.constant 7 : i32
    %63 = arith.subi %c7_i32_34, %c1_i32_23 : i32
    %c1_i32_35 = arith.constant 1 : i32
    %64 = arith.subi %c1_i32_35, %arg0 : i32
    %c8_i32_36 = arith.constant 8 : i32
    %65 = arith.muli %64, %c8_i32_36 : i32
    %66 = arith.addi %65, %63 : i32
    %67 = arith.index_cast %63 : i32 to index
    %c0_37 = arith.constant 0 : index
    %c0_38 = arith.constant 0 : index
    %68 = vector.load %arg2[%67, %c0_37, %c0_38] : memref<8x8x128xbf16, #tpu.memory_space<vmem>>, vector<1x8x128xbf16>
    %69 = vector.shape_cast %68 : vector<1x8x128xbf16> to vector<8x128xbf16>
    %70 = arith.extf %69 : vector<8x128xbf16> to vector<8x128xf32>
    %71 = arith.truncf %40 : vector<8x128xf32> to vector<8x128xbf16>
    %c1_39 = arith.constant 1 : index
    %c0_40 = arith.constant 0 : index
    %c0_41 = arith.constant 0 : index
    %72 = vector.load %arg4[%c1_39, %c0_40, %c0_41] : memref<2x128x128xbf16, #tpu.memory_space<vmem>>, vector<1x128x128xbf16>
    %73 = vector.shape_cast %72 : vector<1x128x128xbf16> to vector<128x128xbf16>
    %cst_42 = arith.constant dense<0.000000e+00> : vector<8x128xf32>
    %74 = tpu.matmul %71, %73, %cst_42 {dimension_numbers = #tpu.dot_dimension_numbers<[1], [0], [0], [1], [0, 0, 1, 1], [], []>} : vector<8x128xbf16>, vector<128x128xbf16>, vector<8x128xf32> -> vector<8x128xf32>
    %75 = arith.addf %70, %74 : vector<8x128xf32>
    %76 = math.tanh %75 : vector<8x128xf32>
    %c12_i32_43 = arith.constant 12 : i32
    %77 = arith.cmpi slt, %66, %c12_i32_43 : i32
    %78 = arith.select %77, %76, %40 : vector<8x128xf32>
    %79 = arith.index_cast %63 : i32 to index
    %c0_44 = arith.constant 0 : index
    %c0_45 = arith.constant 0 : index
    %80 = vector.load %arg6[%79, %c0_44, %c0_45] : memref<8x8x128xf32, #tpu.memory_space<vmem>>, vector<1x8x128xf32>
    %81 = vector.shape_cast %80 : vector<1x8x128xf32> to vector<8x128xf32>
    %82 = vector.shape_cast %78 : vector<8x128xf32> to vector<1x8x128xf32>
    tpu.vector_store %arg6[%79, %c0_44, %c0_45], %82 {strides = array<i32>} : memref<8x8x128xf32, #tpu.memory_space<vmem>>, vector<1x8x128xf32>,
    %c2_i32 = arith.constant 2 : i32
    %c8_i32_46 = arith.constant 8 : i32
    %83 = arith.muli %arg0, %c8_i32_46 : i32
    %84 = arith.addi %83, %c2_i32 : i32
    %85 = arith.index_cast %c2_i32 : i32 to index
    %c0_47 = arith.constant 0 : index
    %c0_48 = arith.constant 0 : index
    %86 = vector.load %arg1[%85, %c0_47, %c0_48] : memref<8x8x128xbf16, #tpu.memory_space<vmem>>, vector<1x8x128xbf16>
    %87 = vector.shape_cast %86 : vector<1x8x128xbf16> to vector<8x128xbf16>
    %88 = arith.extf %87 : vector<8x128xbf16> to vector<8x128xf32>
    %89 = arith.truncf %58 : vector<8x128xf32> to vector<8x128xbf16>
    %c0_49 = arith.constant 0 : index
    %c0_50 = arith.constant 0 : index
    %c0_51 = arith.constant 0 : index
    %90 = vector.load %arg4[%c0_49, %c0_50, %c0_51] : memref<2x128x128xbf16, #tpu.memory_space<vmem>>, vector<1x128x128xbf16>
    %91 = vector.shape_cast %90 : vector<1x128x128xbf16> to vector<128x128xbf16>
    %cst_52 = arith.constant dense<0.000000e+00> : vector<8x128xf32>
    %92 = tpu.matmul %89, %91, %cst_52 {dimension_numbers = #tpu.dot_dimension_numbers<[1], [0], [0], [1], [0, 0, 1, 1], [], []>} : vector<8x128xbf16>, vector<128x128xbf16>, vector<8x128xf32> -> vector<8x128xf32>
    %93 = arith.addf %88, %92 : vector<8x128xf32>
    %94 = math.tanh %93 : vector<8x128xf32>
    %c12_i32_53 = arith.constant 12 : i32
    %95 = arith.cmpi slt, %84, %c12_i32_53 : i32
    %96 = arith.select %95, %94, %58 : vector<8x128xf32>
    %97 = arith.index_cast %c2_i32 : i32 to index
    %c0_54 = arith.constant 0 : index
    %c0_55 = arith.constant 0 : index
    %98 = vector.load %arg5[%97, %c0_54, %c0_55] : memref<8x8x128xf32, #tpu.memory_space<vmem>>, vector<1x8x128xf32>
    %99 = vector.shape_cast %98 : vector<1x8x128xf32> to vector<8x128xf32>
    %100 = vector.shape_cast %96 : vector<8x128xf32> to vector<1x8x128xf32>
    tpu.vector_store %arg5[%97, %c0_54, %c0_55], %100 {strides = array<i32>} : memref<8x8x128xf32, #tpu.memory_space<vmem>>, vector<1x8x128xf32>,
    %c7_i32_56 = arith.constant 7 : i32
    %101 = arith.subi %c7_i32_56, %c2_i32 : i32
    %c1_i32_57 = arith.constant 1 : i32
    %102 = arith.subi %c1_i32_57, %arg0 : i32
    %c8_i32_58 = arith.constant 8 : i32
    %103 = arith.muli %102, %c8_i32_58 : i32
    %104 = arith.addi %103, %101 : i32
    %105 = arith.index_cast %101 : i32 to index
    %c0_59 = arith.constant 0 : index
    %c0_60 = arith.constant 0 : index
    %106 = vector.load %arg2[%105, %c0_59, %c0_60] : memref<8x8x128xbf16, #tpu.memory_space<vmem>>, vector<1x8x128xbf16>
    %107 = vector.shape_cast %106 : vector<1x8x128xbf16> to vector<8x128xbf16>
    %108 = arith.extf %107 : vector<8x128xbf16> to vector<8x128xf32>
    %109 = arith.truncf %78 : vector<8x128xf32> to vector<8x128xbf16>
    %c1_61 = arith.constant 1 : index
    %c0_62 = arith.constant 0 : index
    %c0_63 = arith.constant 0 : index
    %110 = vector.load %arg4[%c1_61, %c0_62, %c0_63] : memref<2x128x128xbf16, #tpu.memory_space<vmem>>, vector<1x128x128xbf16>
    %111 = vector.shape_cast %110 : vector<1x128x128xbf16> to vector<128x128xbf16>
    %cst_64 = arith.constant dense<0.000000e+00> : vector<8x128xf32>
    %112 = tpu.matmul %109, %111, %cst_64 {dimension_numbers = #tpu.dot_dimension_numbers<[1], [0], [0], [1], [0, 0, 1, 1], [], []>} : vector<8x128xbf16>, vector<128x128xbf16>, vector<8x128xf32> -> vector<8x128xf32>
    %113 = arith.addf %108, %112 : vector<8x128xf32>
    %114 = math.tanh %113 : vector<8x128xf32>
    %c12_i32_65 = arith.constant 12 : i32
    %115 = arith.cmpi slt, %104, %c12_i32_65 : i32
    %116 = arith.select %115, %114, %78 : vector<8x128xf32>
    %117 = arith.index_cast %101 : i32 to index
    %c0_66 = arith.constant 0 : index
    %c0_67 = arith.constant 0 : index
    %118 = vector.load %arg6[%117, %c0_66, %c0_67] : memref<8x8x128xf32, #tpu.memory_space<vmem>>, vector<1x8x128xf32>
    %119 = vector.shape_cast %118 : vector<1x8x128xf32> to vector<8x128xf32>
    %120 = vector.shape_cast %116 : vector<8x128xf32> to vector<1x8x128xf32>
    tpu.vector_store %arg6[%117, %c0_66, %c0_67], %120 {strides = array<i32>} : memref<8x8x128xf32, #tpu.memory_space<vmem>>, vector<1x8x128xf32>,
    %c3_i32 = arith.constant 3 : i32
    %c8_i32_68 = arith.constant 8 : i32
    %121 = arith.muli %arg0, %c8_i32_68 : i32
    %122 = arith.addi %121, %c3_i32 : i32
    %123 = arith.index_cast %c3_i32 : i32 to index
    %c0_69 = arith.constant 0 : index
    %c0_70 = arith.constant 0 : index
    %124 = vector.load %arg1[%123, %c0_69, %c0_70] : memref<8x8x128xbf16, #tpu.memory_space<vmem>>, vector<1x8x128xbf16>
    %125 = vector.shape_cast %124 : vector<1x8x128xbf16> to vector<8x128xbf16>
    %126 = arith.extf %125 : vector<8x128xbf16> to vector<8x128xf32>
    %127 = arith.truncf %96 : vector<8x128xf32> to vector<8x128xbf16>
    %c0_71 = arith.constant 0 : index
    %c0_72 = arith.constant 0 : index
    %c0_73 = arith.constant 0 : index
    %128 = vector.load %arg4[%c0_71, %c0_72, %c0_73] : memref<2x128x128xbf16, #tpu.memory_space<vmem>>, vector<1x128x128xbf16>
    %129 = vector.shape_cast %128 : vector<1x128x128xbf16> to vector<128x128xbf16>
    %cst_74 = arith.constant dense<0.000000e+00> : vector<8x128xf32>
    %130 = tpu.matmul %127, %129, %cst_74 {dimension_numbers = #tpu.dot_dimension_numbers<[1], [0], [0], [1], [0, 0, 1, 1], [], []>} : vector<8x128xbf16>, vector<128x128xbf16>, vector<8x128xf32> -> vector<8x128xf32>
    %131 = arith.addf %126, %130 : vector<8x128xf32>
    %132 = math.tanh %131 : vector<8x128xf32>
    %c12_i32_75 = arith.constant 12 : i32
    %133 = arith.cmpi slt, %122, %c12_i32_75 : i32
    %134 = arith.select %133, %132, %96 : vector<8x128xf32>
    %135 = arith.index_cast %c3_i32 : i32 to index
    %c0_76 = arith.constant 0 : index
    %c0_77 = arith.constant 0 : index
    %136 = vector.load %arg5[%135, %c0_76, %c0_77] : memref<8x8x128xf32, #tpu.memory_space<vmem>>, vector<1x8x128xf32>
    %137 = vector.shape_cast %136 : vector<1x8x128xf32> to vector<8x128xf32>
    %138 = vector.shape_cast %134 : vector<8x128xf32> to vector<1x8x128xf32>
    tpu.vector_store %arg5[%135, %c0_76, %c0_77], %138 {strides = array<i32>} : memref<8x8x128xf32, #tpu.memory_space<vmem>>, vector<1x8x128xf32>,
    %c7_i32_78 = arith.constant 7 : i32
    %139 = arith.subi %c7_i32_78, %c3_i32 : i32
    %c1_i32_79 = arith.constant 1 : i32
    %140 = arith.subi %c1_i32_79, %arg0 : i32
    %c8_i32_80 = arith.constant 8 : i32
    %141 = arith.muli %140, %c8_i32_80 : i32
    %142 = arith.addi %141, %139 : i32
    %143 = arith.index_cast %139 : i32 to index
    %c0_81 = arith.constant 0 : index
    %c0_82 = arith.constant 0 : index
    %144 = vector.load %arg2[%143, %c0_81, %c0_82] : memref<8x8x128xbf16, #tpu.memory_space<vmem>>, vector<1x8x128xbf16>
    %145 = vector.shape_cast %144 : vector<1x8x128xbf16> to vector<8x128xbf16>
    %146 = arith.extf %145 : vector<8x128xbf16> to vector<8x128xf32>
    %147 = arith.truncf %116 : vector<8x128xf32> to vector<8x128xbf16>
    %c1_83 = arith.constant 1 : index
    %c0_84 = arith.constant 0 : index
    %c0_85 = arith.constant 0 : index
    %148 = vector.load %arg4[%c1_83, %c0_84, %c0_85] : memref<2x128x128xbf16, #tpu.memory_space<vmem>>, vector<1x128x128xbf16>
    %149 = vector.shape_cast %148 : vector<1x128x128xbf16> to vector<128x128xbf16>
    %cst_86 = arith.constant dense<0.000000e+00> : vector<8x128xf32>
    %150 = tpu.matmul %147, %149, %cst_86 {dimension_numbers = #tpu.dot_dimension_numbers<[1], [0], [0], [1], [0, 0, 1, 1], [], []>} : vector<8x128xbf16>, vector<128x128xbf16>, vector<8x128xf32> -> vector<8x128xf32>
    %151 = arith.addf %146, %150 : vector<8x128xf32>
    %152 = math.tanh %151 : vector<8x128xf32>
    %c12_i32_87 = arith.constant 12 : i32
    %153 = arith.cmpi slt, %142, %c12_i32_87 : i32
    %154 = arith.select %153, %152, %116 : vector<8x128xf32>
    %155 = arith.index_cast %139 : i32 to index
    %c0_88 = arith.constant 0 : index
    %c0_89 = arith.constant 0 : index
    %156 = vector.load %arg6[%155, %c0_88, %c0_89] : memref<8x8x128xf32, #tpu.memory_space<vmem>>, vector<1x8x128xf32>
    %157 = vector.shape_cast %156 : vector<1x8x128xf32> to vector<8x128xf32>
    %158 = vector.shape_cast %154 : vector<8x128xf32> to vector<1x8x128xf32>
    tpu.vector_store %arg6[%155, %c0_88, %c0_89], %158 {strides = array<i32>} : memref<8x8x128xf32, #tpu.memory_space<vmem>>, vector<1x8x128xf32>,
    %c4_i32 = arith.constant 4 : i32
    %c8_i32_90 = arith.constant 8 : i32
    %159 = arith.muli %arg0, %c8_i32_90 : i32
    %160 = arith.addi %159, %c4_i32 : i32
    %161 = arith.index_cast %c4_i32 : i32 to index
    %c0_91 = arith.constant 0 : index
    %c0_92 = arith.constant 0 : index
    %162 = vector.load %arg1[%161, %c0_91, %c0_92] : memref<8x8x128xbf16, #tpu.memory_space<vmem>>, vector<1x8x128xbf16>
    %163 = vector.shape_cast %162 : vector<1x8x128xbf16> to vector<8x128xbf16>
    %164 = arith.extf %163 : vector<8x128xbf16> to vector<8x128xf32>
    %165 = arith.truncf %134 : vector<8x128xf32> to vector<8x128xbf16>
    %c0_93 = arith.constant 0 : index
    %c0_94 = arith.constant 0 : index
    %c0_95 = arith.constant 0 : index
    %166 = vector.load %arg4[%c0_93, %c0_94, %c0_95] : memref<2x128x128xbf16, #tpu.memory_space<vmem>>, vector<1x128x128xbf16>
    %167 = vector.shape_cast %166 : vector<1x128x128xbf16> to vector<128x128xbf16>
    %cst_96 = arith.constant dense<0.000000e+00> : vector<8x128xf32>
    %168 = tpu.matmul %165, %167, %cst_96 {dimension_numbers = #tpu.dot_dimension_numbers<[1], [0], [0], [1], [0, 0, 1, 1], [], []>} : vector<8x128xbf16>, vector<128x128xbf16>, vector<8x128xf32> -> vector<8x128xf32>
    %169 = arith.addf %164, %168 : vector<8x128xf32>
    %170 = math.tanh %169 : vector<8x128xf32>
    %c12_i32_97 = arith.constant 12 : i32
    %171 = arith.cmpi slt, %160, %c12_i32_97 : i32
    %172 = arith.select %171, %170, %134 : vector<8x128xf32>
    %173 = arith.index_cast %c4_i32 : i32 to index
    %c0_98 = arith.constant 0 : index
    %c0_99 = arith.constant 0 : index
    %174 = vector.load %arg5[%173, %c0_98, %c0_99] : memref<8x8x128xf32, #tpu.memory_space<vmem>>, vector<1x8x128xf32>
    %175 = vector.shape_cast %174 : vector<1x8x128xf32> to vector<8x128xf32>
    %176 = vector.shape_cast %172 : vector<8x128xf32> to vector<1x8x128xf32>
    tpu.vector_store %arg5[%173, %c0_98, %c0_99], %176 {strides = array<i32>} : memref<8x8x128xf32, #tpu.memory_space<vmem>>, vector<1x8x128xf32>,
    %c7_i32_100 = arith.constant 7 : i32
    %177 = arith.subi %c7_i32_100, %c4_i32 : i32
    %c1_i32_101 = arith.constant 1 : i32
    %178 = arith.subi %c1_i32_101, %arg0 : i32
    %c8_i32_102 = arith.constant 8 : i32
    %179 = arith.muli %178, %c8_i32_102 : i32
    %180 = arith.addi %179, %177 : i32
    %181 = arith.index_cast %177 : i32 to index
    %c0_103 = arith.constant 0 : index
    %c0_104 = arith.constant 0 : index
    %182 = vector.load %arg2[%181, %c0_103, %c0_104] : memref<8x8x128xbf16, #tpu.memory_space<vmem>>, vector<1x8x128xbf16>
    %183 = vector.shape_cast %182 : vector<1x8x128xbf16> to vector<8x128xbf16>
    %184 = arith.extf %183 : vector<8x128xbf16> to vector<8x128xf32>
    %185 = arith.truncf %154 : vector<8x128xf32> to vector<8x128xbf16>
    %c1_105 = arith.constant 1 : index
    %c0_106 = arith.constant 0 : index
    %c0_107 = arith.constant 0 : index
    %186 = vector.load %arg4[%c1_105, %c0_106, %c0_107] : memref<2x128x128xbf16, #tpu.memory_space<vmem>>, vector<1x128x128xbf16>
    %187 = vector.shape_cast %186 : vector<1x128x128xbf16> to vector<128x128xbf16>
    %cst_108 = arith.constant dense<0.000000e+00> : vector<8x128xf32>
    %188 = tpu.matmul %185, %187, %cst_108 {dimension_numbers = #tpu.dot_dimension_numbers<[1], [0], [0], [1], [0, 0, 1, 1], [], []>} : vector<8x128xbf16>, vector<128x128xbf16>, vector<8x128xf32> -> vector<8x128xf32>
    %189 = arith.addf %184, %188 : vector<8x128xf32>
    %190 = math.tanh %189 : vector<8x128xf32>
    %c12_i32_109 = arith.constant 12 : i32
    %191 = arith.cmpi slt, %180, %c12_i32_109 : i32
    %192 = arith.select %191, %190, %154 : vector<8x128xf32>
    %193 = arith.index_cast %177 : i32 to index
    %c0_110 = arith.constant 0 : index
    %c0_111 = arith.constant 0 : index
    %194 = vector.load %arg6[%193, %c0_110, %c0_111] : memref<8x8x128xf32, #tpu.memory_space<vmem>>, vector<1x8x128xf32>
    %195 = vector.shape_cast %194 : vector<1x8x128xf32> to vector<8x128xf32>
    %196 = vector.shape_cast %192 : vector<8x128xf32> to vector<1x8x128xf32>
    tpu.vector_store %arg6[%193, %c0_110, %c0_111], %196 {strides = array<i32>} : memref<8x8x128xf32, #tpu.memory_space<vmem>>, vector<1x8x128xf32>,
    %c5_i32 = arith.constant 5 : i32
    %c8_i32_112 = arith.constant 8 : i32
    %197 = arith.muli %arg0, %c8_i32_112 : i32
    %198 = arith.addi %197, %c5_i32 : i32
    %199 = arith.index_cast %c5_i32 : i32 to index
    %c0_113 = arith.constant 0 : index
    %c0_114 = arith.constant 0 : index
    %200 = vector.load %arg1[%199, %c0_113, %c0_114] : memref<8x8x128xbf16, #tpu.memory_space<vmem>>, vector<1x8x128xbf16>
    %201 = vector.shape_cast %200 : vector<1x8x128xbf16> to vector<8x128xbf16>
    %202 = arith.extf %201 : vector<8x128xbf16> to vector<8x128xf32>
    %203 = arith.truncf %172 : vector<8x128xf32> to vector<8x128xbf16>
    %c0_115 = arith.constant 0 : index
    %c0_116 = arith.constant 0 : index
    %c0_117 = arith.constant 0 : index
    %204 = vector.load %arg4[%c0_115, %c0_116, %c0_117] : memref<2x128x128xbf16, #tpu.memory_space<vmem>>, vector<1x128x128xbf16>
    %205 = vector.shape_cast %204 : vector<1x128x128xbf16> to vector<128x128xbf16>
    %cst_118 = arith.constant dense<0.000000e+00> : vector<8x128xf32>
    %206 = tpu.matmul %203, %205, %cst_118 {dimension_numbers = #tpu.dot_dimension_numbers<[1], [0], [0], [1], [0, 0, 1, 1], [], []>} : vector<8x128xbf16>, vector<128x128xbf16>, vector<8x128xf32> -> vector<8x128xf32>
    %207 = arith.addf %202, %206 : vector<8x128xf32>
    %208 = math.tanh %207 : vector<8x128xf32>
    %c12_i32_119 = arith.constant 12 : i32
    %209 = arith.cmpi slt, %198, %c12_i32_119 : i32
    %210 = arith.select %209, %208, %172 : vector<8x128xf32>
    %211 = arith.index_cast %c5_i32 : i32 to index
    %c0_120 = arith.constant 0 : index
    %c0_121 = arith.constant 0 : index
    %212 = vector.load %arg5[%211, %c0_120, %c0_121] : memref<8x8x128xf32, #tpu.memory_space<vmem>>, vector<1x8x128xf32>
    %213 = vector.shape_cast %212 : vector<1x8x128xf32> to vector<8x128xf32>
    %214 = vector.shape_cast %210 : vector<8x128xf32> to vector<1x8x128xf32>
    tpu.vector_store %arg5[%211, %c0_120, %c0_121], %214 {strides = array<i32>} : memref<8x8x128xf32, #tpu.memory_space<vmem>>, vector<1x8x128xf32>,
    %c7_i32_122 = arith.constant 7 : i32
    %215 = arith.subi %c7_i32_122, %c5_i32 : i32
    %c1_i32_123 = arith.constant 1 : i32
    %216 = arith.subi %c1_i32_123, %arg0 : i32
    %c8_i32_124 = arith.constant 8 : i32
    %217 = arith.muli %216, %c8_i32_124 : i32
    %218 = arith.addi %217, %215 : i32
    %219 = arith.index_cast %215 : i32 to index
    %c0_125 = arith.constant 0 : index
    %c0_126 = arith.constant 0 : index
    %220 = vector.load %arg2[%219, %c0_125, %c0_126] : memref<8x8x128xbf16, #tpu.memory_space<vmem>>, vector<1x8x128xbf16>
    %221 = vector.shape_cast %220 : vector<1x8x128xbf16> to vector<8x128xbf16>
    %222 = arith.extf %221 : vector<8x128xbf16> to vector<8x128xf32>
    %223 = arith.truncf %192 : vector<8x128xf32> to vector<8x128xbf16>
    %c1_127 = arith.constant 1 : index
    %c0_128 = arith.constant 0 : index
    %c0_129 = arith.constant 0 : index
    %224 = vector.load %arg4[%c1_127, %c0_128, %c0_129] : memref<2x128x128xbf16, #tpu.memory_space<vmem>>, vector<1x128x128xbf16>
    %225 = vector.shape_cast %224 : vector<1x128x128xbf16> to vector<128x128xbf16>
    %cst_130 = arith.constant dense<0.000000e+00> : vector<8x128xf32>
    %226 = tpu.matmul %223, %225, %cst_130 {dimension_numbers = #tpu.dot_dimension_numbers<[1], [0], [0], [1], [0, 0, 1, 1], [], []>} : vector<8x128xbf16>, vector<128x128xbf16>, vector<8x128xf32> -> vector<8x128xf32>
    %227 = arith.addf %222, %226 : vector<8x128xf32>
    %228 = math.tanh %227 : vector<8x128xf32>
    %c12_i32_131 = arith.constant 12 : i32
    %229 = arith.cmpi slt, %218, %c12_i32_131 : i32
    %230 = arith.select %229, %228, %192 : vector<8x128xf32>
    %231 = arith.index_cast %215 : i32 to index
    %c0_132 = arith.constant 0 : index
    %c0_133 = arith.constant 0 : index
    %232 = vector.load %arg6[%231, %c0_132, %c0_133] : memref<8x8x128xf32, #tpu.memory_space<vmem>>, vector<1x8x128xf32>
    %233 = vector.shape_cast %232 : vector<1x8x128xf32> to vector<8x128xf32>
    %234 = vector.shape_cast %230 : vector<8x128xf32> to vector<1x8x128xf32>
    tpu.vector_store %arg6[%231, %c0_132, %c0_133], %234 {strides = array<i32>} : memref<8x8x128xf32, #tpu.memory_space<vmem>>, vector<1x8x128xf32>,
    %c6_i32 = arith.constant 6 : i32
    %c8_i32_134 = arith.constant 8 : i32
    %235 = arith.muli %arg0, %c8_i32_134 : i32
    %236 = arith.addi %235, %c6_i32 : i32
    %237 = arith.index_cast %c6_i32 : i32 to index
    %c0_135 = arith.constant 0 : index
    %c0_136 = arith.constant 0 : index
    %238 = vector.load %arg1[%237, %c0_135, %c0_136] : memref<8x8x128xbf16, #tpu.memory_space<vmem>>, vector<1x8x128xbf16>
    %239 = vector.shape_cast %238 : vector<1x8x128xbf16> to vector<8x128xbf16>
    %240 = arith.extf %239 : vector<8x128xbf16> to vector<8x128xf32>
    %241 = arith.truncf %210 : vector<8x128xf32> to vector<8x128xbf16>
    %c0_137 = arith.constant 0 : index
    %c0_138 = arith.constant 0 : index
    %c0_139 = arith.constant 0 : index
    %242 = vector.load %arg4[%c0_137, %c0_138, %c0_139] : memref<2x128x128xbf16, #tpu.memory_space<vmem>>, vector<1x128x128xbf16>
    %243 = vector.shape_cast %242 : vector<1x128x128xbf16> to vector<128x128xbf16>
    %cst_140 = arith.constant dense<0.000000e+00> : vector<8x128xf32>
    %244 = tpu.matmul %241, %243, %cst_140 {dimension_numbers = #tpu.dot_dimension_numbers<[1], [0], [0], [1], [0, 0, 1, 1], [], []>} : vector<8x128xbf16>, vector<128x128xbf16>, vector<8x128xf32> -> vector<8x128xf32>
    %245 = arith.addf %240, %244 : vector<8x128xf32>
    %246 = math.tanh %245 : vector<8x128xf32>
    %c12_i32_141 = arith.constant 12 : i32
    %247 = arith.cmpi slt, %236, %c12_i32_141 : i32
    %248 = arith.select %247, %246, %210 : vector<8x128xf32>
    %249 = arith.index_cast %c6_i32 : i32 to index
    %c0_142 = arith.constant 0 : index
    %c0_143 = arith.constant 0 : index
    %250 = vector.load %arg5[%249, %c0_142, %c0_143] : memref<8x8x128xf32, #tpu.memory_space<vmem>>, vector<1x8x128xf32>
    %251 = vector.shape_cast %250 : vector<1x8x128xf32> to vector<8x128xf32>
    %252 = vector.shape_cast %248 : vector<8x128xf32> to vector<1x8x128xf32>
    tpu.vector_store %arg5[%249, %c0_142, %c0_143], %252 {strides = array<i32>} : memref<8x8x128xf32, #tpu.memory_space<vmem>>, vector<1x8x128xf32>,
    %c7_i32_144 = arith.constant 7 : i32
    %253 = arith.subi %c7_i32_144, %c6_i32 : i32
    %c1_i32_145 = arith.constant 1 : i32
    %254 = arith.subi %c1_i32_145, %arg0 : i32
    %c8_i32_146 = arith.constant 8 : i32
    %255 = arith.muli %254, %c8_i32_146 : i32
    %256 = arith.addi %255, %253 : i32
    %257 = arith.index_cast %253 : i32 to index
    %c0_147 = arith.constant 0 : index
    %c0_148 = arith.constant 0 : index
    %258 = vector.load %arg2[%257, %c0_147, %c0_148] : memref<8x8x128xbf16, #tpu.memory_space<vmem>>, vector<1x8x128xbf16>
    %259 = vector.shape_cast %258 : vector<1x8x128xbf16> to vector<8x128xbf16>
    %260 = arith.extf %259 : vector<8x128xbf16> to vector<8x128xf32>
    %261 = arith.truncf %230 : vector<8x128xf32> to vector<8x128xbf16>
    %c1_149 = arith.constant 1 : index
    %c0_150 = arith.constant 0 : index
    %c0_151 = arith.constant 0 : index
    %262 = vector.load %arg4[%c1_149, %c0_150, %c0_151] : memref<2x128x128xbf16, #tpu.memory_space<vmem>>, vector<1x128x128xbf16>
    %263 = vector.shape_cast %262 : vector<1x128x128xbf16> to vector<128x128xbf16>
    %cst_152 = arith.constant dense<0.000000e+00> : vector<8x128xf32>
    %264 = tpu.matmul %261, %263, %cst_152 {dimension_numbers = #tpu.dot_dimension_numbers<[1], [0], [0], [1], [0, 0, 1, 1], [], []>} : vector<8x128xbf16>, vector<128x128xbf16>, vector<8x128xf32> -> vector<8x128xf32>
    %265 = arith.addf %260, %264 : vector<8x128xf32>
    %266 = math.tanh %265 : vector<8x128xf32>
    %c12_i32_153 = arith.constant 12 : i32
    %267 = arith.cmpi slt, %256, %c12_i32_153 : i32
    %268 = arith.select %267, %266, %230 : vector<8x128xf32>
    %269 = arith.index_cast %253 : i32 to index
    %c0_154 = arith.constant 0 : index
    %c0_155 = arith.constant 0 : index
    %270 = vector.load %arg6[%269, %c0_154, %c0_155] : memref<8x8x128xf32, #tpu.memory_space<vmem>>, vector<1x8x128xf32>
    %271 = vector.shape_cast %270 : vector<1x8x128xf32> to vector<8x128xf32>
    %272 = vector.shape_cast %268 : vector<8x128xf32> to vector<1x8x128xf32>
    tpu.vector_store %arg6[%269, %c0_154, %c0_155], %272 {strides = array<i32>} : memref<8x8x128xf32, #tpu.memory_space<vmem>>, vector<1x8x128xf32>,
    %c7_i32_156 = arith.constant 7 : i32
    %c8_i32_157 = arith.constant 8 : i32
    %273 = arith.muli %arg0, %c8_i32_157 : i32
    %274 = arith.addi %273, %c7_i32_156 : i32
    %275 = arith.index_cast %c7_i32_156 : i32 to index
    %c0_158 = arith.constant 0 : index
    %c0_159 = arith.constant 0 : index
    %276 = vector.load %arg1[%275, %c0_158, %c0_159] : memref<8x8x128xbf16, #tpu.memory_space<vmem>>, vector<1x8x128xbf16>
    %277 = vector.shape_cast %276 : vector<1x8x128xbf16> to vector<8x128xbf16>
    %278 = arith.extf %277 : vector<8x128xbf16> to vector<8x128xf32>
    %279 = arith.truncf %248 : vector<8x128xf32> to vector<8x128xbf16>
    %c0_160 = arith.constant 0 : index
    %c0_161 = arith.constant 0 : index
    %c0_162 = arith.constant 0 : index
    %280 = vector.load %arg4[%c0_160, %c0_161, %c0_162] : memref<2x128x128xbf16, #tpu.memory_space<vmem>>, vector<1x128x128xbf16>
    %281 = vector.shape_cast %280 : vector<1x128x128xbf16> to vector<128x128xbf16>
    %cst_163 = arith.constant dense<0.000000e+00> : vector<8x128xf32>
    %282 = tpu.matmul %279, %281, %cst_163 {dimension_numbers = #tpu.dot_dimension_numbers<[1], [0], [0], [1], [0, 0, 1, 1], [], []>} : vector<8x128xbf16>, vector<128x128xbf16>, vector<8x128xf32> -> vector<8x128xf32>
    %283 = arith.addf %278, %282 : vector<8x128xf32>
    %284 = math.tanh %283 : vector<8x128xf32>
    %c12_i32_164 = arith.constant 12 : i32
    %285 = arith.cmpi slt, %274, %c12_i32_164 : i32
    %286 = arith.select %285, %284, %248 : vector<8x128xf32>
    %287 = arith.index_cast %c7_i32_156 : i32 to index
    %c0_165 = arith.constant 0 : index
    %c0_166 = arith.constant 0 : index
    %288 = vector.load %arg5[%287, %c0_165, %c0_166] : memref<8x8x128xf32, #tpu.memory_space<vmem>>, vector<1x8x128xf32>
    %289 = vector.shape_cast %288 : vector<1x8x128xf32> to vector<8x128xf32>
    %290 = vector.shape_cast %286 : vector<8x128xf32> to vector<1x8x128xf32>
    tpu.vector_store %arg5[%287, %c0_165, %c0_166], %290 {strides = array<i32>} : memref<8x8x128xf32, #tpu.memory_space<vmem>>, vector<1x8x128xf32>,
    %c7_i32_167 = arith.constant 7 : i32
    %291 = arith.subi %c7_i32_167, %c7_i32_156 : i32
    %c1_i32_168 = arith.constant 1 : i32
    %292 = arith.subi %c1_i32_168, %arg0 : i32
    %c8_i32_169 = arith.constant 8 : i32
    %293 = arith.muli %292, %c8_i32_169 : i32
    %294 = arith.addi %293, %291 : i32
    %295 = arith.index_cast %291 : i32 to index
    %c0_170 = arith.constant 0 : index
    %c0_171 = arith.constant 0 : index
    %296 = vector.load %arg2[%295, %c0_170, %c0_171] : memref<8x8x128xbf16, #tpu.memory_space<vmem>>, vector<1x8x128xbf16>
    %297 = vector.shape_cast %296 : vector<1x8x128xbf16> to vector<8x128xbf16>
    %298 = arith.extf %297 : vector<8x128xbf16> to vector<8x128xf32>
    %299 = arith.truncf %268 : vector<8x128xf32> to vector<8x128xbf16>
    %c1_172 = arith.constant 1 : index
    %c0_173 = arith.constant 0 : index
    %c0_174 = arith.constant 0 : index
    %300 = vector.load %arg4[%c1_172, %c0_173, %c0_174] : memref<2x128x128xbf16, #tpu.memory_space<vmem>>, vector<1x128x128xbf16>
    %301 = vector.shape_cast %300 : vector<1x128x128xbf16> to vector<128x128xbf16>
    %cst_175 = arith.constant dense<0.000000e+00> : vector<8x128xf32>
    %302 = tpu.matmul %299, %301, %cst_175 {dimension_numbers = #tpu.dot_dimension_numbers<[1], [0], [0], [1], [0, 0, 1, 1], [], []>} : vector<8x128xbf16>, vector<128x128xbf16>, vector<8x128xf32> -> vector<8x128xf32>
    %303 = arith.addf %298, %302 : vector<8x128xf32>
    %304 = math.tanh %303 : vector<8x128xf32>
    %c12_i32_176 = arith.constant 12 : i32
    %305 = arith.cmpi slt, %294, %c12_i32_176 : i32
    %306 = arith.select %305, %304, %268 : vector<8x128xf32>
    %307 = arith.index_cast %291 : i32 to index
    %c0_177 = arith.constant 0 : index
    %c0_178 = arith.constant 0 : index
    %308 = vector.load %arg6[%307, %c0_177, %c0_178] : memref<8x8x128xf32, #tpu.memory_space<vmem>>, vector<1x8x128xf32>
    %309 = vector.shape_cast %308 : vector<1x8x128xf32> to vector<8x128xf32>
    %310 = vector.shape_cast %306 : vector<8x128xf32> to vector<1x8x128xf32>
    tpu.vector_store %arg6[%307, %c0_177, %c0_178], %310 {strides = array<i32>} : memref<8x8x128xf32, #tpu.memory_space<vmem>>, vector<1x8x128xf32>,
    %c8_i32_179 = arith.constant 8 : i32
    %c0_180 = arith.constant 0 : index
    %c0_181 = arith.constant 0 : index
    %c0_182 = arith.constant 0 : index
    %311 = vector.load %arg8[%c0_180, %c0_181, %c0_182] : memref<2x8x128xf32, #tpu.memory_space<vmem>>, vector<1x8x128xf32>
    %312 = vector.shape_cast %311 : vector<1x8x128xf32> to vector<8x128xf32>
    %313 = vector.shape_cast %286 : vector<8x128xf32> to vector<1x8x128xf32>
    tpu.vector_store %arg8[%c0_180, %c0_181, %c0_182], %313 {strides = array<i32>} : memref<2x8x128xf32, #tpu.memory_space<vmem>>, vector<1x8x128xf32>,
    %c0_183 = arith.constant 0 : index
    %c0_184 = arith.constant 0 : index
    %c0_185 = arith.constant 0 : index
    %314 = vector.load %arg7[%c0_183, %c0_184, %c0_185] : memref<2x8x128xf32, #tpu.memory_space<vmem>>, vector<1x8x128xf32>
    %315 = vector.shape_cast %314 : vector<1x8x128xf32> to vector<8x128xf32>
    %316 = vector.shape_cast %286 : vector<8x128xf32> to vector<1x8x128xf32>
    tpu.vector_store %arg7[%c0_183, %c0_184, %c0_185], %316 {strides = array<i32>} : memref<2x8x128xf32, #tpu.memory_space<vmem>>, vector<1x8x128xf32>,
    %c1_186 = arith.constant 1 : index
    %c0_187 = arith.constant 0 : index
    %c0_188 = arith.constant 0 : index
    %317 = vector.load %arg8[%c1_186, %c0_187, %c0_188] : memref<2x8x128xf32, #tpu.memory_space<vmem>>, vector<1x8x128xf32>
    %318 = vector.shape_cast %317 : vector<1x8x128xf32> to vector<8x128xf32>
    %319 = vector.shape_cast %306 : vector<8x128xf32> to vector<1x8x128xf32>
    tpu.vector_store %arg8[%c1_186, %c0_187, %c0_188], %319 {strides = array<i32>} : memref<2x8x128xf32, #tpu.memory_space<vmem>>, vector<1x8x128xf32>,
    %c1_189 = arith.constant 1 : index
    %c0_190 = arith.constant 0 : index
    %c0_191 = arith.constant 0 : index
    %320 = vector.load %arg7[%c1_189, %c0_190, %c0_191] : memref<2x8x128xf32, #tpu.memory_space<vmem>>, vector<1x8x128xf32>
    %321 = vector.shape_cast %320 : vector<1x8x128xf32> to vector<8x128xf32>
    %322 = vector.shape_cast %306 : vector<8x128xf32> to vector<1x8x128xf32>
    tpu.vector_store %arg7[%c1_189, %c0_190, %c0_191], %322 {strides = array<i32>} : memref<2x8x128xf32, #tpu.memory_space<vmem>>, vector<1x8x128xf32>,
    return
  }
  func.func @transform_0(%arg0: i32) -> (i32, i32, i32) {
    %c0_i32 = arith.constant 0 : i32
    %c0_i32_0 = arith.constant 0 : i32
    %c0_i32_1 = arith.constant 0 : i32
    return %arg0, %c0_i32, %c0_i32_0 : i32, i32, i32
  }
  func.func @transform_1(%arg0: i32) -> (i32, i32, i32) {
    %c1_i32 = arith.constant 1 : i32
    %0 = arith.subi %c1_i32, %arg0 : i32
    %c0_i32 = arith.constant 0 : i32
    %c1_i32_0 = arith.constant 1 : i32
    %c0_i32_1 = arith.constant 0 : i32
    return %0, %c0_i32, %c1_i32_0 : i32, i32, i32
  }
  func.func @transform_2(%arg0: i32) -> (i32, i32, i32) {
    %c0_i32 = arith.constant 0 : i32
    %c0_i32_0 = arith.constant 0 : i32
    %c0_i32_1 = arith.constant 0 : i32
    %c0_i32_2 = arith.constant 0 : i32
    return %c0_i32, %c0_i32_0, %c0_i32_1 : i32, i32, i32
  }
  func.func @transform_3(%arg0: i32) -> (i32, i32, i32) {
    %c0_i32 = arith.constant 0 : i32
    %c0_i32_0 = arith.constant 0 : i32
    %c0_i32_1 = arith.constant 0 : i32
    %c0_i32_2 = arith.constant 0 : i32
    return %c0_i32, %c0_i32_0, %c0_i32_1 : i32, i32, i32
  }
  func.func @transform_4(%arg0: i32) -> (i32, i32, i32) {
    %c0_i32 = arith.constant 0 : i32
    %c0_i32_0 = arith.constant 0 : i32
    %c0_i32_1 = arith.constant 0 : i32
    return %arg0, %c0_i32, %c0_i32_0 : i32, i32, i32
  }
  func.func @transform_5(%arg0: i32) -> (i32, i32, i32) {
    %c1_i32 = arith.constant 1 : i32
    %0 = arith.subi %c1_i32, %arg0 : i32
    %c0_i32 = arith.constant 0 : i32
    %c0_i32_0 = arith.constant 0 : i32
    %c0_i32_1 = arith.constant 0 : i32
    return %0, %c0_i32, %c0_i32_0 : i32, i32, i32
  }
  func.func @transform_6(%arg0: i32) -> (i32, i32, i32) {
    %c0_i32 = arith.constant 0 : i32
    %c0_i32_0 = arith.constant 0 : i32
    %c0_i32_1 = arith.constant 0 : i32
    %c0_i32_2 = arith.constant 0 : i32
    return %c0_i32, %c0_i32_0, %c0_i32_1 : i32, i32, i32
  }
}

</mosaic_0001>

<bundles_post_ra>
// kernel: rnn_frame_forward.2
= control target key start
LH: loop header
LB: loop body
LE: loop exit
PB: predicated region body
PF: predicated region fallthrough
CT: control target
= control target key end

     0   :  { %s3530_s21 = smov 0   ;;  %s3532_s22 = smov 0   ;;  %s4375_s0 = inlined_call_operand.vmem [shape: bf16[16,8,256], index: 0, kind: input, shape index: {}, may-alias: {0,1}]   ;;  %s4376_s1 = inlined_call_operand.vmem [shape: bf16[16,8,256], index: 1, kind: input, shape index: {}, may-alias: {0,1}]   ;;  %s4377_s2 = inlined_call_operand.vmem [shape: f32[2,8,128], index: 2, kind: input, shape index: {}]   ;;  %s4378_s3 = inlined_call_operand.vmem [shape: bf16[2,128,128], index: 3, kind: input, shape index: {}]   ;;  %s4379_s4 = inlined_call_operand.vmem [shape: bf16[16,8,128], index: 4, kind: output, shape index: {0}]   ;;  %s4380_s5 = inlined_call_operand.vmem [shape: bf16[16,8,128], index: 5, kind: output, shape index: {1}]   ;;  %s4381_s6 = inlined_call_operand.vmem [shape: f32[2,8,128], index: 6, kind: output, shape index: {2}]  }
   0x1   :  { %s3534_s23 = smov 0   ;;  %s3536_s24 = smov 0  }
   0x2   :  { %s3538_s25 = smov 0  }
   0x3 LB: > { %s3556_s26 = sadd.s32 4294967295, %s3491_s25   ;;  %s3559_s27 = sadd.s32 1, %s3491_s25   ;;  %s3491_s25 = sphi %s3538_s25, %s4394_s25   ;;  %s3487_s24 = sphi %s3536_s24, %s4393_s24   ;;  %s3483_s23 = sphi %s3534_s23, %s4392_s23   ;;  %s3479_s22 = sphi %s3532_s22, %s4391_s22   ;;  %s3475_s21 = sphi %s3530_s21, %s4390_s21  }
   0x4   : > { %s21_s28 = ssub.s32 %s3491_s25, %s3559_s27  ;;  %s24_s29 = sadd.s32 1, %s3487_s24 }
   0x5   : > { %p22_p0 = scmp.eq.s32.totalorder %s21_s28, 0  ;;  %p31_p1 = scmp.ne.s32.totalorder %s3487_s24, %s3483_s23 }
   0x6   : > { %p32_p2 = scmp.eq.s32.totalorder %s3491_s25, 0  ;;  %s47_s30 = ssub.s32 1, %s3491_s25 }
   0x7   : > { %s3569_s7 = scalar_select %p22_p0, %s3487_s24, %s24_s29  }
   0x8   : > { %p33_p3 = por %p32_p2, %p31_p1  ;;  %s48_s8 = ssub.s32 1, %s3559_s27 }
   0x9   : > { %s49_s9 = ssub.s32 %s47_s30, %s48_s8  ;;  %s52_s10 = sadd.s32 1, %s3479_s22 }
   0xa   : > { %p50_p4 = scmp.eq.s32.totalorder %s49_s9, 0  ;;  %p59_p5 = scmp.ne.s32.totalorder %s3479_s22, %s3475_s21 }
   0xb   : > { %p2471_p7 = scmp.ge.s32.totalorder %s3491_s25, 2 }
   0xc   : > { %s3578_s11 = scalar_select %p50_p4, %s3479_s22, %s52_s10  }
   0xd   : > { %p3580_p6 = por %p59_p5, %p32_p2  ;;  %208 = sbr.rel (%p2471_p7) target bundleno = 38 (0x26), region = 24 }
  0x14   : > { %211 = sbr.rel (!%p33_p3) target bundleno = 29 (0x1d), region = 28  ;;  %s213_s13 = sand.u32 (%p33_p3), 1, %s3487_s24  }
  0x15   : > { %s2785_s14 = sshll.u32 (%p33_p3), %s3491_s25, 6  ;;  %s2472_s15 = sshll.u32 (%p33_p3), %s213_s13, 5 }
  0x16   : > { %s219_s18 = scalar_lea.vmem (%p33_p3), %s4375_s0, %s2785_s14  ;;  %s215_s19 = scalar_lea.vmem (%p33_p3), [#allocation3], %s2472_s15 }
  0x17   : > { %v235_v0 = vld [vmem:[%s219_s18] sm:$0xf] (%p33_p3)  ;;  %v237_v1 = vld [vmem:[%s219_s18 + $0x8] sm:$0xf] (%p33_p3)  ;;  %v239_v2 = vld [vmem:[%s219_s18 + $0x10] sm:$0xf] (%p33_p3) }
  0x18   : > { %236 = vst [vmem:[%s215_s19] sm:$0xf] (%p33_p3), %v235_v0  ;;  %238 = vst [vmem:[%s215_s19 + $0x4] sm:$0xf] (%p33_p3), %v237_v1  ;;  %v241_v3 = vld [vmem:[%s219_s18 + $0x18] sm:$0xf] (%p33_p3) }
  0x19   : > { %v243_v4 = vld [vmem:[%s219_s18 + $0x20] sm:$0xf] (%p33_p3)  ;;  %240 = vst [vmem:[%s215_s19 + $0x8] sm:$0xf] (%p33_p3), %v239_v2  ;;  %242 = vst [vmem:[%s215_s19 + $0xc] sm:$0xf] (%p33_p3), %v241_v3 }
  0x1a   : > { %244 = vst [vmem:[%s215_s19 + $0x10] sm:$0xf] (%p33_p3), %v243_v4  ;;  %v245_v5 = vld [vmem:[%s219_s18 + $0x28] sm:$0xf] (%p33_p3)  ;;  %v247_v6 = vld [vmem:[%s219_s18 + $0x30] sm:$0xf] (%p33_p3) }
  0x1b   : > { %v249_v7 = vld [vmem:[%s219_s18 + $0x38] sm:$0xf]  ;;  %246 = vst [vmem:[%s215_s19 + $0x14] sm:$0xf] %v245_v5  ;;  %248 = vst [vmem:[%s215_s19 + $0x18] sm:$0xf] %v247_v6 }
  0x1c   : > { %250 = vst [vmem:[%s215_s19 + $0x1c] sm:$0xf] %v249_v7 }
  0x1d PF: > { %289 = sbr.rel (!%p3580_p6) target bundleno = 38 (0x26), region = 69  ;;  %s291_s20 = sand.u32 (%p3580_p6), 1, %s3479_s22  }
  0x1e   : > { %s2786_s28 = sshll.u32 (%p3580_p6), %s47_s30, 6  ;;  %s2476_s29 = sshll.u32 (%p3580_p6), %s291_s20, 5 }
  0x1f   : > { %s2399_s10 = scalar_lea.vmem (%p3580_p6), %s4376_s1, %s2786_s28  ;;  %s293_s13 = scalar_lea.vmem (%p3580_p6), [#allocation4], %s2476_s29 }
  0x20   : > { %v2479_v8 = vld [vmem:[%s2399_s10 + $0x4] sm:$0xf] (%p3580_p6)  ;;  %v2480_v9 = vld [vmem:[%s2399_s10 + $0xc] sm:$0xf] (%p3580_p6)  ;;  %v2481_v10 = vld [vmem:[%s2399_s10 + $0x14] sm:$0xf] (%p3580_p6) }
  0x21   : > { %316 = vst [vmem:[%s293_s13] sm:$0xf] (%p3580_p6), %v2479_v8  ;;  %318 = vst [vmem:[%s293_s13 + $0x4] sm:$0xf] (%p3580_p6), %v2480_v9  ;;  %v2482_v11 = vld [vmem:[%s2399_s10 + $0x1c] sm:$0xf] (%p3580_p6) }
  0x22   : > { %v2483_v12 = vld [vmem:[%s2399_s10 + $0x24] sm:$0xf] (%p3580_p6)  ;;  %320 = vst [vmem:[%s293_s13 + $0x8] sm:$0xf] (%p3580_p6), %v2481_v10  ;;  %322 = vst [vmem:[%s293_s13 + $0xc] sm:$0xf] (%p3580_p6), %v2482_v11 }
  0x23   : > { %324 = vst [vmem:[%s293_s13 + $0x10] sm:$0xf] (%p3580_p6), %v2483_v12  ;;  %v2484_v13 = vld [vmem:[%s2399_s10 + $0x2c] sm:$0xf] (%p3580_p6)  ;;  %v2485_v14 = vld [vmem:[%s2399_s10 + $0x34] sm:$0xf] (%p3580_p6) }
  0x24   : > { %v2486_v15 = vld [vmem:[%s2399_s10 + $0x3c] sm:$0xf]  ;;  %326 = vst [vmem:[%s293_s13 + $0x14] sm:$0xf] %v2484_v13  ;;  %328 = vst [vmem:[%s293_s13 + $0x18] sm:$0xf] %v2485_v14 }
  0x25   : > { %330 = vst [vmem:[%s293_s13 + $0x1c] sm:$0xf] %v2486_v15 }
  0x26 PF: > { %p2487_p8 = scmp.ge.s32.totalorder %s3491_s25, 1  ;;  %p368_p9 = scmp.lt.s32.totalorder %s3491_s25, 3 }
  0x28   : > { %p369_p10 = pnand %p2487_p8, %p368_p9 }
  0x29   : > { %s375_s30 = sand.u32 (!%p369_p10), 1, %s3483_s23   ;;  %s382_s12 = sand.u32 (!%p369_p10), 1, %s3475_s21  }
  0x2a   : > { %372 = sbr.rel (%p369_p10) target bundleno = 1917 (0x77d), region = 110  ;;  %s2488_s14 = sshll.u32 (!%p369_p10), %s375_s30, 5 }
  0x2b   : > { %s2489_s15 = sshll.u32 (!%p369_p10), %s382_s12, 5  ;;  %s3603_s16 = sshll.u32 (!%p369_p10), %s3556_s26, 3 }
  0x2c   : > { %s430_s17 = ssub.s32 (!%p369_p10), 1, %s3556_s26  ;;  %p425_p11 = scmp.lt.s32.totalorder (!%p369_p10), %s3603_s16, 15 }
  0x2d   : > { %s3607_s18 = sshll.u32 (!%p369_p10), %s430_s17, 3  ;;  %s3622_s13 = scalar_lea.vmem (!%p369_p10), [#allocation3], %s2488_s14 }
  0x2e   : > { %p432_p12 = scmp.lt.s32.totalorder (!%p369_p10), %s3607_s18, 15  ;;  %s3624_s30 = scalar_lea.vmem (!%p369_p10), [#allocation4], %s2489_s15 }
  0x2f   : > { %p2494_p13 = scmp.ne.s32.totalorder (!%p369_p10), %s3556_s26, 0 }
  0x31   : > { %s426_s25 = scalar_select %p425_p11, %s3603_s16, 15 }
  0x32   : > { %s433_s19 = scalar_select %p432_p12, %s3607_s18, 15 }
  0x33   : > { %s2491_s20 = sshll.u32 %s426_s25, 2  ;;  %442 = sbr.rel (%p2494_p13) target bundleno = 58 (0x3a), region = 122  ;;  %v443_v16 = vld [vmem:[%s4377_s2] sm:$0xff] (!%p2494_p13)  ;;  %v444_v17 = vld [vmem:[%s4377_s2 + $0x8] sm:$0xff] (!%p2494_p13) }
  0x34   : > { %s3615_s21 = scalar_lea.vmem %s4379_s4, %s2491_s20  ;;  %s2493_s23 = sshll.u32 %s433_s19, 2  ;;  %445 = vst [vmem:[#allocation2] sm:$0xff] (!%p2494_p13), %v443_v16  ;;  %446 = vst [vmem:[#allocation2 + $0x8] sm:$0xff] (!%p2494_p13), %v444_v17 }
  0x35   : > { %s3620_s10 = scalar_lea.vmem %s4380_s5, %s2493_s23 }
  0x3a PF: > { %v3293_v18 = vld [vmem:[%s4378_s3] sm:$0xff]   ;;  %v3493_v19 = vmov 0.0   ;;  %v3295_v21 = vld [vmem:[%s4378_s3 + $0x8] sm:$0xff]   ;;  %vm3494_vm0 = vmmov 0   ;;  %v3297_v23 = vld [vmem:[%s4378_s3 + $0x10] sm:$0xff]   ;;  %s569_s20 = sadd.s32 7, %s3607_s18 }
  0x3b   : > { %2931 = vmatprep.subr.bf16.mxu0 %v3493_v19  ;;  %2951 = vmatprep.subr.bf16.mxu1 %v3493_v19  ;;  %v3294_v20 = vld [vmem:[%s4378_s3 + $0x40] sm:$0xff]   ;;  %v3296_v22 = vld [vmem:[%s4378_s3 + $0x48] sm:$0xff]   ;;  %v3298_v24 = vld [vmem:[%s4378_s3 + $0x50] sm:$0xff]   ;;  %p560_p0 = scmp.lt.s32.totalorder %s3603_s16, 12  ;;  %p681_p1 = scmp.lt.s32.totalorder %s569_s20, 12 }
  0x3c   : > { %2932 = vmatpush3.bf16.msra.mxu0 %v3293_v18  ;;  %2947 = vmatprep.mubr.msk.bf16.mxu0 %vm3494_vm0, %v3493_v19  ;;  %v3299_v25 = vld [vmem:[%s4378_s3 + $0x18] sm:$0xff]   ;;  %v3301_v27 = vld [vmem:[%s4378_s3 + $0x20] sm:$0xff]   ;;  %v3303_v29 = vld [vmem:[%s4378_s3 + $0x28] sm:$0xff]   ;;  %s689_s9 = sadd.s32 1, %s3603_s16  ;;  %s807_s12 = sadd.s32 6, %s3607_s18 }
  0x3d   : > { %2952 = vmatpush3.bf16.msra.mxu1 %v3294_v20  ;;  %2933 = vmatprep.subr.bf16.mxu0 %v3493_v19  ;;  %v3300_v26 = vld [vmem:[%s4378_s3 + $0x58] sm:$0xff]   ;;  %v3302_v28 = vld [vmem:[%s4378_s3 + $0x60] sm:$0xff]   ;;  %v3304_v30 = vld [vmem:[%s4378_s3 + $0x68] sm:$0xff]   ;;  %s561_s19 = scalar_select %p560_p0, 1, 0 }
  0x3e   : > { %2953 = vmatprep.subr.bf16.mxu1 %v3493_v19  ;;  %2967 = vmatprep.mubr.msk.bf16.mxu1 %vm3494_vm0, %v3493_v19  ;;  %v3305_v31 = vld [vmem:[%s4378_s3 + $0x30] sm:$0xff]   ;;  %v3307_v33 = vld [vmem:[%s4378_s3 + $0x38] sm:$0xff]   ;;  %v3696_v34 = vld [vmem:[#allocation2] sm:$0xff]  ;;  %s682_s28 = scalar_select %p681_p1, 1, 0 }
  0x3f   : > { %v3306_v32 = vld [vmem:[%s4378_s3 + $0x70] sm:$0xff]   ;;  %v3308_v35 = vld [vmem:[%s4378_s3 + $0x78] sm:$0xff]   ;;  %v3701_v36 = vld [vmem:[#allocation2 + $0x8] sm:$0xff]  ;;  %v453_v38 = vpack.c.bf16 %v3696_v34, %v3696_v34  ;;  %v562_v5 = vstv %s561_s19  ;;  %p3873_p2 = scmp.lt.s32.totalorder %s689_s9, 12  ;;  %p917_p3 = scmp.lt.s32.totalorder %s807_s12, 12 }
  0x40   : > { %2934 = vmatpush3.bf16.msra.mxu0 %v3295_v21  ;;  %v3309_v37 = vld [vmem:[%s4378_s3] sm:$0xff]   ;;  %v573_v40 = vpack.c.bf16 %v3701_v36, %v3701_v36  ;;  %v3311_v41 = vld [vmem:[%s4378_s3 + $0x8] sm:$0xff]   ;;  %v3313_v43 = vld [vmem:[%s4378_s3 + $0x10] sm:$0xff]   ;;  %v683_v6 = vstv %s682_s28  ;;  %vm563_vm1 = vcmp.eq.s32.totalorder %v562_v5, 1  ;;  %s925_s23 = sadd.s32 2, %s3603_s16  ;;  %s1043_s8 = sadd.s32 5, %s3607_s18 }
  0x41   : > { %2954 = vmatpush3.bf16.msra.mxu1 %v3296_v22  ;;  %2935 = vmatprep.subr.bf16.mxu0 %v3493_v19  ;;  %v3310_v39 = vld [vmem:[%s4378_s3 + $0x40] sm:$0xff]   ;;  %v3312_v42 = vld [vmem:[%s4378_s3 + $0x48] sm:$0xff]   ;;  %v3314_v44 = vld [vmem:[%s4378_s3 + $0x50] sm:$0xff]   ;;  %vm684_vm2 = vcmp.eq.s32.totalorder %v683_v6, 1  ;;  %s800_s25 = scalar_select %p3873_p2, 1, 0 }
  0x42   : > { %2955 = vmatprep.subr.bf16.mxu1 %v3493_v19  ;;  %v3315_v45 = vld [vmem:[%s4378_s3 + $0x18] sm:$0xff]   ;;  %v3317_v47 = vld [vmem:[%s4378_s3 + $0x20] sm:$0xff]   ;;  %v3319_v49 = vld [vmem:[%s4378_s3 + $0x28] sm:$0xff]   ;;  %s918_s20 = scalar_select %p917_p3, 1, 0 }
  0x43   : > { %v3316_v46 = vld [vmem:[%s4378_s3 + $0x58] sm:$0xff]   ;;  %v3318_v48 = vld [vmem:[%s4378_s3 + $0x60] sm:$0xff]   ;;  %v3320_v50 = vld [vmem:[%s4378_s3 + $0x68] sm:$0xff]   ;;  %p3969_p4 = scmp.lt.s32.totalorder %s925_s23, 12  ;;  %p1153_p5 = scmp.lt.s32.totalorder %s1043_s8, 12 }
  0x44   : > { %2936 = vmatpush3.bf16.msra.mxu0 %v3297_v23  ;;  %v3321_v51 = vld [vmem:[%s4378_s3 + $0x30] sm:$0xff]   ;;  %v3323_v53 = vld [vmem:[%s4378_s3 + $0x38] sm:$0xff]   ;;  %v3783_v56 = vld [vmem:[%s3624_s30 + $0x18] sm:$0xff]   ;;  %s1161_s15 = sadd.s32 3, %s3603_s16  ;;  %s1279_s29 = sadd.s32 4, %s3607_s18 }
  0x45   : > { %2956 = vmatpush3.bf16.msra.mxu1 %v3298_v24  ;;  %2937 = vmatprep.subr.bf16.mxu0 %v3493_v19  ;;  %v3322_v52 = vld [vmem:[%s4378_s3 + $0x70] sm:$0xff]   ;;  %v3324_v54 = vld [vmem:[%s4378_s3 + $0x78] sm:$0xff]   ;;  %v572_v58 = vunpack.c.h.bf16 %v3783_v56  ;;  %v3325_v10 = vld [vmem:[%s4378_s3] sm:$0xff]   ;;  %s1036_s12 = scalar_select %p3969_p4, 1, 0 }
  0x46   : > { %2957 = vmatprep.subr.bf16.mxu1 %v3493_v19  ;;  %v3780_v55 = vld [vmem:[%s3622_s13] sm:$0xff]   ;;  %v3326_v13 = vld [vmem:[%s4378_s3 + $0x40] sm:$0xff]   ;;  %v3327_v15 = vld [vmem:[%s4378_s3 + $0x8] sm:$0xff]   ;;  %s1154_s17 = scalar_select %p1153_p5, 1, 0 }
  0x47   : > { %v452_v57 = vunpack.c.l.bf16 %v3780_v55  ;;  %v3328_v16 = vld [vmem:[%s4378_s3 + $0x48] sm:$0xff]   ;;  %v3329_v17 = vld [vmem:[%s4378_s3 + $0x10] sm:$0xff]   ;;  %v3331_v20 = vld [vmem:[%s4378_s3 + $0x18] sm:$0xff]   ;;  %p4059_p6 = scmp.lt.s32.totalorder %s1161_s15, 12  ;;  %p1389_p7 = scmp.lt.s32.totalorder %s1279_s29, 12 }
  0x48   : > { %2938 = vmatpush3.bf16.msra.mxu0 %v3299_v25  ;;  %v3330_v18 = vld [vmem:[%s4378_s3 + $0x50] sm:$0xff]   ;;  %v3332_v21 = vld [vmem:[%s4378_s3 + $0x58] sm:$0xff]   ;;  %v3333_v22 = vld [vmem:[%s4378_s3 + $0x20] sm:$0xff]   ;;  %s1397_s26 = sadd.s32 4, %s3603_s16  ;;  %s1515_s14 = sadd.s32 3, %s3607_s18 }
  0x49   : > { %2958 = vmatpush3.bf16.msra.mxu1 %v3300_v26  ;;  %2939 = vmatprep.subr.bf16.mxu0 %v3493_v19  ;;  %v3334_v23 = vld [vmem:[%s4378_s3 + $0x60] sm:$0xff]   ;;  %v3335_v24 = vld [vmem:[%s4378_s3 + $0x28] sm:$0xff]   ;;  %v3337_v26 = vld [vmem:[%s4378_s3 + $0x30] sm:$0xff]   ;;  %s1272_s8 = scalar_select %p4059_p6, 1, 0 }
  0x4a   : > { %2959 = vmatprep.subr.bf16.mxu1 %v3493_v19  ;;  %v3336_v25 = vld [vmem:[%s4378_s3 + $0x68] sm:$0xff]   ;;  %s1390_s9 = scalar_select %p1389_p7, 1, 0 }
  0x4b   : > { %p4155_p8 = scmp.lt.s32.totalorder %s1397_s26, 12  ;;  %p1625_p9 = scmp.lt.s32.totalorder %s1515_s14, 12 }
  0x4c   : > { %2940 = vmatpush3.bf16.msra.mxu0 %v3301_v27  ;;  %v3338_v27 = vld [vmem:[%s4378_s3 + $0x70] sm:$0xff]   ;;  %s1633_s19 = sadd.s32 5, %s3603_s16  ;;  %s1751_s28 = sadd.s32 2, %s3607_s18 }
  0x4d   : > { %2960 = vmatpush3.bf16.msra.mxu1 %v3302_v28  ;;  %2941 = vmatprep.subr.bf16.mxu0 %v3493_v19  ;;  %v3339_v28 = vld [vmem:[%s4378_s3 + $0x38] sm:$0xff]   ;;  %s1508_s29 = scalar_select %p4155_p8, 1, 0 }
  0x4e   : > { %2961 = vmatprep.subr.bf16.mxu1 %v3493_v19  ;;  %s1626_s23 = scalar_select %p1625_p9, 1, 0 }
  0x4f   : > { %p4245_p10 = scmp.lt.s32.totalorder %s1633_s19, 12  ;;  %p1861_p11 = scmp.lt.s32.totalorder %s1751_s28, 12 }
  0x50   : > { %2942 = vmatpush3.bf16.msra.mxu0 %v3303_v29  ;;  %v3340_v29 = vld [vmem:[%s4378_s3 + $0x78] sm:$0xff]   ;;  %s2105_s28 = sadd.s32 7, %s3603_s16  ;;  %p2331_p1 = scmp.lt.s32.totalorder %s3607_s18, 12 }
  0x51   : > { %2962 = vmatpush3.bf16.msra.mxu1 %v3304_v30  ;;  %2943 = vmatprep.subr.bf16.mxu0 %v3493_v19  ;;  %v692_v30 = vunpack.c.h.bf16 %v3780_v55  ;;  %v3346_v55 = vld [vmem:[%s4378_s3 + $0x50] sm:$0xff]   ;;  %s1744_s14 = scalar_select %p4245_p10, 1, 0 }
  0x52   : > { %2963 = vmatprep.subr.bf16.mxu1 %v3493_v19  ;;  %s1862_s15 = scalar_select %p1861_p11, 1, 0 }
  0x53   : > { %p4344_p0 = scmp.lt.s32.totalorder %s2105_s28, 12 }
  0x54   : > { %2944 = vmatpush3.bf16.msra.mxu0 %v3305_v31  ;;  %v810_v31 = vunpack.c.l.bf16 %v3783_v56  ;;  %v3347_v56 = vld [vmem:[%s4378_s3 + $0x18] sm:$0xff]  }
  0x55   : > { %2964 = vmatpush3.bf16.msra.mxu1 %v3306_v32  ;;  %2945 = vmatprep.subr.bf16.mxu0 %v3493_v19 }
  0x56   : > { %2965 = vmatprep.subr.bf16.mxu1 %v3493_v19 }
  0x58   : > { %2946 = vmatpush3.bf16.msra.mxu0 %v3307_v33 }
  0x59   : > { %2966 = vmatpush3.bf16.msra.mxu1 %v3308_v35  ;;  %2971 = vmatprep.subr.bf16.mxu0 %v3493_v19 }
  0x5a   : > { %2991 = vmatprep.subr.bf16.mxu1 %v3493_v19 }
  0x5b   : > { %2948 = vmatmul.mubr.bf16.vlgmr.msra.gmra.mrb[0].mxu0 %v453_v38 }
  0x5c   : > { %2968 = vmatmul.mubr.bf16.vlgmr.msra.gmra.mrb[0].mxu1 %v573_v40  ;;  %2972 = vmatpush3.bf16.msra.mxu0 %v3309_v37 }
  0x5d   : > { %2992 = vmatpush3.bf16.msra.mxu1 %v3310_v39  ;;  %2973 = vmatprep.subr.bf16.mxu0 %v3493_v19 }
  0x5e   : > { %2993 = vmatprep.subr.bf16.mxu1 %v3493_v19  ;;  %2987 = vmatprep.mubr.msk.bf16.mxu0 %vm3494_vm0, %v3493_v19 }
  0x5f   : > { %3007 = vmatprep.mubr.msk.bf16.mxu1 %vm3494_vm0, %v3493_v19 }
  0x60   : > { %2974 = vmatpush3.bf16.msra.mxu0 %v3311_v41 }
  0x61   : > { %2994 = vmatpush3.bf16.msra.mxu1 %v3312_v42  ;;  %2975 = vmatprep.subr.bf16.mxu0 %v3493_v19  ;;  %v801_v42 = vstv %s800_s25  ;;  %s1869_s25 = sadd.s32 6, %s3603_s16 }
  0x62   : > { %2995 = vmatprep.subr.bf16.mxu1 %v3493_v19  ;;  %vm802_vm3 = vcmp.eq.s32.totalorder %v801_v42, 1  ;;  %p4333_p12 = scmp.lt.s32.totalorder %s1869_s25, 12 }
  0x63   : > { %s2216_s16 = scalar_select %p4344_p0, 1, 0 }
  0x64   : > { %2976 = vmatpush3.bf16.msra.mxu0 %v3313_v43  ;;  %v919_v43 = vstv %s918_s20  ;;  %s1987_s20 = sadd.s32 1, %s3607_s18 }
  0x65   : > { %2996 = vmatpush3.bf16.msra.mxu1 %v3314_v44  ;;  %2977 = vmatprep.subr.bf16.mxu0 %v3493_v19  ;;  %vm920_vm4 = vcmp.eq.s32.totalorder %v919_v43, 1  ;;  %p2097_p13 = scmp.lt.s32.totalorder %s1987_s20, 12 }
  0x66   : > { %2997 = vmatprep.subr.bf16.mxu1 %v3493_v19 }
  0x68   : > { %2978 = vmatpush3.bf16.msra.mxu0 %v3315_v45 }
  0x69   : > { %2998 = vmatpush3.bf16.msra.mxu1 %v3316_v46  ;;  %2979 = vmatprep.subr.bf16.mxu0 %v3493_v19 }
  0x6a   : > { %2999 = vmatprep.subr.bf16.mxu1 %v3493_v19 }
  0x6c   : > { %2980 = vmatpush3.bf16.msra.mxu0 %v3317_v47  ;;  %v3341_v47 = vld [vmem:[%s4378_s3] sm:$0xff]  }
  0x6d   : > { %3000 = vmatpush3.bf16.msra.mxu1 %v3318_v48  ;;  %2981 = vmatprep.subr.bf16.mxu0 %v3493_v19 }
  0x6e   : > { %3001 = vmatprep.subr.bf16.mxu1 %v3493_v19 }
  0x70   : > { %2982 = vmatpush3.bf16.msra.mxu0 %v3319_v49 }
  0x71   : > { %3002 = vmatpush3.bf16.msra.mxu1 %v3320_v50  ;;  %2983 = vmatprep.subr.bf16.mxu0 %v3493_v19  ;;  %v3342_v50 = vld [vmem:[%s4378_s3 + $0x40] sm:$0xff]  }
  0x72   : > { %3003 = vmatprep.subr.bf16.mxu1 %v3493_v19 }
  0x74   : > { %2984 = vmatpush3.bf16.msra.mxu0 %v3321_v51 }
  0x75   : > { %3004 = vmatpush3.bf16.msra.mxu1 %v3322_v52  ;;  %2985 = vmatprep.subr.bf16.mxu0 %v3493_v19  ;;  %v3343_v52 = vld [vmem:[%s4378_s3 + $0x8] sm:$0xff]  }
  0x76   : > { %3005 = vmatprep.subr.bf16.mxu1 %v3493_v19 }
  0x78   : > { %2986 = vmatpush3.bf16.msra.mxu0 %v3323_v53  ;;  %v3344_v53 = vld [vmem:[%s4378_s3 + $0x48] sm:$0xff]  }
  0x79   : > { %3006 = vmatpush3.bf16.msra.mxu1 %v3324_v54  ;;  %3011 = vmatprep.subr.bf16.mxu0 %v3493_v19  ;;  %v3345_v54 = vld [vmem:[%s4378_s3 + $0x10] sm:$0xff]  }
  0x7a   : > { %3031 = vmatprep.subr.bf16.mxu1 %v3493_v19 }
 0x12e   : > { %v552_v59 = vpop.f32.mrb[0].mxu0 }
 0x12f   : > { %v558_v60 = vadd.f32 %v552_v59, %v452_v57  ;;  %v673_v61 = vpop.f32.mrb[0].mxu1  ;;  %v2949_v62 = vpop.f32.mrb[1].mxu0  ;;  %v3348_v57 = vld [vmem:[%s4378_s3 + $0x58] sm:$0xff]   ;;  %v3350_v59 = vld [vmem:[%s4378_s3 + $0x60] sm:$0xff]  }
 0x130   : > { %v679_v63 = vadd.f32 %v673_v61, %v572_v58  ;;  %v2969_v0 = vpop.f32.mrb[1].mxu1  ;;  %v555_v1 = vpop.f32.mrb[2].mxu0  ;;  %v3349_v58 = vld [vmem:[%s4378_s3 + $0x20] sm:$0xff]   ;;  %v3352_v61 = vld [vmem:[%s4378_s3 + $0x68] sm:$0xff]   ;;  %v3353_v62 = vld [vmem:[%s4378_s3 + $0x30] sm:$0xff]  }
 0x131   : > { %3421 = vtanh.f32 %v558_v60  ;;  %v676_v2 = vpop.f32.mrb[2].mxu1  ;;  %v2950_v3 = vpop.f32.mrb[3].mxu0  ;;  %v3351_v60 = vld [vmem:[%s4378_s3 + $0x28] sm:$0xff]   ;;  %v3355_v0 = vld [vmem:[%s4378_s3 + $0x38] sm:$0xff]  }
 0x132   : > { %3423 = vtanh.f32 %v679_v63  ;;  %v2970_v4 = vpop.f32.mrb[3].mxu1  ;;  %v3354_v63 = vld [vmem:[%s4378_s3 + $0x70] sm:$0xff]   ;;  %v3356_v1 = vld [vmem:[%s4378_s3 + $0x78] sm:$0xff]   ;;  %v3963_v3 = vld [vmem:[%s3624_s30 + $0x10] sm:$0xff]  }
 0x133   : > { %v3960_v2 = vld [vmem:[%s3622_s13 + $0x8] sm:$0xff]   ;;  %v1046_v5 = vunpack.c.h.bf16 %v3963_v3  ;;  %v1282_v42 = vunpack.c.l.bf16 %v3963_v3 }
 0x134   : > { %v928_v4 = vunpack.c.l.bf16 %v3960_v2  ;;  %v3379_v3 = vld [vmem:[%s4378_s3 + $0x18] sm:$0xff]  }
 0x13b   : > { %v3422_v7 = vpop.eup %3421 }
 0x13c   : > { %v3424_v8 = vpop.eup %3423  ;;  %v3790_v9 = vsel %vm563_vm1, %v3422_v7, %v3696_v34 }
 0x13d   : > { %v565_v11 = vpack.c.bf16 %v3790_v9, %v3790_v9  ;;  %v3798_v12 = vsel %vm684_vm2, %v3424_v8, %v3701_v36 }
 0x13e   : > { %v686_v14 = vpack.c.bf16 %v3798_v12, %v3798_v12 }
 0x13f   : > { %566 = vst [vmem:[%s3615_s21] sm:$0xf] %v565_v11  ;;  %2988 = vmatmul.mubr.bf16.vlgmr.msra.gmra.mrb[4].mxu0 %v565_v11 }
 0x140   : > { %2530 = vst [vmem:[%s3620_s10 + $0x1c] sm:$0xf] %v686_v14  ;;  %3008 = vmatmul.mubr.bf16.vlgmr.msra.gmra.mrb[4].mxu1 %v686_v14  ;;  %3012 = vmatpush3.bf16.msra.mxu0 %v3325_v10 }
 0x141   : > { %3032 = vmatpush3.bf16.msra.mxu1 %v3326_v13  ;;  %3013 = vmatprep.subr.bf16.mxu0 %v3493_v19 }
 0x142   : > { %3033 = vmatprep.subr.bf16.mxu1 %v3493_v19  ;;  %3027 = vmatprep.mubr.msk.bf16.mxu0 %vm3494_vm0, %v3493_v19 }
 0x143   : > { %3047 = vmatprep.mubr.msk.bf16.mxu1 %vm3494_vm0, %v3493_v19 }
 0x144   : > { %3014 = vmatpush3.bf16.msra.mxu0 %v3327_v15 }
 0x145   : > { %3034 = vmatpush3.bf16.msra.mxu1 %v3328_v16  ;;  %3015 = vmatprep.subr.bf16.mxu0 %v3493_v19  ;;  %v1037_v16 = vstv %s1036_s12 }
 0x146   : > { %3035 = vmatprep.subr.bf16.mxu1 %v3493_v19  ;;  %vm1038_vm5 = vcmp.eq.s32.totalorder %v1037_v16, 1 }
 0x148   : > { %3016 = vmatpush3.bf16.msra.mxu0 %v3329_v17  ;;  %v1155_v17 = vstv %s1154_s17 }
 0x149   : > { %3036 = vmatpush3.bf16.msra.mxu1 %v3330_v18  ;;  %3017 = vmatprep.subr.bf16.mxu0 %v3493_v19  ;;  %vm1156_vm6 = vcmp.eq.s32.totalorder %v1155_v17, 1 }
 0x14a   : > { %3037 = vmatprep.subr.bf16.mxu1 %v3493_v19 }
 0x14c   : > { %3018 = vmatpush3.bf16.msra.mxu0 %v3331_v20 }
 0x14d   : > { %3038 = vmatpush3.bf16.msra.mxu1 %v3332_v21  ;;  %3019 = vmatprep.subr.bf16.mxu0 %v3493_v19 }
 0x14e   : > { %3039 = vmatprep.subr.bf16.mxu1 %v3493_v19 }
 0x150   : > { %3020 = vmatpush3.bf16.msra.mxu0 %v3333_v22  ;;  %v3357_v22 = vld [vmem:[%s4378_s3] sm:$0xff]  }
 0x151   : > { %3040 = vmatpush3.bf16.msra.mxu1 %v3334_v23  ;;  %3021 = vmatprep.subr.bf16.mxu0 %v3493_v19 }
 0x152   : > { %3041 = vmatprep.subr.bf16.mxu1 %v3493_v19 }
 0x154   : > { %3022 = vmatpush3.bf16.msra.mxu0 %v3335_v24 }
 0x155   : > { %3042 = vmatpush3.bf16.msra.mxu1 %v3336_v25  ;;  %3023 = vmatprep.subr.bf16.mxu0 %v3493_v19  ;;  %v3358_v25 = vld [vmem:[%s4378_s3 + $0x40] sm:$0xff]  }
 0x156   : > { %3043 = vmatprep.subr.bf16.mxu1 %v3493_v19 }
 0x158   : > { %3024 = vmatpush3.bf16.msra.mxu0 %v3337_v26 }
 0x159   : > { %3044 = vmatpush3.bf16.msra.mxu1 %v3338_v27  ;;  %3025 = vmatprep.subr.bf16.mxu0 %v3493_v19  ;;  %v3359_v27 = vld [vmem:[%s4378_s3 + $0x8] sm:$0xff]  }
 0x15a   : > { %3045 = vmatprep.subr.bf16.mxu1 %v3493_v19 }
 0x15c   : > { %3026 = vmatpush3.bf16.msra.mxu0 %v3339_v28  ;;  %v3360_v28 = vld [vmem:[%s4378_s3 + $0x48] sm:$0xff]  }
 0x15d   : > { %3046 = vmatpush3.bf16.msra.mxu1 %v3340_v29  ;;  %3051 = vmatprep.subr.bf16.mxu0 %v3493_v19  ;;  %v3361_v29 = vld [vmem:[%s4378_s3 + $0x10] sm:$0xff]  }
 0x15e   : > { %3071 = vmatprep.subr.bf16.mxu1 %v3493_v19 }
 0x212   : > { %v791_v32 = vpop.f32.mrb[4].mxu0 }
 0x213   : > { %v797_v33 = vadd.f32 %v791_v32, %v692_v30  ;;  %v909_v34 = vpop.f32.mrb[4].mxu1  ;;  %v2989_v35 = vpop.f32.mrb[5].mxu0  ;;  %v3362_v30 = vld [vmem:[%s4378_s3 + $0x50] sm:$0xff]   ;;  %v3364_v32 = vld [vmem:[%s4378_s3 + $0x58] sm:$0xff]  }
 0x214   : > { %v915_v36 = vadd.f32 %v909_v34, %v810_v31  ;;  %v3009_v37 = vpop.f32.mrb[5].mxu1  ;;  %v794_v38 = vpop.f32.mrb[6].mxu0  ;;  %v3363_v31 = vld [vmem:[%s4378_s3 + $0x18] sm:$0xff]   ;;  %v3366_v34 = vld [vmem:[%s4378_s3 + $0x60] sm:$0xff]   ;;  %v3367_v35 = vld [vmem:[%s4378_s3 + $0x28] sm:$0xff]  }
 0x215   : > { %3425 = vtanh.f32 %v797_v33  ;;  %v912_v39 = vpop.f32.mrb[6].mxu1  ;;  %v2990_v40 = vpop.f32.mrb[7].mxu0  ;;  %v3365_v33 = vld [vmem:[%s4378_s3 + $0x20] sm:$0xff]   ;;  %v3369_v37 = vld [vmem:[%s4378_s3 + $0x30] sm:$0xff]  }
 0x216   : > { %3427 = vtanh.f32 %v915_v36  ;;  %v3010_v41 = vpop.f32.mrb[7].mxu1  ;;  %v3368_v36 = vld [vmem:[%s4378_s3 + $0x68] sm:$0xff]   ;;  %v3370_v38 = vld [vmem:[%s4378_s3 + $0x70] sm:$0xff]   ;;  %v3371_v39 = vld [vmem:[%s4378_s3 + $0x38] sm:$0xff]  }
 0x217   : > { %v3372_v40 = vld [vmem:[%s4378_s3 + $0x78] sm:$0xff]   ;;  %v1164_v41 = vunpack.c.h.bf16 %v3960_v2  ;;  %v3378_v2 = vld [vmem:[%s4378_s3 + $0x50] sm:$0xff]  }
 0x21f   : > { %v3426_v44 = vpop.eup %3425 }
 0x220   : > { %v3428_v45 = vpop.eup %3427  ;;  %v3880_v46 = vsel %vm802_vm3, %v3426_v44, %v3790_v9 }
 0x221   : > { %v804_v48 = vpack.c.bf16 %v3880_v46, %v3880_v46  ;;  %v3888_v49 = vsel %vm920_vm4, %v3428_v45, %v3798_v12 }
 0x222   : > { %v922_v51 = vpack.c.bf16 %v3888_v49, %v3888_v49 }
 0x223   : > { %2540 = vst [vmem:[%s3615_s21 + $0x4] sm:$0xf] %v804_v48  ;;  %3028 = vmatmul.mubr.bf16.vlgmr.msra.gmra.mrb[8].mxu0 %v804_v48 }
 0x224   : > { %2566 = vst [vmem:[%s3620_s10 + $0x18] sm:$0xf] %v922_v51  ;;  %3048 = vmatmul.mubr.bf16.vlgmr.msra.gmra.mrb[8].mxu1 %v922_v51  ;;  %3052 = vmatpush3.bf16.msra.mxu0 %v3341_v47 }
 0x225   : > { %3072 = vmatpush3.bf16.msra.mxu1 %v3342_v50  ;;  %3053 = vmatprep.subr.bf16.mxu0 %v3493_v19 }
 0x226   : > { %3073 = vmatprep.subr.bf16.mxu1 %v3493_v19  ;;  %3067 = vmatprep.mubr.msk.bf16.mxu0 %vm3494_vm0, %v3493_v19 }
 0x227   : > { %3087 = vmatprep.mubr.msk.bf16.mxu1 %vm3494_vm0, %v3493_v19 }
 0x228   : > { %3054 = vmatpush3.bf16.msra.mxu0 %v3343_v52 }
 0x229   : > { %3074 = vmatpush3.bf16.msra.mxu1 %v3344_v53  ;;  %3055 = vmatprep.subr.bf16.mxu0 %v3493_v19  ;;  %v1273_v53 = vstv %s1272_s8 }
 0x22a   : > { %3075 = vmatprep.subr.bf16.mxu1 %v3493_v19  ;;  %vm1274_vm7 = vcmp.eq.s32.totalorder %v1273_v53, 1 }
 0x22c   : > { %3056 = vmatpush3.bf16.msra.mxu0 %v3345_v54  ;;  %v1391_v54 = vstv %s1390_s9 }
 0x22d   : > { %3076 = vmatpush3.bf16.msra.mxu1 %v3346_v55  ;;  %3057 = vmatprep.subr.bf16.mxu0 %v3493_v19  ;;  %vm1392_vm8 = vcmp.eq.s32.totalorder %v1391_v54, 1 }
 0x22e   : > { %3077 = vmatprep.subr.bf16.mxu1 %v3493_v19 }
 0x230   : > { %3058 = vmatpush3.bf16.msra.mxu0 %v3347_v56 }
 0x231   : > { %3078 = vmatpush3.bf16.msra.mxu1 %v3348_v57  ;;  %3059 = vmatprep.subr.bf16.mxu0 %v3493_v19 }
 0x232   : > { %3079 = vmatprep.subr.bf16.mxu1 %v3493_v19 }
 0x234   : > { %3060 = vmatpush3.bf16.msra.mxu0 %v3349_v58  ;;  %v3373_v58 = vld [vmem:[%s4378_s3] sm:$0xff]  }
 0x235   : > { %3080 = vmatpush3.bf16.msra.mxu1 %v3350_v59  ;;  %3061 = vmatprep.subr.bf16.mxu0 %v3493_v19 }
 0x236   : > { %3081 = vmatprep.subr.bf16.mxu1 %v3493_v19 }
 0x238   : > { %3062 = vmatpush3.bf16.msra.mxu0 %v3351_v60 }
 0x239   : > { %3082 = vmatpush3.bf16.msra.mxu1 %v3352_v61  ;;  %3063 = vmatprep.subr.bf16.mxu0 %v3493_v19  ;;  %v3374_v61 = vld [vmem:[%s4378_s3 + $0x40] sm:$0xff]  }
 0x23a   : > { %3083 = vmatprep.subr.bf16.mxu1 %v3493_v19 }
 0x23c   : > { %3064 = vmatpush3.bf16.msra.mxu0 %v3353_v62 }
 0x23d   : > { %3084 = vmatpush3.bf16.msra.mxu1 %v3354_v63  ;;  %3065 = vmatprep.subr.bf16.mxu0 %v3493_v19  ;;  %v3375_v63 = vld [vmem:[%s4378_s3 + $0x8] sm:$0xff]  }
 0x23e   : > { %3085 = vmatprep.subr.bf16.mxu1 %v3493_v19 }
 0x240   : > { %3066 = vmatpush3.bf16.msra.mxu0 %v3355_v0  ;;  %v3376_v0 = vld [vmem:[%s4378_s3 + $0x48] sm:$0xff]  }
 0x241   : > { %3086 = vmatpush3.bf16.msra.mxu1 %v3356_v1  ;;  %3091 = vmatprep.subr.bf16.mxu0 %v3493_v19  ;;  %v3377_v1 = vld [vmem:[%s4378_s3 + $0x10] sm:$0xff]  }
 0x242   : > { %3111 = vmatprep.subr.bf16.mxu1 %v3493_v19 }
 0x2f6   : > { %v1027_v6 = vpop.f32.mrb[8].mxu0 }
 0x2f7   : > { %v1033_v7 = vadd.f32 %v1027_v6, %v928_v4  ;;  %v1145_v8 = vpop.f32.mrb[8].mxu1  ;;  %v3029_v9 = vpop.f32.mrb[9].mxu0  ;;  %v3380_v4 = vld [vmem:[%s4378_s3 + $0x58] sm:$0xff]   ;;  %v3382_v6 = vld [vmem:[%s4378_s3 + $0x60] sm:$0xff]  }
 0x2f8   : > { %v1151_v10 = vadd.f32 %v1145_v8, %v1046_v5  ;;  %v3049_v11 = vpop.f32.mrb[9].mxu1  ;;  %v1030_v12 = vpop.f32.mrb[10].mxu0  ;;  %v3381_v5 = vld [vmem:[%s4378_s3 + $0x20] sm:$0xff]   ;;  %v3384_v8 = vld [vmem:[%s4378_s3 + $0x68] sm:$0xff]   ;;  %v3385_v9 = vld [vmem:[%s4378_s3 + $0x30] sm:$0xff]  }
 0x2f9   : > { %3429 = vtanh.f32 %v1033_v7  ;;  %v1148_v13 = vpop.f32.mrb[10].mxu1  ;;  %v3030_v14 = vpop.f32.mrb[11].mxu0  ;;  %v3383_v7 = vld [vmem:[%s4378_s3 + $0x28] sm:$0xff]   ;;  %v3387_v11 = vld [vmem:[%s4378_s3 + $0x38] sm:$0xff]  }
 0x2fa   : > { %3431 = vtanh.f32 %v1151_v10  ;;  %v3050_v15 = vpop.f32.mrb[11].mxu1  ;;  %v3386_v10 = vld [vmem:[%s4378_s3 + $0x70] sm:$0xff]   ;;  %v3388_v12 = vld [vmem:[%s4378_s3 + $0x78] sm:$0xff]   ;;  %v4146_v13 = vld [vmem:[%s3622_s13 + $0x10] sm:$0xff]  }
 0x2fb   : > { %v4149_v14 = vld [vmem:[%s3624_s30 + $0x8] sm:$0xff]   ;;  %v1400_v15 = vunpack.c.l.bf16 %v4146_v13 }
 0x2fc   : > { %v1518_v16 = vunpack.c.h.bf16 %v4149_v14  ;;  %v1754_v53 = vunpack.c.l.bf16 %v4149_v14  ;;  %v3411_v14 = vld [vmem:[%s4378_s3 + $0x18] sm:$0xff]  }
 0x303   : > { %v3430_v18 = vpop.eup %3429 }
 0x304   : > { %v3432_v20 = vpop.eup %3431  ;;  %v3976_v21 = vsel %vm1038_vm5, %v3430_v18, %v3880_v46 }
 0x305   : > { %v1040_v23 = vpack.c.bf16 %v3976_v21, %v3976_v21  ;;  %v3984_v24 = vsel %vm1156_vm6, %v3432_v20, %v3888_v49 }
 0x306   : > { %v1158_v26 = vpack.c.bf16 %v3984_v24, %v3984_v24 }
 0x307   : > { %2576 = vst [vmem:[%s3615_s21 + $0x8] sm:$0xf] %v1040_v23  ;;  %3068 = vmatmul.mubr.bf16.vlgmr.msra.gmra.mrb[12].mxu0 %v1040_v23 }
 0x308   : > { %2602 = vst [vmem:[%s3620_s10 + $0x14] sm:$0xf] %v1158_v26  ;;  %3088 = vmatmul.mubr.bf16.vlgmr.msra.gmra.mrb[12].mxu1 %v1158_v26  ;;  %3092 = vmatpush3.bf16.msra.mxu0 %v3357_v22 }
 0x309   : > { %3112 = vmatpush3.bf16.msra.mxu1 %v3358_v25  ;;  %3093 = vmatprep.subr.bf16.mxu0 %v3493_v19 }
 0x30a   : > { %3113 = vmatprep.subr.bf16.mxu1 %v3493_v19  ;;  %3107 = vmatprep.mubr.msk.bf16.mxu0 %vm3494_vm0, %v3493_v19 }
 0x30b   : > { %3127 = vmatprep.mubr.msk.bf16.mxu1 %vm3494_vm0, %v3493_v19 }
 0x30c   : > { %3094 = vmatpush3.bf16.msra.mxu0 %v3359_v27 }
 0x30d   : > { %3114 = vmatpush3.bf16.msra.mxu1 %v3360_v28  ;;  %3095 = vmatprep.subr.bf16.mxu0 %v3493_v19  ;;  %v1509_v28 = vstv %s1508_s29 }
 0x30e   : > { %3115 = vmatprep.subr.bf16.mxu1 %v3493_v19  ;;  %vm1510_vm9 = vcmp.eq.s32.totalorder %v1509_v28, 1 }
 0x310   : > { %3096 = vmatpush3.bf16.msra.mxu0 %v3361_v29  ;;  %v1627_v29 = vstv %s1626_s23 }
 0x311   : > { %3116 = vmatpush3.bf16.msra.mxu1 %v3362_v30  ;;  %3097 = vmatprep.subr.bf16.mxu0 %v3493_v19  ;;  %vm1628_vm10 = vcmp.eq.s32.totalorder %v1627_v29, 1 }
 0x312   : > { %3117 = vmatprep.subr.bf16.mxu1 %v3493_v19 }
 0x314   : > { %3098 = vmatpush3.bf16.msra.mxu0 %v3363_v31 }
 0x315   : > { %3118 = vmatpush3.bf16.msra.mxu1 %v3364_v32  ;;  %3099 = vmatprep.subr.bf16.mxu0 %v3493_v19 }
 0x316   : > { %3119 = vmatprep.subr.bf16.mxu1 %v3493_v19 }
 0x318   : > { %3100 = vmatpush3.bf16.msra.mxu0 %v3365_v33  ;;  %v3389_v33 = vld [vmem:[%s4378_s3] sm:$0xff]  }
 0x319   : > { %3120 = vmatpush3.bf16.msra.mxu1 %v3366_v34  ;;  %3101 = vmatprep.subr.bf16.mxu0 %v3493_v19 }
 0x31a   : > { %3121 = vmatprep.subr.bf16.mxu1 %v3493_v19 }
 0x31c   : > { %3102 = vmatpush3.bf16.msra.mxu0 %v3367_v35 }
 0x31d   : > { %3122 = vmatpush3.bf16.msra.mxu1 %v3368_v36  ;;  %3103 = vmatprep.subr.bf16.mxu0 %v3493_v19  ;;  %v3390_v36 = vld [vmem:[%s4378_s3 + $0x40] sm:$0xff]  }
 0x31e   : > { %3123 = vmatprep.subr.bf16.mxu1 %v3493_v19 }
 0x320   : > { %3104 = vmatpush3.bf16.msra.mxu0 %v3369_v37 }
 0x321   : > { %3124 = vmatpush3.bf16.msra.mxu1 %v3370_v38  ;;  %3105 = vmatprep.subr.bf16.mxu0 %v3493_v19  ;;  %v3391_v38 = vld [vmem:[%s4378_s3 + $0x8] sm:$0xff]  }
 0x322   : > { %3125 = vmatprep.subr.bf16.mxu1 %v3493_v19 }
 0x324   : > { %3106 = vmatpush3.bf16.msra.mxu0 %v3371_v39  ;;  %v3392_v39 = vld [vmem:[%s4378_s3 + $0x48] sm:$0xff]  }
 0x325   : > { %3126 = vmatpush3.bf16.msra.mxu1 %v3372_v40  ;;  %3131 = vmatprep.subr.bf16.mxu0 %v3493_v19  ;;  %v3393_v40 = vld [vmem:[%s4378_s3 + $0x10] sm:$0xff]  }
 0x326   : > { %3151 = vmatprep.subr.bf16.mxu1 %v3493_v19 }
 0x3da   : > { %v1263_v43 = vpop.f32.mrb[12].mxu0 }
 0x3db   : > { %v1269_v44 = vadd.f32 %v1263_v43, %v1164_v41  ;;  %v1381_v45 = vpop.f32.mrb[12].mxu1  ;;  %v3069_v46 = vpop.f32.mrb[13].mxu0  ;;  %v3394_v41 = vld [vmem:[%s4378_s3 + $0x50] sm:$0xff]   ;;  %v3396_v43 = vld [vmem:[%s4378_s3 + $0x58] sm:$0xff]  }
 0x3dc   : > { %v1387_v47 = vadd.f32 %v1381_v45, %v1282_v42  ;;  %v3089_v48 = vpop.f32.mrb[13].mxu1  ;;  %v1266_v49 = vpop.f32.mrb[14].mxu0  ;;  %v3395_v42 = vld [vmem:[%s4378_s3 + $0x18] sm:$0xff]   ;;  %v3398_v45 = vld [vmem:[%s4378_s3 + $0x60] sm:$0xff]   ;;  %v3399_v46 = vld [vmem:[%s4378_s3 + $0x28] sm:$0xff]  }
 0x3dd   : > { %3433 = vtanh.f32 %v1269_v44  ;;  %v1384_v50 = vpop.f32.mrb[14].mxu1  ;;  %v3070_v51 = vpop.f32.mrb[15].mxu0  ;;  %v3397_v44 = vld [vmem:[%s4378_s3 + $0x20] sm:$0xff]   ;;  %v3401_v48 = vld [vmem:[%s4378_s3 + $0x30] sm:$0xff]  }
 0x3de   : > { %3435 = vtanh.f32 %v1387_v47  ;;  %v3090_v52 = vpop.f32.mrb[15].mxu1  ;;  %v3400_v47 = vld [vmem:[%s4378_s3 + $0x68] sm:$0xff]   ;;  %v3402_v49 = vld [vmem:[%s4378_s3 + $0x70] sm:$0xff]   ;;  %v3403_v50 = vld [vmem:[%s4378_s3 + $0x38] sm:$0xff]  }
 0x3df   : > { %v3404_v51 = vld [vmem:[%s4378_s3 + $0x78] sm:$0xff]   ;;  %v1636_v52 = vunpack.c.h.bf16 %v4146_v13  ;;  %v3410_v13 = vld [vmem:[%s4378_s3 + $0x50] sm:$0xff]  }
 0x3e7   : > { %v3434_v55 = vpop.eup %3433 }
 0x3e8   : > { %v3436_v56 = vpop.eup %3435  ;;  %v4066_v57 = vsel %vm1274_vm7, %v3434_v55, %v3976_v21 }
 0x3e9   : > { %v1276_v59 = vpack.c.bf16 %v4066_v57, %v4066_v57  ;;  %v4074_v60 = vsel %vm1392_vm8, %v3436_v56, %v3984_v24 }
 0x3ea   : > { %v1394_v62 = vpack.c.bf16 %v4074_v60, %v4074_v60 }
 0x3eb   : > { %2612 = vst [vmem:[%s3615_s21 + $0xc] sm:$0xf] %v1276_v59  ;;  %3108 = vmatmul.mubr.bf16.vlgmr.msra.gmra.mrb[16].mxu0 %v1276_v59 }
 0x3ec   : > { %2638 = vst [vmem:[%s3620_s10 + $0x10] sm:$0xf] %v1394_v62  ;;  %3128 = vmatmul.mubr.bf16.vlgmr.msra.gmra.mrb[16].mxu1 %v1394_v62  ;;  %3132 = vmatpush3.bf16.msra.mxu0 %v3373_v58 }
 0x3ed   : > { %3152 = vmatpush3.bf16.msra.mxu1 %v3374_v61  ;;  %3133 = vmatprep.subr.bf16.mxu0 %v3493_v19 }
 0x3ee   : > { %3153 = vmatprep.subr.bf16.mxu1 %v3493_v19  ;;  %3147 = vmatprep.mubr.msk.bf16.mxu0 %vm3494_vm0, %v3493_v19 }
 0x3ef   : > { %3167 = vmatprep.mubr.msk.bf16.mxu1 %vm3494_vm0, %v3493_v19 }
 0x3f0   : > { %3134 = vmatpush3.bf16.msra.mxu0 %v3375_v63 }
 0x3f1   : > { %3154 = vmatpush3.bf16.msra.mxu1 %v3376_v0  ;;  %3135 = vmatprep.subr.bf16.mxu0 %v3493_v19  ;;  %v1745_v0 = vstv %s1744_s14  ;;  %s2332_s14 = scalar_select %p2331_p1, 1, 0 }
 0x3f2   : > { %3155 = vmatprep.subr.bf16.mxu1 %v3493_v19  ;;  %vm1746_vm11 = vcmp.eq.s32.totalorder %v1745_v0, 1 }
 0x3f4   : > { %3136 = vmatpush3.bf16.msra.mxu0 %v3377_v1  ;;  %v1863_v1 = vstv %s1862_s15 }
 0x3f5   : > { %3156 = vmatpush3.bf16.msra.mxu1 %v3378_v2  ;;  %3137 = vmatprep.subr.bf16.mxu0 %v3493_v19  ;;  %vm1864_vm12 = vcmp.eq.s32.totalorder %v1863_v1, 1 }
 0x3f6   : > { %3157 = vmatprep.subr.bf16.mxu1 %v3493_v19 }
 0x3f8   : > { %3138 = vmatpush3.bf16.msra.mxu0 %v3379_v3 }
 0x3f9   : > { %3158 = vmatpush3.bf16.msra.mxu1 %v3380_v4  ;;  %3139 = vmatprep.subr.bf16.mxu0 %v3493_v19 }
 0x3fa   : > { %3159 = vmatprep.subr.bf16.mxu1 %v3493_v19 }
 0x3fc   : > { %3140 = vmatpush3.bf16.msra.mxu0 %v3381_v5  ;;  %v3405_v5 = vld [vmem:[%s4378_s3] sm:$0xff]  }
 0x3fd   : > { %3160 = vmatpush3.bf16.msra.mxu1 %v3382_v6  ;;  %3141 = vmatprep.subr.bf16.mxu0 %v3493_v19 }
 0x3fe   : > { %3161 = vmatprep.subr.bf16.mxu1 %v3493_v19 }
 0x400   : > { %3142 = vmatpush3.bf16.msra.mxu0 %v3383_v7 }
 0x401   : > { %3162 = vmatpush3.bf16.msra.mxu1 %v3384_v8  ;;  %3143 = vmatprep.subr.bf16.mxu0 %v3493_v19  ;;  %v3406_v8 = vld [vmem:[%s4378_s3 + $0x40] sm:$0xff]  }
 0x402   : > { %3163 = vmatprep.subr.bf16.mxu1 %v3493_v19 }
 0x404   : > { %3144 = vmatpush3.bf16.msra.mxu0 %v3385_v9 }
 0x405   : > { %3164 = vmatpush3.bf16.msra.mxu1 %v3386_v10  ;;  %3145 = vmatprep.subr.bf16.mxu0 %v3493_v19  ;;  %v3407_v10 = vld [vmem:[%s4378_s3 + $0x8] sm:$0xff]  }
 0x406   : > { %3165 = vmatprep.subr.bf16.mxu1 %v3493_v19 }
 0x408   : > { %3146 = vmatpush3.bf16.msra.mxu0 %v3387_v11  ;;  %v3408_v11 = vld [vmem:[%s4378_s3 + $0x48] sm:$0xff]  }
 0x409   : > { %3166 = vmatpush3.bf16.msra.mxu1 %v3388_v12  ;;  %3171 = vmatprep.subr.bf16.mxu0 %v3493_v19  ;;  %v3409_v12 = vld [vmem:[%s4378_s3 + $0x10] sm:$0xff]  }
 0x40a   : > { %3191 = vmatprep.subr.bf16.mxu1 %v3493_v19 }
 0x4be   : > { %v1499_v17 = vpop.f32.mrb[16].mxu0 }
 0x4bf   : > { %v1505_v18 = vadd.f32 %v1499_v17, %v1400_v15  ;;  %v1617_v20 = vpop.f32.mrb[16].mxu1  ;;  %v3109_v21 = vpop.f32.mrb[17].mxu0  ;;  %v3412_v15 = vld [vmem:[%s4378_s3 + $0x58] sm:$0xff]   ;;  %v3414_v17 = vld [vmem:[%s4378_s3 + $0x60] sm:$0xff]  }
 0x4c0   : > { %v1623_v22 = vadd.f32 %v1617_v20, %v1518_v16  ;;  %v3129_v23 = vpop.f32.mrb[17].mxu1  ;;  %v1502_v24 = vpop.f32.mrb[18].mxu0  ;;  %v3413_v16 = vld [vmem:[%s4378_s3 + $0x20] sm:$0xff]   ;;  %v3416_v20 = vld [vmem:[%s4378_s3 + $0x68] sm:$0xff]   ;;  %v3417_v21 = vld [vmem:[%s4378_s3 + $0x30] sm:$0xff]  }
 0x4c1   : > { %3437 = vtanh.f32 %v1505_v18  ;;  %v1620_v25 = vpop.f32.mrb[18].mxu1  ;;  %v3110_v26 = vpop.f32.mrb[19].mxu0  ;;  %v3415_v18 = vld [vmem:[%s4378_s3 + $0x28] sm:$0xff]   ;;  %v3419_v23 = vld [vmem:[%s4378_s3 + $0x38] sm:$0xff]  }
 0x4c2   : > { %3439 = vtanh.f32 %v1623_v22  ;;  %v3130_v27 = vpop.f32.mrb[19].mxu1  ;;  %v3418_v22 = vld [vmem:[%s4378_s3 + $0x70] sm:$0xff]   ;;  %v3420_v24 = vld [vmem:[%s4378_s3 + $0x78] sm:$0xff]   ;;  %v2711_v25 = vld [vmem:[%s3622_s13 + $0x18] sm:$0xff]   ;;  %s1980_s13 = scalar_select %p4333_p12, 1, 0 }
 0x4c3   : > { %v2721_v26 = vld [vmem:[%s3624_s30] sm:$0xff]   ;;  %v1872_v27 = vunpack.c.l.bf16 %v2711_v25  ;;  %s2098_s30 = scalar_select %p2097_p13, 1, 0 }
 0x4c4   : > { %v1990_v28 = vunpack.c.h.bf16 %v2721_v26 }
 0x4cb   : > { %v3438_v30 = vpop.eup %3437 }
 0x4cc   : > { %v3440_v31 = vpop.eup %3439  ;;  %v4162_v32 = vsel %vm1510_vm9, %v3438_v30, %v4066_v57 }
 0x4cd   : > { %v1512_v34 = vpack.c.bf16 %v4162_v32, %v4162_v32  ;;  %v4170_v35 = vsel %vm1628_vm10, %v3440_v31, %v4074_v60 }
 0x4ce   : > { %v1630_v37 = vpack.c.bf16 %v4170_v35, %v4170_v35 }
 0x4cf   : > { %2648 = vst [vmem:[%s3615_s21 + $0x10] sm:$0xf] %v1512_v34  ;;  %3148 = vmatmul.mubr.bf16.vlgmr.msra.gmra.mrb[20].mxu0 %v1512_v34 }
 0x4d0   : > { %2674 = vst [vmem:[%s3620_s10 + $0xc] sm:$0xf] %v1630_v37  ;;  %3168 = vmatmul.mubr.bf16.vlgmr.msra.gmra.mrb[20].mxu1 %v1630_v37  ;;  %3172 = vmatpush3.bf16.msra.mxu0 %v3389_v33 }
 0x4d1   : > { %3192 = vmatpush3.bf16.msra.mxu1 %v3390_v36  ;;  %3173 = vmatprep.subr.bf16.mxu0 %v3493_v19 }
 0x4d2   : > { %3193 = vmatprep.subr.bf16.mxu1 %v3493_v19  ;;  %3187 = vmatprep.mubr.msk.bf16.mxu0 %vm3494_vm0, %v3493_v19 }
 0x4d3   : > { %3207 = vmatprep.mubr.msk.bf16.mxu1 %vm3494_vm0, %v3493_v19 }
 0x4d4   : > { %3174 = vmatpush3.bf16.msra.mxu0 %v3391_v38  ;;  %v1981_v38 = vstv %s1980_s13 }
 0x4d5   : > { %3194 = vmatpush3.bf16.msra.mxu1 %v3392_v39  ;;  %3175 = vmatprep.subr.bf16.mxu0 %v3493_v19  ;;  %v2099_v39 = vstv %s2098_s30  ;;  %vm1982_vm13 = vcmp.eq.s32.totalorder %v1981_v38, 1 }
 0x4d6   : > { %3195 = vmatprep.subr.bf16.mxu1 %v3493_v19  ;;  %vm2100_vm14 = vcmp.eq.s32.totalorder %v2099_v39, 1 }
 0x4d8   : > { %3176 = vmatpush3.bf16.msra.mxu0 %v3393_v40 }
 0x4d9   : > { %3196 = vmatpush3.bf16.msra.mxu1 %v3394_v41  ;;  %3177 = vmatprep.subr.bf16.mxu0 %v3493_v19 }
 0x4da   : > { %3197 = vmatprep.subr.bf16.mxu1 %v3493_v19 }
 0x4dc   : > { %3178 = vmatpush3.bf16.msra.mxu0 %v3395_v42 }
 0x4dd   : > { %3198 = vmatpush3.bf16.msra.mxu1 %v3396_v43  ;;  %3179 = vmatprep.subr.bf16.mxu0 %v3493_v19 }
 0x4de   : > { %3199 = vmatprep.subr.bf16.mxu1 %v3493_v19 }
 0x4e0   : > { %3180 = vmatpush3.bf16.msra.mxu0 %v3397_v44 }
 0x4e1   : > { %3200 = vmatpush3.bf16.msra.mxu1 %v3398_v45  ;;  %3181 = vmatprep.subr.bf16.mxu0 %v3493_v19 }
 0x4e2   : > { %3201 = vmatprep.subr.bf16.mxu1 %v3493_v19 }
 0x4e4   : > { %3182 = vmatpush3.bf16.msra.mxu0 %v3399_v46  ;;  %v2108_v46 = vunpack.c.h.bf16 %v2711_v25 }
 0x4e5   : > { %3202 = vmatpush3.bf16.msra.mxu1 %v3400_v47  ;;  %3183 = vmatprep.subr.bf16.mxu0 %v3493_v19  ;;  %v2224_v47 = vunpack.c.l.bf16 %v2721_v26 }
 0x4e6   : > { %3203 = vmatprep.subr.bf16.mxu1 %v3493_v19 }
 0x4e8   : > { %3184 = vmatpush3.bf16.msra.mxu0 %v3401_v48 }
 0x4e9   : > { %3204 = vmatpush3.bf16.msra.mxu1 %v3402_v49  ;;  %3185 = vmatprep.subr.bf16.mxu0 %v3493_v19 }
 0x4ea   : > { %3205 = vmatprep.subr.bf16.mxu1 %v3493_v19 }
 0x4ec   : > { %3186 = vmatpush3.bf16.msra.mxu0 %v3403_v50 }
 0x4ed   : > { %3206 = vmatpush3.bf16.msra.mxu1 %v3404_v51  ;;  %3211 = vmatprep.subr.bf16.mxu0 %v3493_v19 }
 0x4ee   : > { %3231 = vmatprep.subr.bf16.mxu1 %v3493_v19 }
 0x5a2   : > { %v1735_v54 = vpop.f32.mrb[20].mxu0 }
 0x5a3   : > { %v1741_v55 = vadd.f32 %v1735_v54, %v1636_v52  ;;  %v1853_v56 = vpop.f32.mrb[20].mxu1  ;;  %v3149_v57 = vpop.f32.mrb[21].mxu0 }
 0x5a4   : > { %v1859_v58 = vadd.f32 %v1853_v56, %v1754_v53  ;;  %v3169_v59 = vpop.f32.mrb[21].mxu1  ;;  %v1738_v60 = vpop.f32.mrb[22].mxu0 }
 0x5a5   : > { %3441 = vtanh.f32 %v1741_v55  ;;  %v1856_v61 = vpop.f32.mrb[22].mxu1  ;;  %v3150_v62 = vpop.f32.mrb[23].mxu0  ;;  %v2333_v59 = vstv %s2332_s14 }
 0x5a6   : > { %3443 = vtanh.f32 %v1859_v58  ;;  %v3170_v63 = vpop.f32.mrb[23].mxu1  ;;  %v2217_v58 = vstv %s2216_s16 }
 0x5a7   : > { %vm2218_vm15 = vcmp.eq.s32.totalorder %v2217_v58, 1 }
 0x5af   : > { %v3442_v2 = vpop.eup %3441 }
 0x5b0   : > { %v3444_v3 = vpop.eup %3443  ;;  %v4252_v4 = vsel %vm1746_vm11, %v3442_v2, %v4162_v32 }
 0x5b1   : > { %v1748_v6 = vpack.c.bf16 %v4252_v4, %v4252_v4  ;;  %v4260_v7 = vsel %vm1864_vm12, %v3444_v3, %v4170_v35 }
 0x5b2   : > { %v1866_v9 = vpack.c.bf16 %v4260_v7, %v4260_v7 }
 0x5b3   : > { %2684 = vst [vmem:[%s3615_s21 + $0x14] sm:$0xf] %v1748_v6  ;;  %3188 = vmatmul.mubr.bf16.vlgmr.msra.gmra.mrb[24].mxu0 %v1748_v6 }
 0x5b4   : > { %2710 = vst [vmem:[%s3620_s10 + $0x8] sm:$0xf] %v1866_v9  ;;  %3208 = vmatmul.mubr.bf16.vlgmr.msra.gmra.mrb[24].mxu1 %v1866_v9  ;;  %3212 = vmatpush3.bf16.msra.mxu0 %v3405_v5 }
 0x5b5   : > { %3232 = vmatpush3.bf16.msra.mxu1 %v3406_v8  ;;  %3213 = vmatprep.subr.bf16.mxu0 %v3493_v19 }
 0x5b6   : > { %3233 = vmatprep.subr.bf16.mxu1 %v3493_v19  ;;  %3227 = vmatprep.mubr.msk.bf16.mxu0 %vm3494_vm0, %v3493_v19 }
 0x5b7   : > { %3247 = vmatprep.mubr.msk.bf16.mxu1 %vm3494_vm0, %v3493_v19  ;;  %vm2334_vm0 = vcmp.eq.s32.totalorder %v2333_v59, 1 }
 0x5b8   : > { %3214 = vmatpush3.bf16.msra.mxu0 %v3407_v10 }
 0x5b9   : > { %3234 = vmatpush3.bf16.msra.mxu1 %v3408_v11  ;;  %3215 = vmatprep.subr.bf16.mxu0 %v3493_v19 }
 0x5ba   : > { %3235 = vmatprep.subr.bf16.mxu1 %v3493_v19 }
 0x5bc   : > { %3216 = vmatpush3.bf16.msra.mxu0 %v3409_v12 }
 0x5bd   : > { %3236 = vmatpush3.bf16.msra.mxu1 %v3410_v13  ;;  %3217 = vmatprep.subr.bf16.mxu0 %v3493_v19 }
 0x5be   : > { %3237 = vmatprep.subr.bf16.mxu1 %v3493_v19 }
 0x5c0   : > { %3218 = vmatpush3.bf16.msra.mxu0 %v3411_v14 }
 0x5c1   : > { %3238 = vmatpush3.bf16.msra.mxu1 %v3412_v15  ;;  %3219 = vmatprep.subr.bf16.mxu0 %v3493_v19 }
 0x5c2   : > { %3239 = vmatprep.subr.bf16.mxu1 %v3493_v19 }
 0x5c4   : > { %3220 = vmatpush3.bf16.msra.mxu0 %v3413_v16 }
 0x5c5   : > { %3240 = vmatpush3.bf16.msra.mxu1 %v3414_v17  ;;  %3221 = vmatprep.subr.bf16.mxu0 %v3493_v19 }
 0x5c6   : > { %3241 = vmatprep.subr.bf16.mxu1 %v3493_v19 }
 0x5c8   : > { %3222 = vmatpush3.bf16.msra.mxu0 %v3415_v18 }
 0x5c9   : > { %3242 = vmatpush3.bf16.msra.mxu1 %v3416_v20  ;;  %3223 = vmatprep.subr.bf16.mxu0 %v3493_v19 }
 0x5ca   : > { %3243 = vmatprep.subr.bf16.mxu1 %v3493_v19 }
 0x5cc   : > { %3224 = vmatpush3.bf16.msra.mxu0 %v3417_v21 }
 0x5cd   : > { %3244 = vmatpush3.bf16.msra.mxu1 %v3418_v22  ;;  %3225 = vmatprep.subr.bf16.mxu0 %v3493_v19 }
 0x5ce   : > { %3245 = vmatprep.subr.bf16.mxu1 %v3493_v19 }
 0x5d0   : > { %3226 = vmatpush3.bf16.msra.mxu0 %v3419_v23 }
 0x5d1   : > { %3246 = vmatpush3.bf16.msra.mxu1 %v3420_v24 }
 0x686   : > { %v1971_v29 = vpop.f32.mrb[24].mxu0 }
 0x687   : > { %v1977_v30 = vadd.f32 %v1971_v29, %v1872_v27  ;;  %v2089_v31 = vpop.f32.mrb[24].mxu1  ;;  %v3189_v32 = vpop.f32.mrb[25].mxu0 }
 0x688   : > { %v2095_v33 = vadd.f32 %v2089_v31, %v1990_v28  ;;  %v3209_v19 = vpop.f32.mrb[25].mxu1  ;;  %v1974_v34 = vpop.f32.mrb[26].mxu0 }
 0x689   : > { %3445 = vtanh.f32 %v1977_v30  ;;  %v2092_v35 = vpop.f32.mrb[26].mxu1  ;;  %v3190_v36 = vpop.f32.mrb[27].mxu0 }
 0x68a   : > { %3447 = vtanh.f32 %v2095_v33  ;;  %v3210_v37 = vpop.f32.mrb[27].mxu1 }
 0x693   : > { %v3446_v40 = vpop.eup %3445 }
 0x694   : > { %v3448_v41 = vpop.eup %3447  ;;  %v1983_v42 = vsel %vm1982_vm13, %v3446_v40, %v4252_v4 }
 0x695   : > { %v1984_v43 = vpack.c.bf16 %v1983_v42, %v1983_v42  ;;  %v2101_v44 = vsel %vm2100_vm14, %v3448_v41, %v4260_v7 }
 0x696   : > { %v2102_v45 = vpack.c.bf16 %v2101_v44, %v2101_v44 }
 0x697   : > { %2720 = vst [vmem:[%s3615_s21 + $0x18] sm:$0xf] %v1984_v43  ;;  %3228 = vmatmul.mubr.bf16.vlgmr.msra.gmra.mrb[28].mxu0 %v1984_v43 }
 0x698   : > { %2746 = vst [vmem:[%s3620_s10 + $0x4] sm:$0xf] %v2102_v45  ;;  %3248 = vmatmul.mubr.bf16.vlgmr.msra.gmra.mrb[28].mxu1 %v2102_v45 }
 0x76a   : > { %v2207_v48 = vpop.f32.mrb[28].mxu0 }
 0x76b   : > { %v2213_v49 = vadd.f32 %v2207_v48, %v2108_v46  ;;  %v2323_v50 = vpop.f32.mrb[28].mxu1  ;;  %v3229_v51 = vpop.f32.mrb[29].mxu0 }
 0x76c   : > { %v2329_v52 = vadd.f32 %v2323_v50, %v2224_v47  ;;  %v3249_v53 = vpop.f32.mrb[29].mxu1  ;;  %v2210_v54 = vpop.f32.mrb[30].mxu0 }
 0x76d   : > { %3449 = vtanh.f32 %v2213_v49  ;;  %v2326_v55 = vpop.f32.mrb[30].mxu1  ;;  %v3230_v56 = vpop.f32.mrb[31].mxu0 }
 0x76e   : > { %3451 = vtanh.f32 %v2329_v52  ;;  %v3250_v57 = vpop.f32.mrb[31].mxu1 }
 0x777   : > { %v3450_v60 = vpop.eup %3449 }
 0x778   : > { %v3452_v61 = vpop.eup %3451  ;;  %v2219_v62 = vsel %vm2218_vm15, %v3450_v60, %v1983_v42 }
 0x779   : > { %v2220_v63 = vpack.c.bf16 %v2219_v62, %v2219_v62  ;;  %2338 = vst [vmem:[#allocation2] sm:$0xff] %v2219_v62  ;;  %2339 = vst [vmem:[%s4381_s6] sm:$0xff] %v2219_v62  ;;  %v2335_v0 = vsel %vm2334_vm0, %v3452_v61, %v2101_v44 }
 0x77a   : > { %v2336_v1 = vpack.c.bf16 %v2335_v0, %v2335_v0  ;;  %2340 = vst [vmem:[#allocation2 + $0x8] sm:$0xff] %v2335_v0  ;;  %2781 = vst [vmem:[%s4381_s6 + $0x8] sm:$0xff] %v2335_v0 }
 0x77b   : > { %2756 = vst [vmem:[%s3615_s21 + $0x1c] sm:$0xf] %v2220_v63 }
 0x77c   : > { %2337 = vst [vmem:[%s3620_s10] sm:$0xf] %v2336_v1 }
 0x77d PF: > { %p14_p2 = scmp.ge.s32.totalorder %s3559_s27, 4   ;;  %s4390_s21 = smov %s3479_s22 }
 0x77e   : > { %s4391_s22 = smov %s3578_s11  ;;  %s4392_s23 = smov %s3487_s24 }
 0x77f   : > { %s4393_s24 = smov %s3569_s7  ;;  %s4394_s25 = smov %s3559_s27 }
 0x780   :  { %16 = sbr.rel (!%p14_p2) target bundleno = 3 (0x3), region = 216 }

// kernel: rnn_frame_forward.3
= control target key start
LH: loop header
LB: loop body
LE: loop exit
PB: predicated region body
PF: predicated region fallthrough
CT: control target
= control target key end

     0   :  { %s3528_s21 = smov 0   ;;  %s3530_s22 = smov 0   ;;  %s4385_s0 = inlined_call_operand.vmem [shape: bf16[16,8,256], index: 0, kind: input, shape index: {}, may-alias: {0,1}]   ;;  %s4386_s1 = inlined_call_operand.vmem [shape: bf16[16,8,256], index: 1, kind: input, shape index: {}, may-alias: {0,1}]   ;;  %s4387_s2 = inlined_call_operand.vmem [shape: f32[2,8,128], index: 2, kind: input, shape index: {}]   ;;  %s4388_s3 = inlined_call_operand.vmem [shape: bf16[2,128,128], index: 3, kind: input, shape index: {}]   ;;  %s4389_s4 = inlined_call_operand.vmem [shape: f32[16,8,128], index: 4, kind: output, shape index: {0}]   ;;  %s4390_s5 = inlined_call_operand.vmem [shape: f32[16,8,128], index: 5, kind: output, shape index: {1}]   ;;  %s4391_s6 = inlined_call_operand.vmem [shape: f32[2,8,128], index: 6, kind: output, shape index: {2}]  }
   0x1   :  { %s3532_s23 = smov 0   ;;  %s3534_s24 = smov 0  }
   0x2   :  { %s3536_s25 = smov 0  }
   0x3 LB: > { %s3554_s26 = sadd.s32 4294967295, %s3489_s25   ;;  %s3557_s27 = sadd.s32 1, %s3489_s25   ;;  %s3489_s25 = sphi %s3536_s25, %s4404_s25   ;;  %s3485_s24 = sphi %s3534_s24, %s4403_s24   ;;  %s3481_s23 = sphi %s3532_s23, %s4402_s23   ;;  %s3477_s22 = sphi %s3530_s22, %s4401_s22   ;;  %s3473_s21 = sphi %s3528_s21, %s4400_s21  }
   0x4   : > { %s21_s28 = ssub.s32 %s3489_s25, %s3557_s27  ;;  %s24_s29 = sadd.s32 1, %s3485_s24 }
   0x5   : > { %p22_p0 = scmp.eq.s32.totalorder %s21_s28, 0  ;;  %p31_p1 = scmp.ne.s32.totalorder %s3485_s24, %s3481_s23 }
   0x6   : > { %p32_p2 = scmp.eq.s32.totalorder %s3489_s25, 0  ;;  %s47_s30 = ssub.s32 1, %s3489_s25 }
   0x7   : > { %s3567_s7 = scalar_select %p22_p0, %s3485_s24, %s24_s29  }
   0x8   : > { %p33_p3 = por %p32_p2, %p31_p1  ;;  %s48_s8 = ssub.s32 1, %s3557_s27 }
   0x9   : > { %s49_s9 = ssub.s32 %s47_s30, %s48_s8  ;;  %s52_s10 = sadd.s32 1, %s3477_s22 }
   0xa   : > { %p50_p4 = scmp.eq.s32.totalorder %s49_s9, 0  ;;  %p59_p5 = scmp.ne.s32.totalorder %s3477_s22, %s3473_s21 }
   0xb   : > { %p2469_p7 = scmp.ge.s32.totalorder %s3489_s25, 2 }
   0xc   : > { %s3576_s11 = scalar_select %p50_p4, %s3477_s22, %s52_s10  }
   0xd   : > { %p3578_p6 = por %p59_p5, %p32_p2  ;;  %208 = sbr.rel (%p2469_p7) target bundleno = 38 (0x26), region = 24 }
  0x14   : > { %211 = sbr.rel (!%p33_p3) target bundleno = 29 (0x1d), region = 28  ;;  %s213_s13 = sand.u32 (%p33_p3), 1, %s3485_s24  }
  0x15   : > { %s2783_s14 = sshll.u32 (%p33_p3), %s3489_s25, 6  ;;  %s2470_s15 = sshll.u32 (%p33_p3), %s213_s13, 5 }
  0x16   : > { %s219_s18 = scalar_lea.vmem (%p33_p3), %s4385_s0, %s2783_s14  ;;  %s215_s19 = scalar_lea.vmem (%p33_p3), [#allocation3], %s2470_s15 }
  0x17   : > { %v235_v0 = vld [vmem:[%s219_s18] sm:$0xf] (%p33_p3)  ;;  %v237_v1 = vld [vmem:[%s219_s18 + $0x8] sm:$0xf] (%p33_p3)  ;;  %v239_v2 = vld [vmem:[%s219_s18 + $0x10] sm:$0xf] (%p33_p3) }
  0x18   : > { %236 = vst [vmem:[%s215_s19] sm:$0xf] (%p33_p3), %v235_v0  ;;  %238 = vst [vmem:[%s215_s19 + $0x4] sm:$0xf] (%p33_p3), %v237_v1  ;;  %v241_v3 = vld [vmem:[%s219_s18 + $0x18] sm:$0xf] (%p33_p3) }
  0x19   : > { %v243_v4 = vld [vmem:[%s219_s18 + $0x20] sm:$0xf] (%p33_p3)  ;;  %240 = vst [vmem:[%s215_s19 + $0x8] sm:$0xf] (%p33_p3), %v239_v2  ;;  %242 = vst [vmem:[%s215_s19 + $0xc] sm:$0xf] (%p33_p3), %v241_v3 }
  0x1a   : > { %244 = vst [vmem:[%s215_s19 + $0x10] sm:$0xf] (%p33_p3), %v243_v4  ;;  %v245_v5 = vld [vmem:[%s219_s18 + $0x28] sm:$0xf] (%p33_p3)  ;;  %v247_v6 = vld [vmem:[%s219_s18 + $0x30] sm:$0xf] (%p33_p3) }
  0x1b   : > { %v249_v7 = vld [vmem:[%s219_s18 + $0x38] sm:$0xf]  ;;  %246 = vst [vmem:[%s215_s19 + $0x14] sm:$0xf] %v245_v5  ;;  %248 = vst [vmem:[%s215_s19 + $0x18] sm:$0xf] %v247_v6 }
  0x1c   : > { %250 = vst [vmem:[%s215_s19 + $0x1c] sm:$0xf] %v249_v7 }
  0x1d PF: > { %289 = sbr.rel (!%p3578_p6) target bundleno = 38 (0x26), region = 69  ;;  %s291_s20 = sand.u32 (%p3578_p6), 1, %s3477_s22  }
  0x1e   : > { %s2784_s28 = sshll.u32 (%p3578_p6), %s47_s30, 6  ;;  %s2474_s29 = sshll.u32 (%p3578_p6), %s291_s20, 5 }
  0x1f   : > { %s2397_s10 = scalar_lea.vmem (%p3578_p6), %s4386_s1, %s2784_s28  ;;  %s293_s13 = scalar_lea.vmem (%p3578_p6), [#allocation4], %s2474_s29 }
  0x20   : > { %v2477_v8 = vld [vmem:[%s2397_s10 + $0x4] sm:$0xf] (%p3578_p6)  ;;  %v2478_v9 = vld [vmem:[%s2397_s10 + $0xc] sm:$0xf] (%p3578_p6)  ;;  %v2479_v10 = vld [vmem:[%s2397_s10 + $0x14] sm:$0xf] (%p3578_p6) }
  0x21   : > { %316 = vst [vmem:[%s293_s13] sm:$0xf] (%p3578_p6), %v2477_v8  ;;  %318 = vst [vmem:[%s293_s13 + $0x4] sm:$0xf] (%p3578_p6), %v2478_v9  ;;  %v2480_v11 = vld [vmem:[%s2397_s10 + $0x1c] sm:$0xf] (%p3578_p6) }
  0x22   : > { %v2481_v12 = vld [vmem:[%s2397_s10 + $0x24] sm:$0xf] (%p3578_p6)  ;;  %320 = vst [vmem:[%s293_s13 + $0x8] sm:$0xf] (%p3578_p6), %v2479_v10  ;;  %322 = vst [vmem:[%s293_s13 + $0xc] sm:$0xf] (%p3578_p6), %v2480_v11 }
  0x23   : > { %324 = vst [vmem:[%s293_s13 + $0x10] sm:$0xf] (%p3578_p6), %v2481_v12  ;;  %v2482_v13 = vld [vmem:[%s2397_s10 + $0x2c] sm:$0xf] (%p3578_p6)  ;;  %v2483_v14 = vld [vmem:[%s2397_s10 + $0x34] sm:$0xf] (%p3578_p6) }
  0x24   : > { %v2484_v15 = vld [vmem:[%s2397_s10 + $0x3c] sm:$0xf]  ;;  %326 = vst [vmem:[%s293_s13 + $0x14] sm:$0xf] %v2482_v13  ;;  %328 = vst [vmem:[%s293_s13 + $0x18] sm:$0xf] %v2483_v14 }
  0x25   : > { %330 = vst [vmem:[%s293_s13 + $0x1c] sm:$0xf] %v2484_v15 }
  0x26 PF: > { %p2485_p8 = scmp.ge.s32.totalorder %s3489_s25, 1  ;;  %p368_p9 = scmp.lt.s32.totalorder %s3489_s25, 3 }
  0x28   : > { %p369_p10 = pnand %p2485_p8, %p368_p9 }
  0x29   : > { %s375_s30 = sand.u32 (!%p369_p10), 1, %s3481_s23   ;;  %s382_s12 = sand.u32 (!%p369_p10), 1, %s3473_s21  }
  0x2a   : > { %372 = sbr.rel (%p369_p10) target bundleno = 1916 (0x77c), region = 110  ;;  %s2486_s14 = sshll.u32 (!%p369_p10), %s375_s30, 5 }
  0x2b   : > { %s2487_s15 = sshll.u32 (!%p369_p10), %s382_s12, 5  ;;  %s3601_s16 = sshll.u32 (!%p369_p10), %s3554_s26, 3 }
  0x2c   : > { %s430_s17 = ssub.s32 (!%p369_p10), 1, %s3554_s26  ;;  %p425_p11 = scmp.lt.s32.totalorder (!%p369_p10), %s3601_s16, 15 }
  0x2d   : > { %s3605_s18 = sshll.u32 (!%p369_p10), %s430_s17, 3  ;;  %s3620_s13 = scalar_lea.vmem (!%p369_p10), [#allocation3], %s2486_s14 }
  0x2e   : > { %p432_p12 = scmp.lt.s32.totalorder (!%p369_p10), %s3605_s18, 15  ;;  %s3622_s30 = scalar_lea.vmem (!%p369_p10), [#allocation4], %s2487_s15 }
  0x2f   : > { %p2492_p13 = scmp.ne.s32.totalorder (!%p369_p10), %s3554_s26, 0 }
  0x31   : > { %s426_s25 = scalar_select %p425_p11, %s3601_s16, 15 }
  0x32   : > { %s433_s19 = scalar_select %p432_p12, %s3605_s18, 15 }
  0x33   : > { %s2489_s20 = sshll.u32 %s426_s25, 3  ;;  %442 = sbr.rel (%p2492_p13) target bundleno = 58 (0x3a), region = 122  ;;  %v443_v16 = vld [vmem:[%s4387_s2] sm:$0xff] (!%p2492_p13)  ;;  %v444_v17 = vld [vmem:[%s4387_s2 + $0x8] sm:$0xff] (!%p2492_p13) }
  0x34   : > { %s3613_s21 = scalar_lea.vmem %s4389_s4, %s2489_s20  ;;  %s2491_s23 = sshll.u32 %s433_s19, 3  ;;  %445 = vst [vmem:[#allocation2] sm:$0xff] (!%p2492_p13), %v443_v16  ;;  %446 = vst [vmem:[#allocation2 + $0x8] sm:$0xff] (!%p2492_p13), %v444_v17 }
  0x35   : > { %s3618_s10 = scalar_lea.vmem %s4390_s5, %s2491_s23 }
  0x3a PF: > { %v3291_v18 = vld [vmem:[%s4388_s3] sm:$0xff]   ;;  %v3491_v19 = vmov 0.0   ;;  %v3293_v21 = vld [vmem:[%s4388_s3 + $0x8] sm:$0xff]   ;;  %vm3492_vm0 = vmmov 0   ;;  %v3295_v23 = vld [vmem:[%s4388_s3 + $0x10] sm:$0xff]   ;;  %s568_s20 = sadd.s32 7, %s3605_s18 }
  0x3b   : > { %2929 = vmatprep.subr.bf16.mxu0 %v3491_v19  ;;  %2949 = vmatprep.subr.bf16.mxu1 %v3491_v19  ;;  %v3292_v20 = vld [vmem:[%s4388_s3 + $0x40] sm:$0xff]   ;;  %v3294_v22 = vld [vmem:[%s4388_s3 + $0x48] sm:$0xff]   ;;  %v3296_v24 = vld [vmem:[%s4388_s3 + $0x50] sm:$0xff]   ;;  %p560_p0 = scmp.lt.s32.totalorder %s3601_s16, 12  ;;  %p680_p1 = scmp.lt.s32.totalorder %s568_s20, 12 }
  0x3c   : > { %2930 = vmatpush3.bf16.msra.mxu0 %v3291_v18  ;;  %2945 = vmatprep.mubr.msk.bf16.mxu0 %vm3492_vm0, %v3491_v19  ;;  %v3297_v25 = vld [vmem:[%s4388_s3 + $0x18] sm:$0xff]   ;;  %v3299_v27 = vld [vmem:[%s4388_s3 + $0x20] sm:$0xff]   ;;  %v3301_v29 = vld [vmem:[%s4388_s3 + $0x28] sm:$0xff]   ;;  %s687_s9 = sadd.s32 1, %s3601_s16  ;;  %s805_s12 = sadd.s32 6, %s3605_s18 }
  0x3d   : > { %2950 = vmatpush3.bf16.msra.mxu1 %v3292_v20  ;;  %2931 = vmatprep.subr.bf16.mxu0 %v3491_v19  ;;  %v3298_v26 = vld [vmem:[%s4388_s3 + $0x58] sm:$0xff]   ;;  %v3300_v28 = vld [vmem:[%s4388_s3 + $0x60] sm:$0xff]   ;;  %v3302_v30 = vld [vmem:[%s4388_s3 + $0x68] sm:$0xff]   ;;  %s561_s19 = scalar_select %p560_p0, 1, 0 }
  0x3e   : > { %2951 = vmatprep.subr.bf16.mxu1 %v3491_v19  ;;  %2965 = vmatprep.mubr.msk.bf16.mxu1 %vm3492_vm0, %v3491_v19  ;;  %v3303_v31 = vld [vmem:[%s4388_s3 + $0x30] sm:$0xff]   ;;  %v3305_v33 = vld [vmem:[%s4388_s3 + $0x38] sm:$0xff]   ;;  %v3694_v34 = vld [vmem:[#allocation2] sm:$0xff]  ;;  %s681_s28 = scalar_select %p680_p1, 1, 0 }
  0x3f   : > { %v3304_v32 = vld [vmem:[%s4388_s3 + $0x70] sm:$0xff]   ;;  %v3306_v35 = vld [vmem:[%s4388_s3 + $0x78] sm:$0xff]   ;;  %v3699_v36 = vld [vmem:[#allocation2 + $0x8] sm:$0xff]  ;;  %v453_v38 = vpack.c.bf16 %v3694_v34, %v3694_v34  ;;  %v562_v5 = vstv %s561_s19  ;;  %p3873_p2 = scmp.lt.s32.totalorder %s687_s9, 12  ;;  %p916_p3 = scmp.lt.s32.totalorder %s805_s12, 12 }
  0x40   : > { %2932 = vmatpush3.bf16.msra.mxu0 %v3293_v21  ;;  %v3307_v37 = vld [vmem:[%s4388_s3] sm:$0xff]   ;;  %v572_v40 = vpack.c.bf16 %v3699_v36, %v3699_v36  ;;  %v3309_v41 = vld [vmem:[%s4388_s3 + $0x8] sm:$0xff]   ;;  %v3311_v43 = vld [vmem:[%s4388_s3 + $0x10] sm:$0xff]   ;;  %v682_v6 = vstv %s681_s28  ;;  %vm563_vm1 = vcmp.eq.s32.totalorder %v562_v5, 1  ;;  %s923_s23 = sadd.s32 2, %s3601_s16  ;;  %s1041_s8 = sadd.s32 5, %s3605_s18 }
  0x41   : > { %2952 = vmatpush3.bf16.msra.mxu1 %v3294_v22  ;;  %2933 = vmatprep.subr.bf16.mxu0 %v3491_v19  ;;  %v3308_v39 = vld [vmem:[%s4388_s3 + $0x40] sm:$0xff]   ;;  %v3310_v42 = vld [vmem:[%s4388_s3 + $0x48] sm:$0xff]   ;;  %v3312_v44 = vld [vmem:[%s4388_s3 + $0x50] sm:$0xff]   ;;  %vm683_vm2 = vcmp.eq.s32.totalorder %v682_v6, 1  ;;  %s799_s25 = scalar_select %p3873_p2, 1, 0 }
  0x42   : > { %2953 = vmatprep.subr.bf16.mxu1 %v3491_v19  ;;  %v3313_v45 = vld [vmem:[%s4388_s3 + $0x18] sm:$0xff]   ;;  %v3315_v47 = vld [vmem:[%s4388_s3 + $0x20] sm:$0xff]   ;;  %v3317_v49 = vld [vmem:[%s4388_s3 + $0x28] sm:$0xff]   ;;  %s917_s20 = scalar_select %p916_p3, 1, 0 }
  0x43   : > { %v3314_v46 = vld [vmem:[%s4388_s3 + $0x58] sm:$0xff]   ;;  %v3316_v48 = vld [vmem:[%s4388_s3 + $0x60] sm:$0xff]   ;;  %v3318_v50 = vld [vmem:[%s4388_s3 + $0x68] sm:$0xff]   ;;  %p3971_p4 = scmp.lt.s32.totalorder %s923_s23, 12  ;;  %p1152_p5 = scmp.lt.s32.totalorder %s1041_s8, 12 }
  0x44   : > { %2934 = vmatpush3.bf16.msra.mxu0 %v3295_v23  ;;  %v3319_v51 = vld [vmem:[%s4388_s3 + $0x30] sm:$0xff]   ;;  %v3321_v53 = vld [vmem:[%s4388_s3 + $0x38] sm:$0xff]   ;;  %v3781_v56 = vld [vmem:[%s3622_s30 + $0x18] sm:$0xff]   ;;  %s1159_s15 = sadd.s32 3, %s3601_s16  ;;  %s1277_s29 = sadd.s32 4, %s3605_s18 }
  0x45   : > { %2954 = vmatpush3.bf16.msra.mxu1 %v3296_v24  ;;  %2935 = vmatprep.subr.bf16.mxu0 %v3491_v19  ;;  %v3320_v52 = vld [vmem:[%s4388_s3 + $0x70] sm:$0xff]   ;;  %v3322_v54 = vld [vmem:[%s4388_s3 + $0x78] sm:$0xff]   ;;  %v571_v58 = vunpack.c.h.bf16 %v3781_v56  ;;  %v3323_v10 = vld [vmem:[%s4388_s3] sm:$0xff]   ;;  %s1035_s12 = scalar_select %p3971_p4, 1, 0 }
  0x46   : > { %2955 = vmatprep.subr.bf16.mxu1 %v3491_v19  ;;  %v3778_v55 = vld [vmem:[%s3620_s13] sm:$0xff]   ;;  %v3324_v13 = vld [vmem:[%s4388_s3 + $0x40] sm:$0xff]   ;;  %v3325_v15 = vld [vmem:[%s4388_s3 + $0x8] sm:$0xff]   ;;  %s1153_s17 = scalar_select %p1152_p5, 1, 0 }
  0x47   : > { %v452_v57 = vunpack.c.l.bf16 %v3778_v55  ;;  %v3326_v16 = vld [vmem:[%s4388_s3 + $0x48] sm:$0xff]   ;;  %v3327_v17 = vld [vmem:[%s4388_s3 + $0x10] sm:$0xff]   ;;  %v3329_v20 = vld [vmem:[%s4388_s3 + $0x18] sm:$0xff]   ;;  %p4063_p6 = scmp.lt.s32.totalorder %s1159_s15, 12  ;;  %p1388_p7 = scmp.lt.s32.totalorder %s1277_s29, 12 }
  0x48   : > { %2936 = vmatpush3.bf16.msra.mxu0 %v3297_v25  ;;  %v3328_v18 = vld [vmem:[%s4388_s3 + $0x50] sm:$0xff]   ;;  %v3330_v21 = vld [vmem:[%s4388_s3 + $0x58] sm:$0xff]   ;;  %v3331_v22 = vld [vmem:[%s4388_s3 + $0x20] sm:$0xff]   ;;  %s1395_s26 = sadd.s32 4, %s3601_s16  ;;  %s1513_s14 = sadd.s32 3, %s3605_s18 }
  0x49   : > { %2956 = vmatpush3.bf16.msra.mxu1 %v3298_v26  ;;  %2937 = vmatprep.subr.bf16.mxu0 %v3491_v19  ;;  %v3332_v23 = vld [vmem:[%s4388_s3 + $0x60] sm:$0xff]   ;;  %v3333_v24 = vld [vmem:[%s4388_s3 + $0x28] sm:$0xff]   ;;  %v3335_v26 = vld [vmem:[%s4388_s3 + $0x30] sm:$0xff]   ;;  %s1271_s8 = scalar_select %p4063_p6, 1, 0 }
  0x4a   : > { %2957 = vmatprep.subr.bf16.mxu1 %v3491_v19  ;;  %v3334_v25 = vld [vmem:[%s4388_s3 + $0x68] sm:$0xff]   ;;  %s1389_s9 = scalar_select %p1388_p7, 1, 0 }
  0x4b   : > { %p4161_p8 = scmp.lt.s32.totalorder %s1395_s26, 12  ;;  %p1624_p9 = scmp.lt.s32.totalorder %s1513_s14, 12 }
  0x4c   : > { %2938 = vmatpush3.bf16.msra.mxu0 %v3299_v27  ;;  %v3336_v27 = vld [vmem:[%s4388_s3 + $0x70] sm:$0xff]   ;;  %s1631_s19 = sadd.s32 5, %s3601_s16  ;;  %s1749_s28 = sadd.s32 2, %s3605_s18 }
  0x4d   : > { %2958 = vmatpush3.bf16.msra.mxu1 %v3300_v28  ;;  %2939 = vmatprep.subr.bf16.mxu0 %v3491_v19  ;;  %v3337_v28 = vld [vmem:[%s4388_s3 + $0x38] sm:$0xff]   ;;  %s1507_s29 = scalar_select %p4161_p8, 1, 0 }
  0x4e   : > { %2959 = vmatprep.subr.bf16.mxu1 %v3491_v19  ;;  %s1625_s23 = scalar_select %p1624_p9, 1, 0 }
  0x4f   : > { %p4253_p10 = scmp.lt.s32.totalorder %s1631_s19, 12  ;;  %p1860_p11 = scmp.lt.s32.totalorder %s1749_s28, 12 }
  0x50   : > { %2940 = vmatpush3.bf16.msra.mxu0 %v3301_v29  ;;  %v3338_v29 = vld [vmem:[%s4388_s3 + $0x78] sm:$0xff]   ;;  %s2103_s28 = sadd.s32 7, %s3601_s16  ;;  %p2330_p1 = scmp.lt.s32.totalorder %s3605_s18, 12 }
  0x51   : > { %2960 = vmatpush3.bf16.msra.mxu1 %v3302_v30  ;;  %2941 = vmatprep.subr.bf16.mxu0 %v3491_v19  ;;  %v690_v30 = vunpack.c.h.bf16 %v3778_v55  ;;  %v3344_v55 = vld [vmem:[%s4388_s3 + $0x50] sm:$0xff]   ;;  %s1743_s14 = scalar_select %p4253_p10, 1, 0 }
  0x52   : > { %2961 = vmatprep.subr.bf16.mxu1 %v3491_v19  ;;  %s1861_s15 = scalar_select %p1860_p11, 1, 0 }
  0x53   : > { %p4354_p0 = scmp.lt.s32.totalorder %s2103_s28, 12 }
  0x54   : > { %2942 = vmatpush3.bf16.msra.mxu0 %v3303_v31  ;;  %v808_v31 = vunpack.c.l.bf16 %v3781_v56  ;;  %v3345_v56 = vld [vmem:[%s4388_s3 + $0x18] sm:$0xff]  }
  0x55   : > { %2962 = vmatpush3.bf16.msra.mxu1 %v3304_v32  ;;  %2943 = vmatprep.subr.bf16.mxu0 %v3491_v19 }
  0x56   : > { %2963 = vmatprep.subr.bf16.mxu1 %v3491_v19 }
  0x58   : > { %2944 = vmatpush3.bf16.msra.mxu0 %v3305_v33 }
  0x59   : > { %2964 = vmatpush3.bf16.msra.mxu1 %v3306_v35  ;;  %2969 = vmatprep.subr.bf16.mxu0 %v3491_v19 }
  0x5a   : > { %2989 = vmatprep.subr.bf16.mxu1 %v3491_v19 }
  0x5b   : > { %2946 = vmatmul.mubr.bf16.vlgmr.msra.gmra.mrb[0].mxu0 %v453_v38 }
  0x5c   : > { %2966 = vmatmul.mubr.bf16.vlgmr.msra.gmra.mrb[0].mxu1 %v572_v40  ;;  %2970 = vmatpush3.bf16.msra.mxu0 %v3307_v37 }
  0x5d   : > { %2990 = vmatpush3.bf16.msra.mxu1 %v3308_v39  ;;  %2971 = vmatprep.subr.bf16.mxu0 %v3491_v19 }
  0x5e   : > { %2991 = vmatprep.subr.bf16.mxu1 %v3491_v19  ;;  %2985 = vmatprep.mubr.msk.bf16.mxu0 %vm3492_vm0, %v3491_v19 }
  0x5f   : > { %3005 = vmatprep.mubr.msk.bf16.mxu1 %vm3492_vm0, %v3491_v19 }
  0x60   : > { %2972 = vmatpush3.bf16.msra.mxu0 %v3309_v41 }
  0x61   : > { %2992 = vmatpush3.bf16.msra.mxu1 %v3310_v42  ;;  %2973 = vmatprep.subr.bf16.mxu0 %v3491_v19  ;;  %v800_v42 = vstv %s799_s25  ;;  %s1867_s25 = sadd.s32 6, %s3601_s16 }
  0x62   : > { %2993 = vmatprep.subr.bf16.mxu1 %v3491_v19  ;;  %vm801_vm3 = vcmp.eq.s32.totalorder %v800_v42, 1  ;;  %p4343_p12 = scmp.lt.s32.totalorder %s1867_s25, 12 }
  0x63   : > { %s2215_s16 = scalar_select %p4354_p0, 1, 0 }
  0x64   : > { %2974 = vmatpush3.bf16.msra.mxu0 %v3311_v43  ;;  %v918_v43 = vstv %s917_s20  ;;  %s1985_s20 = sadd.s32 1, %s3605_s18 }
  0x65   : > { %2994 = vmatpush3.bf16.msra.mxu1 %v3312_v44  ;;  %2975 = vmatprep.subr.bf16.mxu0 %v3491_v19  ;;  %vm919_vm4 = vcmp.eq.s32.totalorder %v918_v43, 1  ;;  %p2096_p13 = scmp.lt.s32.totalorder %s1985_s20, 12 }
  0x66   : > { %2995 = vmatprep.subr.bf16.mxu1 %v3491_v19 }
  0x68   : > { %2976 = vmatpush3.bf16.msra.mxu0 %v3313_v45 }
  0x69   : > { %2996 = vmatpush3.bf16.msra.mxu1 %v3314_v46  ;;  %2977 = vmatprep.subr.bf16.mxu0 %v3491_v19 }
  0x6a   : > { %2997 = vmatprep.subr.bf16.mxu1 %v3491_v19 }
  0x6c   : > { %2978 = vmatpush3.bf16.msra.mxu0 %v3315_v47  ;;  %v3339_v47 = vld [vmem:[%s4388_s3] sm:$0xff]  }
  0x6d   : > { %2998 = vmatpush3.bf16.msra.mxu1 %v3316_v48  ;;  %2979 = vmatprep.subr.bf16.mxu0 %v3491_v19 }
  0x6e   : > { %2999 = vmatprep.subr.bf16.mxu1 %v3491_v19 }
  0x70   : > { %2980 = vmatpush3.bf16.msra.mxu0 %v3317_v49 }
  0x71   : > { %3000 = vmatpush3.bf16.msra.mxu1 %v3318_v50  ;;  %2981 = vmatprep.subr.bf16.mxu0 %v3491_v19  ;;  %v3340_v50 = vld [vmem:[%s4388_s3 + $0x40] sm:$0xff]  }
  0x72   : > { %3001 = vmatprep.subr.bf16.mxu1 %v3491_v19 }
  0x74   : > { %2982 = vmatpush3.bf16.msra.mxu0 %v3319_v51 }
  0x75   : > { %3002 = vmatpush3.bf16.msra.mxu1 %v3320_v52  ;;  %2983 = vmatprep.subr.bf16.mxu0 %v3491_v19  ;;  %v3341_v52 = vld [vmem:[%s4388_s3 + $0x8] sm:$0xff]  }
  0x76   : > { %3003 = vmatprep.subr.bf16.mxu1 %v3491_v19 }
  0x78   : > { %2984 = vmatpush3.bf16.msra.mxu0 %v3321_v53  ;;  %v3342_v53 = vld [vmem:[%s4388_s3 + $0x48] sm:$0xff]  }
  0x79   : > { %3004 = vmatpush3.bf16.msra.mxu1 %v3322_v54  ;;  %3009 = vmatprep.subr.bf16.mxu0 %v3491_v19  ;;  %v3343_v54 = vld [vmem:[%s4388_s3 + $0x10] sm:$0xff]  }
  0x7a   : > { %3029 = vmatprep.subr.bf16.mxu1 %v3491_v19 }
 0x12e   : > { %v552_v59 = vpop.f32.mrb[0].mxu0 }
 0x12f   : > { %v558_v60 = vadd.f32 %v552_v59, %v452_v57  ;;  %v672_v61 = vpop.f32.mrb[0].mxu1  ;;  %v2947_v62 = vpop.f32.mrb[1].mxu0  ;;  %v3346_v57 = vld [vmem:[%s4388_s3 + $0x58] sm:$0xff]   ;;  %v3348_v59 = vld [vmem:[%s4388_s3 + $0x60] sm:$0xff]  }
 0x130   : > { %v678_v63 = vadd.f32 %v672_v61, %v571_v58  ;;  %v2967_v0 = vpop.f32.mrb[1].mxu1  ;;  %v555_v1 = vpop.f32.mrb[2].mxu0  ;;  %v3347_v58 = vld [vmem:[%s4388_s3 + $0x20] sm:$0xff]   ;;  %v3350_v61 = vld [vmem:[%s4388_s3 + $0x68] sm:$0xff]   ;;  %v3351_v62 = vld [vmem:[%s4388_s3 + $0x30] sm:$0xff]  }
 0x131   : > { %3419 = vtanh.f32 %v558_v60  ;;  %v675_v2 = vpop.f32.mrb[2].mxu1  ;;  %v2948_v3 = vpop.f32.mrb[3].mxu0  ;;  %v3349_v60 = vld [vmem:[%s4388_s3 + $0x28] sm:$0xff]   ;;  %v3353_v0 = vld [vmem:[%s4388_s3 + $0x38] sm:$0xff]  }
 0x132   : > { %3421 = vtanh.f32 %v678_v63  ;;  %v2968_v4 = vpop.f32.mrb[3].mxu1  ;;  %v3352_v63 = vld [vmem:[%s4388_s3 + $0x70] sm:$0xff]   ;;  %v3354_v1 = vld [vmem:[%s4388_s3 + $0x78] sm:$0xff]   ;;  %v3965_v3 = vld [vmem:[%s3622_s30 + $0x10] sm:$0xff]  }
 0x133   : > { %v3962_v2 = vld [vmem:[%s3620_s13 + $0x8] sm:$0xff]   ;;  %v1044_v5 = vunpack.c.h.bf16 %v3965_v3  ;;  %v1280_v42 = vunpack.c.l.bf16 %v3965_v3 }
 0x134   : > { %v926_v4 = vunpack.c.l.bf16 %v3962_v2  ;;  %v3377_v3 = vld [vmem:[%s4388_s3 + $0x18] sm:$0xff]  }
 0x13b   : > { %v3420_v7 = vpop.eup %3419 }
 0x13c   : > { %v3422_v8 = vpop.eup %3421  ;;  %v3788_v9 = vsel %vm563_vm1, %v3420_v7, %v3694_v34 }
 0x13d   : > { %565 = vst [vmem:[%s3613_s21] sm:$0xff] %v3788_v9  ;;  %v691_v11 = vpack.c.bf16 %v3788_v9, %v3788_v9  ;;  %v3798_v12 = vsel %vm683_vm2, %v3422_v8, %v3699_v36 }
 0x13e   : > { %2528 = vst [vmem:[%s3618_s10 + $0x38] sm:$0xff] %v3798_v12  ;;  %v809_v14 = vpack.c.bf16 %v3798_v12, %v3798_v12 }
 0x13f   : > { %2986 = vmatmul.mubr.bf16.vlgmr.msra.gmra.mrb[4].mxu0 %v691_v11 }
 0x140   : > { %3006 = vmatmul.mubr.bf16.vlgmr.msra.gmra.mrb[4].mxu1 %v809_v14  ;;  %3010 = vmatpush3.bf16.msra.mxu0 %v3323_v10 }
 0x141   : > { %3030 = vmatpush3.bf16.msra.mxu1 %v3324_v13  ;;  %3011 = vmatprep.subr.bf16.mxu0 %v3491_v19 }
 0x142   : > { %3031 = vmatprep.subr.bf16.mxu1 %v3491_v19  ;;  %3025 = vmatprep.mubr.msk.bf16.mxu0 %vm3492_vm0, %v3491_v19 }
 0x143   : > { %3045 = vmatprep.mubr.msk.bf16.mxu1 %vm3492_vm0, %v3491_v19 }
 0x144   : > { %3012 = vmatpush3.bf16.msra.mxu0 %v3325_v15 }
 0x145   : > { %3032 = vmatpush3.bf16.msra.mxu1 %v3326_v16  ;;  %3013 = vmatprep.subr.bf16.mxu0 %v3491_v19  ;;  %v1036_v16 = vstv %s1035_s12 }
 0x146   : > { %3033 = vmatprep.subr.bf16.mxu1 %v3491_v19  ;;  %vm1037_vm5 = vcmp.eq.s32.totalorder %v1036_v16, 1 }
 0x148   : > { %3014 = vmatpush3.bf16.msra.mxu0 %v3327_v17  ;;  %v1154_v17 = vstv %s1153_s17 }
 0x149   : > { %3034 = vmatpush3.bf16.msra.mxu1 %v3328_v18  ;;  %3015 = vmatprep.subr.bf16.mxu0 %v3491_v19  ;;  %vm1155_vm6 = vcmp.eq.s32.totalorder %v1154_v17, 1 }
 0x14a   : > { %3035 = vmatprep.subr.bf16.mxu1 %v3491_v19 }
 0x14c   : > { %3016 = vmatpush3.bf16.msra.mxu0 %v3329_v20 }
 0x14d   : > { %3036 = vmatpush3.bf16.msra.mxu1 %v3330_v21  ;;  %3017 = vmatprep.subr.bf16.mxu0 %v3491_v19 }
 0x14e   : > { %3037 = vmatprep.subr.bf16.mxu1 %v3491_v19 }
 0x150   : > { %3018 = vmatpush3.bf16.msra.mxu0 %v3331_v22  ;;  %v3355_v22 = vld [vmem:[%s4388_s3] sm:$0xff]  }
 0x151   : > { %3038 = vmatpush3.bf16.msra.mxu1 %v3332_v23  ;;  %3019 = vmatprep.subr.bf16.mxu0 %v3491_v19 }
 0x152   : > { %3039 = vmatprep.subr.bf16.mxu1 %v3491_v19 }
 0x154   : > { %3020 = vmatpush3.bf16.msra.mxu0 %v3333_v24 }
 0x155   : > { %3040 = vmatpush3.bf16.msra.mxu1 %v3334_v25  ;;  %3021 = vmatprep.subr.bf16.mxu0 %v3491_v19  ;;  %v3356_v25 = vld [vmem:[%s4388_s3 + $0x40] sm:$0xff]  }
 0x156   : > { %3041 = vmatprep.subr.bf16.mxu1 %v3491_v19 }
 0x158   : > { %3022 = vmatpush3.bf16.msra.mxu0 %v3335_v26 }
 0x159   : > { %3042 = vmatpush3.bf16.msra.mxu1 %v3336_v27  ;;  %3023 = vmatprep.subr.bf16.mxu0 %v3491_v19  ;;  %v3357_v27 = vld [vmem:[%s4388_s3 + $0x8] sm:$0xff]  }
 0x15a   : > { %3043 = vmatprep.subr.bf16.mxu1 %v3491_v19 }
 0x15c   : > { %3024 = vmatpush3.bf16.msra.mxu0 %v3337_v28  ;;  %v3358_v28 = vld [vmem:[%s4388_s3 + $0x48] sm:$0xff]  }
 0x15d   : > { %3044 = vmatpush3.bf16.msra.mxu1 %v3338_v29  ;;  %3049 = vmatprep.subr.bf16.mxu0 %v3491_v19  ;;  %v3359_v29 = vld [vmem:[%s4388_s3 + $0x10] sm:$0xff]  }
 0x15e   : > { %3069 = vmatprep.subr.bf16.mxu1 %v3491_v19 }
 0x212   : > { %v790_v32 = vpop.f32.mrb[4].mxu0 }
 0x213   : > { %v796_v33 = vadd.f32 %v790_v32, %v690_v30  ;;  %v908_v34 = vpop.f32.mrb[4].mxu1  ;;  %v2987_v35 = vpop.f32.mrb[5].mxu0  ;;  %v3360_v30 = vld [vmem:[%s4388_s3 + $0x50] sm:$0xff]   ;;  %v3362_v32 = vld [vmem:[%s4388_s3 + $0x58] sm:$0xff]  }
 0x214   : > { %v914_v36 = vadd.f32 %v908_v34, %v808_v31  ;;  %v3007_v37 = vpop.f32.mrb[5].mxu1  ;;  %v793_v38 = vpop.f32.mrb[6].mxu0  ;;  %v3361_v31 = vld [vmem:[%s4388_s3 + $0x18] sm:$0xff]   ;;  %v3364_v34 = vld [vmem:[%s4388_s3 + $0x60] sm:$0xff]   ;;  %v3365_v35 = vld [vmem:[%s4388_s3 + $0x28] sm:$0xff]  }
 0x215   : > { %3423 = vtanh.f32 %v796_v33  ;;  %v911_v39 = vpop.f32.mrb[6].mxu1  ;;  %v2988_v40 = vpop.f32.mrb[7].mxu0  ;;  %v3363_v33 = vld [vmem:[%s4388_s3 + $0x20] sm:$0xff]   ;;  %v3367_v37 = vld [vmem:[%s4388_s3 + $0x30] sm:$0xff]  }
 0x216   : > { %3425 = vtanh.f32 %v914_v36  ;;  %v3008_v41 = vpop.f32.mrb[7].mxu1  ;;  %v3366_v36 = vld [vmem:[%s4388_s3 + $0x68] sm:$0xff]   ;;  %v3368_v38 = vld [vmem:[%s4388_s3 + $0x70] sm:$0xff]   ;;  %v3369_v39 = vld [vmem:[%s4388_s3 + $0x38] sm:$0xff]  }
 0x217   : > { %v3370_v40 = vld [vmem:[%s4388_s3 + $0x78] sm:$0xff]   ;;  %v1162_v41 = vunpack.c.h.bf16 %v3962_v2  ;;  %v3376_v2 = vld [vmem:[%s4388_s3 + $0x50] sm:$0xff]  }
 0x21f   : > { %v3424_v44 = vpop.eup %3423 }
 0x220   : > { %v3426_v45 = vpop.eup %3425  ;;  %v3880_v46 = vsel %vm801_vm3, %v3424_v44, %v3788_v9 }
 0x221   : > { %2538 = vst [vmem:[%s3613_s21 + $0x8] sm:$0xff] %v3880_v46  ;;  %v927_v48 = vpack.c.bf16 %v3880_v46, %v3880_v46  ;;  %v3890_v49 = vsel %vm919_vm4, %v3426_v45, %v3798_v12 }
 0x222   : > { %2564 = vst [vmem:[%s3618_s10 + $0x30] sm:$0xff] %v3890_v49  ;;  %v1045_v51 = vpack.c.bf16 %v3890_v49, %v3890_v49 }
 0x223   : > { %3026 = vmatmul.mubr.bf16.vlgmr.msra.gmra.mrb[8].mxu0 %v927_v48 }
 0x224   : > { %3046 = vmatmul.mubr.bf16.vlgmr.msra.gmra.mrb[8].mxu1 %v1045_v51  ;;  %3050 = vmatpush3.bf16.msra.mxu0 %v3339_v47 }
 0x225   : > { %3070 = vmatpush3.bf16.msra.mxu1 %v3340_v50  ;;  %3051 = vmatprep.subr.bf16.mxu0 %v3491_v19 }
 0x226   : > { %3071 = vmatprep.subr.bf16.mxu1 %v3491_v19  ;;  %3065 = vmatprep.mubr.msk.bf16.mxu0 %vm3492_vm0, %v3491_v19 }
 0x227   : > { %3085 = vmatprep.mubr.msk.bf16.mxu1 %vm3492_vm0, %v3491_v19 }
 0x228   : > { %3052 = vmatpush3.bf16.msra.mxu0 %v3341_v52 }
 0x229   : > { %3072 = vmatpush3.bf16.msra.mxu1 %v3342_v53  ;;  %3053 = vmatprep.subr.bf16.mxu0 %v3491_v19  ;;  %v1272_v53 = vstv %s1271_s8 }
 0x22a   : > { %3073 = vmatprep.subr.bf16.mxu1 %v3491_v19  ;;  %vm1273_vm7 = vcmp.eq.s32.totalorder %v1272_v53, 1 }
 0x22c   : > { %3054 = vmatpush3.bf16.msra.mxu0 %v3343_v54  ;;  %v1390_v54 = vstv %s1389_s9 }
 0x22d   : > { %3074 = vmatpush3.bf16.msra.mxu1 %v3344_v55  ;;  %3055 = vmatprep.subr.bf16.mxu0 %v3491_v19  ;;  %vm1391_vm8 = vcmp.eq.s32.totalorder %v1390_v54, 1 }
 0x22e   : > { %3075 = vmatprep.subr.bf16.mxu1 %v3491_v19 }
 0x230   : > { %3056 = vmatpush3.bf16.msra.mxu0 %v3345_v56 }
 0x231   : > { %3076 = vmatpush3.bf16.msra.mxu1 %v3346_v57  ;;  %3057 = vmatprep.subr.bf16.mxu0 %v3491_v19 }
 0x232   : > { %3077 = vmatprep.subr.bf16.mxu1 %v3491_v19 }
 0x234   : > { %3058 = vmatpush3.bf16.msra.mxu0 %v3347_v58  ;;  %v3371_v58 = vld [vmem:[%s4388_s3] sm:$0xff]  }
 0x235   : > { %3078 = vmatpush3.bf16.msra.mxu1 %v3348_v59  ;;  %3059 = vmatprep.subr.bf16.mxu0 %v3491_v19 }
 0x236   : > { %3079 = vmatprep.subr.bf16.mxu1 %v3491_v19 }
 0x238   : > { %3060 = vmatpush3.bf16.msra.mxu0 %v3349_v60 }
 0x239   : > { %3080 = vmatpush3.bf16.msra.mxu1 %v3350_v61  ;;  %3061 = vmatprep.subr.bf16.mxu0 %v3491_v19  ;;  %v3372_v61 = vld [vmem:[%s4388_s3 + $0x40] sm:$0xff]  }
 0x23a   : > { %3081 = vmatprep.subr.bf16.mxu1 %v3491_v19 }
 0x23c   : > { %3062 = vmatpush3.bf16.msra.mxu0 %v3351_v62 }
 0x23d   : > { %3082 = vmatpush3.bf16.msra.mxu1 %v3352_v63  ;;  %3063 = vmatprep.subr.bf16.mxu0 %v3491_v19  ;;  %v3373_v63 = vld [vmem:[%s4388_s3 + $0x8] sm:$0xff]  }
 0x23e   : > { %3083 = vmatprep.subr.bf16.mxu1 %v3491_v19 }
 0x240   : > { %3064 = vmatpush3.bf16.msra.mxu0 %v3353_v0  ;;  %v3374_v0 = vld [vmem:[%s4388_s3 + $0x48] sm:$0xff]  }
 0x241   : > { %3084 = vmatpush3.bf16.msra.mxu1 %v3354_v1  ;;  %3089 = vmatprep.subr.bf16.mxu0 %v3491_v19  ;;  %v3375_v1 = vld [vmem:[%s4388_s3 + $0x10] sm:$0xff]  }
 0x242   : > { %3109 = vmatprep.subr.bf16.mxu1 %v3491_v19 }
 0x2f6   : > { %v1026_v6 = vpop.f32.mrb[8].mxu0 }
 0x2f7   : > { %v1032_v7 = vadd.f32 %v1026_v6, %v926_v4  ;;  %v1144_v8 = vpop.f32.mrb[8].mxu1  ;;  %v3027_v9 = vpop.f32.mrb[9].mxu0  ;;  %v3378_v4 = vld [vmem:[%s4388_s3 + $0x58] sm:$0xff]   ;;  %v3380_v6 = vld [vmem:[%s4388_s3 + $0x60] sm:$0xff]  }
 0x2f8   : > { %v1150_v10 = vadd.f32 %v1144_v8, %v1044_v5  ;;  %v3047_v11 = vpop.f32.mrb[9].mxu1  ;;  %v1029_v12 = vpop.f32.mrb[10].mxu0  ;;  %v3379_v5 = vld [vmem:[%s4388_s3 + $0x20] sm:$0xff]   ;;  %v3382_v8 = vld [vmem:[%s4388_s3 + $0x68] sm:$0xff]   ;;  %v3383_v9 = vld [vmem:[%s4388_s3 + $0x30] sm:$0xff]  }
 0x2f9   : > { %3427 = vtanh.f32 %v1032_v7  ;;  %v1147_v13 = vpop.f32.mrb[10].mxu1  ;;  %v3028_v14 = vpop.f32.mrb[11].mxu0  ;;  %v3381_v7 = vld [vmem:[%s4388_s3 + $0x28] sm:$0xff]   ;;  %v3385_v11 = vld [vmem:[%s4388_s3 + $0x38] sm:$0xff]  }
 0x2fa   : > { %3429 = vtanh.f32 %v1150_v10  ;;  %v3048_v15 = vpop.f32.mrb[11].mxu1  ;;  %v3384_v10 = vld [vmem:[%s4388_s3 + $0x70] sm:$0xff]   ;;  %v3386_v12 = vld [vmem:[%s4388_s3 + $0x78] sm:$0xff]   ;;  %v4152_v13 = vld [vmem:[%s3620_s13 + $0x10] sm:$0xff]  }
 0x2fb   : > { %v4155_v14 = vld [vmem:[%s3622_s30 + $0x8] sm:$0xff]   ;;  %v1398_v15 = vunpack.c.l.bf16 %v4152_v13 }
 0x2fc   : > { %v1516_v16 = vunpack.c.h.bf16 %v4155_v14  ;;  %v1752_v53 = vunpack.c.l.bf16 %v4155_v14  ;;  %v3409_v14 = vld [vmem:[%s4388_s3 + $0x18] sm:$0xff]  }
 0x303   : > { %v3428_v18 = vpop.eup %3427 }
 0x304   : > { %v3430_v20 = vpop.eup %3429  ;;  %v3978_v21 = vsel %vm1037_vm5, %v3428_v18, %v3880_v46 }
 0x305   : > { %2574 = vst [vmem:[%s3613_s21 + $0x10] sm:$0xff] %v3978_v21  ;;  %v1163_v23 = vpack.c.bf16 %v3978_v21, %v3978_v21  ;;  %v3988_v24 = vsel %vm1155_vm6, %v3430_v20, %v3890_v49 }
 0x306   : > { %2600 = vst [vmem:[%s3618_s10 + $0x28] sm:$0xff] %v3988_v24  ;;  %v1281_v26 = vpack.c.bf16 %v3988_v24, %v3988_v24 }
 0x307   : > { %3066 = vmatmul.mubr.bf16.vlgmr.msra.gmra.mrb[12].mxu0 %v1163_v23 }
 0x308   : > { %3086 = vmatmul.mubr.bf16.vlgmr.msra.gmra.mrb[12].mxu1 %v1281_v26  ;;  %3090 = vmatpush3.bf16.msra.mxu0 %v3355_v22 }
 0x309   : > { %3110 = vmatpush3.bf16.msra.mxu1 %v3356_v25  ;;  %3091 = vmatprep.subr.bf16.mxu0 %v3491_v19 }
 0x30a   : > { %3111 = vmatprep.subr.bf16.mxu1 %v3491_v19  ;;  %3105 = vmatprep.mubr.msk.bf16.mxu0 %vm3492_vm0, %v3491_v19 }
 0x30b   : > { %3125 = vmatprep.mubr.msk.bf16.mxu1 %vm3492_vm0, %v3491_v19 }
 0x30c   : > { %3092 = vmatpush3.bf16.msra.mxu0 %v3357_v27 }
 0x30d   : > { %3112 = vmatpush3.bf16.msra.mxu1 %v3358_v28  ;;  %3093 = vmatprep.subr.bf16.mxu0 %v3491_v19  ;;  %v1508_v28 = vstv %s1507_s29 }
 0x30e   : > { %3113 = vmatprep.subr.bf16.mxu1 %v3491_v19  ;;  %vm1509_vm9 = vcmp.eq.s32.totalorder %v1508_v28, 1 }
 0x310   : > { %3094 = vmatpush3.bf16.msra.mxu0 %v3359_v29  ;;  %v1626_v29 = vstv %s1625_s23 }
 0x311   : > { %3114 = vmatpush3.bf16.msra.mxu1 %v3360_v30  ;;  %3095 = vmatprep.subr.bf16.mxu0 %v3491_v19  ;;  %vm1627_vm10 = vcmp.eq.s32.totalorder %v1626_v29, 1 }
 0x312   : > { %3115 = vmatprep.subr.bf16.mxu1 %v3491_v19 }
 0x314   : > { %3096 = vmatpush3.bf16.msra.mxu0 %v3361_v31 }
 0x315   : > { %3116 = vmatpush3.bf16.msra.mxu1 %v3362_v32  ;;  %3097 = vmatprep.subr.bf16.mxu0 %v3491_v19 }
 0x316   : > { %3117 = vmatprep.subr.bf16.mxu1 %v3491_v19 }
 0x318   : > { %3098 = vmatpush3.bf16.msra.mxu0 %v3363_v33  ;;  %v3387_v33 = vld [vmem:[%s4388_s3] sm:$0xff]  }
 0x319   : > { %3118 = vmatpush3.bf16.msra.mxu1 %v3364_v34  ;;  %3099 = vmatprep.subr.bf16.mxu0 %v3491_v19 }
 0x31a   : > { %3119 = vmatprep.subr.bf16.mxu1 %v3491_v19 }
 0x31c   : > { %3100 = vmatpush3.bf16.msra.mxu0 %v3365_v35 }
 0x31d   : > { %3120 = vmatpush3.bf16.msra.mxu1 %v3366_v36  ;;  %3101 = vmatprep.subr.bf16.mxu0 %v3491_v19  ;;  %v3388_v36 = vld [vmem:[%s4388_s3 + $0x40] sm:$0xff]  }
 0x31e   : > { %3121 = vmatprep.subr.bf16.mxu1 %v3491_v19 }
 0x320   : > { %3102 = vmatpush3.bf16.msra.mxu0 %v3367_v37 }
 0x321   : > { %3122 = vmatpush3.bf16.msra.mxu1 %v3368_v38  ;;  %3103 = vmatprep.subr.bf16.mxu0 %v3491_v19  ;;  %v3389_v38 = vld [vmem:[%s4388_s3 + $0x8] sm:$0xff]  }
 0x322   : > { %3123 = vmatprep.subr.bf16.mxu1 %v3491_v19 }
 0x324   : > { %3104 = vmatpush3.bf16.msra.mxu0 %v3369_v39  ;;  %v3390_v39 = vld [vmem:[%s4388_s3 + $0x48] sm:$0xff]  }
 0x325   : > { %3124 = vmatpush3.bf16.msra.mxu1 %v3370_v40  ;;  %3129 = vmatprep.subr.bf16.mxu0 %v3491_v19  ;;  %v3391_v40 = vld [vmem:[%s4388_s3 + $0x10] sm:$0xff]  }
 0x326   : > { %3149 = vmatprep.subr.bf16.mxu1 %v3491_v19 }
 0x3da   : > { %v1262_v43 = vpop.f32.mrb[12].mxu0 }
 0x3db   : > { %v1268_v44 = vadd.f32 %v1262_v43, %v1162_v41  ;;  %v1380_v45 = vpop.f32.mrb[12].mxu1  ;;  %v3067_v46 = vpop.f32.mrb[13].mxu0  ;;  %v3392_v41 = vld [vmem:[%s4388_s3 + $0x50] sm:$0xff]   ;;  %v3394_v43 = vld [vmem:[%s4388_s3 + $0x58] sm:$0xff]  }
 0x3dc   : > { %v1386_v47 = vadd.f32 %v1380_v45, %v1280_v42  ;;  %v3087_v48 = vpop.f32.mrb[13].mxu1  ;;  %v1265_v49 = vpop.f32.mrb[14].mxu0  ;;  %v3393_v42 = vld [vmem:[%s4388_s3 + $0x18] sm:$0xff]   ;;  %v3396_v45 = vld [vmem:[%s4388_s3 + $0x60] sm:$0xff]   ;;  %v3397_v46 = vld [vmem:[%s4388_s3 + $0x28] sm:$0xff]  }
 0x3dd   : > { %3431 = vtanh.f32 %v1268_v44  ;;  %v1383_v50 = vpop.f32.mrb[14].mxu1  ;;  %v3068_v51 = vpop.f32.mrb[15].mxu0  ;;  %v3395_v44 = vld [vmem:[%s4388_s3 + $0x20] sm:$0xff]   ;;  %v3399_v48 = vld [vmem:[%s4388_s3 + $0x30] sm:$0xff]  }
 0x3de   : > { %3433 = vtanh.f32 %v1386_v47  ;;  %v3088_v52 = vpop.f32.mrb[15].mxu1  ;;  %v3398_v47 = vld [vmem:[%s4388_s3 + $0x68] sm:$0xff]   ;;  %v3400_v49 = vld [vmem:[%s4388_s3 + $0x70] sm:$0xff]   ;;  %v3401_v50 = vld [vmem:[%s4388_s3 + $0x38] sm:$0xff]  }
 0x3df   : > { %v3402_v51 = vld [vmem:[%s4388_s3 + $0x78] sm:$0xff]   ;;  %v1634_v52 = vunpack.c.h.bf16 %v4152_v13  ;;  %v3408_v13 = vld [vmem:[%s4388_s3 + $0x50] sm:$0xff]  }
 0x3e7   : > { %v3432_v55 = vpop.eup %3431 }
 0x3e8   : > { %v3434_v56 = vpop.eup %3433  ;;  %v4070_v57 = vsel %vm1273_vm7, %v3432_v55, %v3978_v21 }
 0x3e9   : > { %2610 = vst [vmem:[%s3613_s21 + $0x18] sm:$0xff] %v4070_v57  ;;  %v1399_v59 = vpack.c.bf16 %v4070_v57, %v4070_v57  ;;  %v4080_v60 = vsel %vm1391_vm8, %v3434_v56, %v3988_v24 }
 0x3ea   : > { %2636 = vst [vmem:[%s3618_s10 + $0x20] sm:$0xff] %v4080_v60  ;;  %v1517_v62 = vpack.c.bf16 %v4080_v60, %v4080_v60 }
 0x3eb   : > { %3106 = vmatmul.mubr.bf16.vlgmr.msra.gmra.mrb[16].mxu0 %v1399_v59 }
 0x3ec   : > { %3126 = vmatmul.mubr.bf16.vlgmr.msra.gmra.mrb[16].mxu1 %v1517_v62  ;;  %3130 = vmatpush3.bf16.msra.mxu0 %v3371_v58 }
 0x3ed   : > { %3150 = vmatpush3.bf16.msra.mxu1 %v3372_v61  ;;  %3131 = vmatprep.subr.bf16.mxu0 %v3491_v19 }
 0x3ee   : > { %3151 = vmatprep.subr.bf16.mxu1 %v3491_v19  ;;  %3145 = vmatprep.mubr.msk.bf16.mxu0 %vm3492_vm0, %v3491_v19 }
 0x3ef   : > { %3165 = vmatprep.mubr.msk.bf16.mxu1 %vm3492_vm0, %v3491_v19 }
 0x3f0   : > { %3132 = vmatpush3.bf16.msra.mxu0 %v3373_v63 }
 0x3f1   : > { %3152 = vmatpush3.bf16.msra.mxu1 %v3374_v0  ;;  %3133 = vmatprep.subr.bf16.mxu0 %v3491_v19  ;;  %v1744_v0 = vstv %s1743_s14  ;;  %s2331_s14 = scalar_select %p2330_p1, 1, 0 }
 0x3f2   : > { %3153 = vmatprep.subr.bf16.mxu1 %v3491_v19  ;;  %vm1745_vm11 = vcmp.eq.s32.totalorder %v1744_v0, 1 }
 0x3f4   : > { %3134 = vmatpush3.bf16.msra.mxu0 %v3375_v1  ;;  %v1862_v1 = vstv %s1861_s15 }
 0x3f5   : > { %3154 = vmatpush3.bf16.msra.mxu1 %v3376_v2  ;;  %3135 = vmatprep.subr.bf16.mxu0 %v3491_v19  ;;  %vm1863_vm12 = vcmp.eq.s32.totalorder %v1862_v1, 1 }
 0x3f6   : > { %3155 = vmatprep.subr.bf16.mxu1 %v3491_v19 }
 0x3f8   : > { %3136 = vmatpush3.bf16.msra.mxu0 %v3377_v3 }
 0x3f9   : > { %3156 = vmatpush3.bf16.msra.mxu1 %v3378_v4  ;;  %3137 = vmatprep.subr.bf16.mxu0 %v3491_v19 }
 0x3fa   : > { %3157 = vmatprep.subr.bf16.mxu1 %v3491_v19 }
 0x3fc   : > { %3138 = vmatpush3.bf16.msra.mxu0 %v3379_v5  ;;  %v3403_v5 = vld [vmem:[%s4388_s3] sm:$0xff]  }
 0x3fd   : > { %3158 = vmatpush3.bf16.msra.mxu1 %v3380_v6  ;;  %3139 = vmatprep.subr.bf16.mxu0 %v3491_v19 }
 0x3fe   : > { %3159 = vmatprep.subr.bf16.mxu1 %v3491_v19 }
 0x400   : > { %3140 = vmatpush3.bf16.msra.mxu0 %v3381_v7 }
 0x401   : > { %3160 = vmatpush3.bf16.msra.mxu1 %v3382_v8  ;;  %3141 = vmatprep.subr.bf16.mxu0 %v3491_v19  ;;  %v3404_v8 = vld [vmem:[%s4388_s3 + $0x40] sm:$0xff]  }
 0x402   : > { %3161 = vmatprep.subr.bf16.mxu1 %v3491_v19 }
 0x404   : > { %3142 = vmatpush3.bf16.msra.mxu0 %v3383_v9 }
 0x405   : > { %3162 = vmatpush3.bf16.msra.mxu1 %v3384_v10  ;;  %3143 = vmatprep.subr.bf16.mxu0 %v3491_v19  ;;  %v3405_v10 = vld [vmem:[%s4388_s3 + $0x8] sm:$0xff]  }
 0x406   : > { %3163 = vmatprep.subr.bf16.mxu1 %v3491_v19 }
 0x408   : > { %3144 = vmatpush3.bf16.msra.mxu0 %v3385_v11  ;;  %v3406_v11 = vld [vmem:[%s4388_s3 + $0x48] sm:$0xff]  }
 0x409   : > { %3164 = vmatpush3.bf16.msra.mxu1 %v3386_v12  ;;  %3169 = vmatprep.subr.bf16.mxu0 %v3491_v19  ;;  %v3407_v12 = vld [vmem:[%s4388_s3 + $0x10] sm:$0xff]  }
 0x40a   : > { %3189 = vmatprep.subr.bf16.mxu1 %v3491_v19 }
 0x4be   : > { %v1498_v17 = vpop.f32.mrb[16].mxu0 }
 0x4bf   : > { %v1504_v18 = vadd.f32 %v1498_v17, %v1398_v15  ;;  %v1616_v20 = vpop.f32.mrb[16].mxu1  ;;  %v3107_v21 = vpop.f32.mrb[17].mxu0  ;;  %v3410_v15 = vld [vmem:[%s4388_s3 + $0x58] sm:$0xff]   ;;  %v3412_v17 = vld [vmem:[%s4388_s3 + $0x60] sm:$0xff]  }
 0x4c0   : > { %v1622_v22 = vadd.f32 %v1616_v20, %v1516_v16  ;;  %v3127_v23 = vpop.f32.mrb[17].mxu1  ;;  %v1501_v24 = vpop.f32.mrb[18].mxu0  ;;  %v3411_v16 = vld [vmem:[%s4388_s3 + $0x20] sm:$0xff]   ;;  %v3414_v20 = vld [vmem:[%s4388_s3 + $0x68] sm:$0xff]   ;;  %v3415_v21 = vld [vmem:[%s4388_s3 + $0x30] sm:$0xff]  }
 0x4c1   : > { %3435 = vtanh.f32 %v1504_v18  ;;  %v1619_v25 = vpop.f32.mrb[18].mxu1  ;;  %v3108_v26 = vpop.f32.mrb[19].mxu0  ;;  %v3413_v18 = vld [vmem:[%s4388_s3 + $0x28] sm:$0xff]   ;;  %v3417_v23 = vld [vmem:[%s4388_s3 + $0x38] sm:$0xff]  }
 0x4c2   : > { %3437 = vtanh.f32 %v1622_v22  ;;  %v3128_v27 = vpop.f32.mrb[19].mxu1  ;;  %v3416_v22 = vld [vmem:[%s4388_s3 + $0x70] sm:$0xff]   ;;  %v3418_v24 = vld [vmem:[%s4388_s3 + $0x78] sm:$0xff]   ;;  %v2709_v25 = vld [vmem:[%s3620_s13 + $0x18] sm:$0xff]   ;;  %s1979_s13 = scalar_select %p4343_p12, 1, 0 }
 0x4c3   : > { %v2719_v26 = vld [vmem:[%s3622_s30] sm:$0xff]   ;;  %v1870_v27 = vunpack.c.l.bf16 %v2709_v25  ;;  %s2097_s30 = scalar_select %p2096_p13, 1, 0 }
 0x4c4   : > { %v1988_v28 = vunpack.c.h.bf16 %v2719_v26 }
 0x4cb   : > { %v3436_v30 = vpop.eup %3435 }
 0x4cc   : > { %v3438_v31 = vpop.eup %3437  ;;  %v4168_v32 = vsel %vm1509_vm9, %v3436_v30, %v4070_v57 }
 0x4cd   : > { %2646 = vst [vmem:[%s3613_s21 + $0x20] sm:$0xff] %v4168_v32  ;;  %v1635_v34 = vpack.c.bf16 %v4168_v32, %v4168_v32  ;;  %v4178_v35 = vsel %vm1627_vm10, %v3438_v31, %v4080_v60 }
 0x4ce   : > { %2672 = vst [vmem:[%s3618_s10 + $0x18] sm:$0xff] %v4178_v35  ;;  %v1753_v37 = vpack.c.bf16 %v4178_v35, %v4178_v35 }
 0x4cf   : > { %3146 = vmatmul.mubr.bf16.vlgmr.msra.gmra.mrb[20].mxu0 %v1635_v34 }
 0x4d0   : > { %3166 = vmatmul.mubr.bf16.vlgmr.msra.gmra.mrb[20].mxu1 %v1753_v37  ;;  %3170 = vmatpush3.bf16.msra.mxu0 %v3387_v33 }
 0x4d1   : > { %3190 = vmatpush3.bf16.msra.mxu1 %v3388_v36  ;;  %3171 = vmatprep.subr.bf16.mxu0 %v3491_v19 }
 0x4d2   : > { %3191 = vmatprep.subr.bf16.mxu1 %v3491_v19  ;;  %3185 = vmatprep.mubr.msk.bf16.mxu0 %vm3492_vm0, %v3491_v19 }
 0x4d3   : > { %3205 = vmatprep.mubr.msk.bf16.mxu1 %vm3492_vm0, %v3491_v19 }
 0x4d4   : > { %3172 = vmatpush3.bf16.msra.mxu0 %v3389_v38  ;;  %v1980_v38 = vstv %s1979_s13 }
 0x4d5   : > { %3192 = vmatpush3.bf16.msra.mxu1 %v3390_v39  ;;  %3173 = vmatprep.subr.bf16.mxu0 %v3491_v19  ;;  %v2098_v39 = vstv %s2097_s30  ;;  %vm1981_vm13 = vcmp.eq.s32.totalorder %v1980_v38, 1 }
 0x4d6   : > { %3193 = vmatprep.subr.bf16.mxu1 %v3491_v19  ;;  %vm2099_vm14 = vcmp.eq.s32.totalorder %v2098_v39, 1 }
 0x4d8   : > { %3174 = vmatpush3.bf16.msra.mxu0 %v3391_v40 }
 0x4d9   : > { %3194 = vmatpush3.bf16.msra.mxu1 %v3392_v41  ;;  %3175 = vmatprep.subr.bf16.mxu0 %v3491_v19 }
 0x4da   : > { %3195 = vmatprep.subr.bf16.mxu1 %v3491_v19 }
 0x4dc   : > { %3176 = vmatpush3.bf16.msra.mxu0 %v3393_v42 }
 0x4dd   : > { %3196 = vmatpush3.bf16.msra.mxu1 %v3394_v43  ;;  %3177 = vmatprep.subr.bf16.mxu0 %v3491_v19 }
 0x4de   : > { %3197 = vmatprep.subr.bf16.mxu1 %v3491_v19 }
 0x4e0   : > { %3178 = vmatpush3.bf16.msra.mxu0 %v3395_v44 }
 0x4e1   : > { %3198 = vmatpush3.bf16.msra.mxu1 %v3396_v45  ;;  %3179 = vmatprep.subr.bf16.mxu0 %v3491_v19 }
 0x4e2   : > { %3199 = vmatprep.subr.bf16.mxu1 %v3491_v19 }
 0x4e4   : > { %3180 = vmatpush3.bf16.msra.mxu0 %v3397_v46  ;;  %v2106_v46 = vunpack.c.h.bf16 %v2709_v25 }
 0x4e5   : > { %3200 = vmatpush3.bf16.msra.mxu1 %v3398_v47  ;;  %3181 = vmatprep.subr.bf16.mxu0 %v3491_v19  ;;  %v2222_v47 = vunpack.c.l.bf16 %v2719_v26 }
 0x4e6   : > { %3201 = vmatprep.subr.bf16.mxu1 %v3491_v19 }
 0x4e8   : > { %3182 = vmatpush3.bf16.msra.mxu0 %v3399_v48 }
 0x4e9   : > { %3202 = vmatpush3.bf16.msra.mxu1 %v3400_v49  ;;  %3183 = vmatprep.subr.bf16.mxu0 %v3491_v19 }
 0x4ea   : > { %3203 = vmatprep.subr.bf16.mxu1 %v3491_v19 }
 0x4ec   : > { %3184 = vmatpush3.bf16.msra.mxu0 %v3401_v50 }
 0x4ed   : > { %3204 = vmatpush3.bf16.msra.mxu1 %v3402_v51  ;;  %3209 = vmatprep.subr.bf16.mxu0 %v3491_v19 }
 0x4ee   : > { %3229 = vmatprep.subr.bf16.mxu1 %v3491_v19 }
 0x5a2   : > { %v1734_v54 = vpop.f32.mrb[20].mxu0 }
 0x5a3   : > { %v1740_v55 = vadd.f32 %v1734_v54, %v1634_v52  ;;  %v1852_v56 = vpop.f32.mrb[20].mxu1  ;;  %v3147_v57 = vpop.f32.mrb[21].mxu0 }
 0x5a4   : > { %v1858_v58 = vadd.f32 %v1852_v56, %v1752_v53  ;;  %v3167_v59 = vpop.f32.mrb[21].mxu1  ;;  %v1737_v60 = vpop.f32.mrb[22].mxu0 }
 0x5a5   : > { %3439 = vtanh.f32 %v1740_v55  ;;  %v1855_v61 = vpop.f32.mrb[22].mxu1  ;;  %v3148_v62 = vpop.f32.mrb[23].mxu0  ;;  %v2332_v59 = vstv %s2331_s14 }
 0x5a6   : > { %3441 = vtanh.f32 %v1858_v58  ;;  %v3168_v63 = vpop.f32.mrb[23].mxu1  ;;  %v2216_v58 = vstv %s2215_s16 }
 0x5a7   : > { %vm2217_vm15 = vcmp.eq.s32.totalorder %v2216_v58, 1 }
 0x5af   : > { %v3440_v2 = vpop.eup %3439 }
 0x5b0   : > { %v3442_v3 = vpop.eup %3441  ;;  %v4260_v4 = vsel %vm1745_vm11, %v3440_v2, %v4168_v32 }
 0x5b1   : > { %2682 = vst [vmem:[%s3613_s21 + $0x28] sm:$0xff] %v4260_v4  ;;  %v1871_v6 = vpack.c.bf16 %v4260_v4, %v4260_v4  ;;  %v4270_v7 = vsel %vm1863_vm12, %v3442_v3, %v4178_v35 }
 0x5b2   : > { %2708 = vst [vmem:[%s3618_s10 + $0x10] sm:$0xff] %v4270_v7  ;;  %v1989_v9 = vpack.c.bf16 %v4270_v7, %v4270_v7 }
 0x5b3   : > { %3186 = vmatmul.mubr.bf16.vlgmr.msra.gmra.mrb[24].mxu0 %v1871_v6 }
 0x5b4   : > { %3206 = vmatmul.mubr.bf16.vlgmr.msra.gmra.mrb[24].mxu1 %v1989_v9  ;;  %3210 = vmatpush3.bf16.msra.mxu0 %v3403_v5 }
 0x5b5   : > { %3230 = vmatpush3.bf16.msra.mxu1 %v3404_v8  ;;  %3211 = vmatprep.subr.bf16.mxu0 %v3491_v19 }
 0x5b6   : > { %3231 = vmatprep.subr.bf16.mxu1 %v3491_v19  ;;  %3225 = vmatprep.mubr.msk.bf16.mxu0 %vm3492_vm0, %v3491_v19 }
 0x5b7   : > { %3245 = vmatprep.mubr.msk.bf16.mxu1 %vm3492_vm0, %v3491_v19  ;;  %vm2333_vm0 = vcmp.eq.s32.totalorder %v2332_v59, 1 }
 0x5b8   : > { %3212 = vmatpush3.bf16.msra.mxu0 %v3405_v10 }
 0x5b9   : > { %3232 = vmatpush3.bf16.msra.mxu1 %v3406_v11  ;;  %3213 = vmatprep.subr.bf16.mxu0 %v3491_v19 }
 0x5ba   : > { %3233 = vmatprep.subr.bf16.mxu1 %v3491_v19 }
 0x5bc   : > { %3214 = vmatpush3.bf16.msra.mxu0 %v3407_v12 }
 0x5bd   : > { %3234 = vmatpush3.bf16.msra.mxu1 %v3408_v13  ;;  %3215 = vmatprep.subr.bf16.mxu0 %v3491_v19 }
 0x5be   : > { %3235 = vmatprep.subr.bf16.mxu1 %v3491_v19 }
 0x5c0   : > { %3216 = vmatpush3.bf16.msra.mxu0 %v3409_v14 }
 0x5c1   : > { %3236 = vmatpush3.bf16.msra.mxu1 %v3410_v15  ;;  %3217 = vmatprep.subr.bf16.mxu0 %v3491_v19 }
 0x5c2   : > { %3237 = vmatprep.subr.bf16.mxu1 %v3491_v19 }
 0x5c4   : > { %3218 = vmatpush3.bf16.msra.mxu0 %v3411_v16 }
 0x5c5   : > { %3238 = vmatpush3.bf16.msra.mxu1 %v3412_v17  ;;  %3219 = vmatprep.subr.bf16.mxu0 %v3491_v19 }
 0x5c6   : > { %3239 = vmatprep.subr.bf16.mxu1 %v3491_v19 }
 0x5c8   : > { %3220 = vmatpush3.bf16.msra.mxu0 %v3413_v18 }
 0x5c9   : > { %3240 = vmatpush3.bf16.msra.mxu1 %v3414_v20  ;;  %3221 = vmatprep.subr.bf16.mxu0 %v3491_v19 }
 0x5ca   : > { %3241 = vmatprep.subr.bf16.mxu1 %v3491_v19 }
 0x5cc   : > { %3222 = vmatpush3.bf16.msra.mxu0 %v3415_v21 }
 0x5cd   : > { %3242 = vmatpush3.bf16.msra.mxu1 %v3416_v22  ;;  %3223 = vmatprep.subr.bf16.mxu0 %v3491_v19 }
 0x5ce   : > { %3243 = vmatprep.subr.bf16.mxu1 %v3491_v19 }
 0x5d0   : > { %3224 = vmatpush3.bf16.msra.mxu0 %v3417_v23 }
 0x5d1   : > { %3244 = vmatpush3.bf16.msra.mxu1 %v3418_v24 }
 0x686   : > { %v1970_v29 = vpop.f32.mrb[24].mxu0 }
 0x687   : > { %v1976_v30 = vadd.f32 %v1970_v29, %v1870_v27  ;;  %v2088_v31 = vpop.f32.mrb[24].mxu1  ;;  %v3187_v32 = vpop.f32.mrb[25].mxu0 }
 0x688   : > { %v2094_v33 = vadd.f32 %v2088_v31, %v1988_v28  ;;  %v3207_v19 = vpop.f32.mrb[25].mxu1  ;;  %v1973_v34 = vpop.f32.mrb[26].mxu0 }
 0x689   : > { %3443 = vtanh.f32 %v1976_v30  ;;  %v2091_v35 = vpop.f32.mrb[26].mxu1  ;;  %v3188_v36 = vpop.f32.mrb[27].mxu0 }
 0x68a   : > { %3445 = vtanh.f32 %v2094_v33  ;;  %v3208_v37 = vpop.f32.mrb[27].mxu1 }
 0x693   : > { %v3444_v40 = vpop.eup %3443 }
 0x694   : > { %v3446_v41 = vpop.eup %3445  ;;  %v1982_v42 = vsel %vm1981_vm13, %v3444_v40, %v4260_v4 }
 0x695   : > { %2718 = vst [vmem:[%s3613_s21 + $0x30] sm:$0xff] %v1982_v42  ;;  %v2107_v43 = vpack.c.bf16 %v1982_v42, %v1982_v42  ;;  %v2100_v44 = vsel %vm2099_vm14, %v3446_v41, %v4270_v7 }
 0x696   : > { %2744 = vst [vmem:[%s3618_s10 + $0x8] sm:$0xff] %v2100_v44  ;;  %v2223_v45 = vpack.c.bf16 %v2100_v44, %v2100_v44 }
 0x697   : > { %3226 = vmatmul.mubr.bf16.vlgmr.msra.gmra.mrb[28].mxu0 %v2107_v43 }
 0x698   : > { %3246 = vmatmul.mubr.bf16.vlgmr.msra.gmra.mrb[28].mxu1 %v2223_v45 }
 0x76a   : > { %v2206_v48 = vpop.f32.mrb[28].mxu0 }
 0x76b   : > { %v2212_v49 = vadd.f32 %v2206_v48, %v2106_v46  ;;  %v2322_v50 = vpop.f32.mrb[28].mxu1  ;;  %v3227_v51 = vpop.f32.mrb[29].mxu0 }
 0x76c   : > { %v2328_v52 = vadd.f32 %v2322_v50, %v2222_v47  ;;  %v3247_v53 = vpop.f32.mrb[29].mxu1  ;;  %v2209_v54 = vpop.f32.mrb[30].mxu0 }
 0x76d   : > { %3447 = vtanh.f32 %v2212_v49  ;;  %v2325_v55 = vpop.f32.mrb[30].mxu1  ;;  %v3228_v56 = vpop.f32.mrb[31].mxu0 }
 0x76e   : > { %3449 = vtanh.f32 %v2328_v52  ;;  %v3248_v57 = vpop.f32.mrb[31].mxu1 }
 0x777   : > { %v3448_v60 = vpop.eup %3447 }
 0x778   : > { %v3450_v61 = vpop.eup %3449  ;;  %v2218_v62 = vsel %vm2217_vm15, %v3448_v60, %v1982_v42 }
 0x779   : > { %2754 = vst [vmem:[%s3613_s21 + $0x38] sm:$0xff] %v2218_v62  ;;  %2336 = vst [vmem:[#allocation2] sm:$0xff] %v2218_v62  ;;  %v2334_v63 = vsel %vm2333_vm0, %v3450_v61, %v2100_v44 }
 0x77a   : > { %2337 = vst [vmem:[%s4391_s6] sm:$0xff] %v2218_v62  ;;  %2335 = vst [vmem:[%s3618_s10] sm:$0xff] %v2334_v63 }
 0x77b   : > { %2338 = vst [vmem:[#allocation2 + $0x8] sm:$0xff] %v2334_v63  ;;  %2779 = vst [vmem:[%s4391_s6 + $0x8] sm:$0xff] %v2334_v63 }
 0x77c PF: > { %p14_p2 = scmp.ge.s32.totalorder %s3557_s27, 4   ;;  %s4400_s21 = smov %s3477_s22 }
 0x77d   : > { %s4401_s22 = smov %s3576_s11  ;;  %s4402_s23 = smov %s3485_s24 }
 0x77e   : > { %s4403_s24 = smov %s3567_s7  ;;  %s4404_s25 = smov %s3557_s27 }
 0x77f   :  { %16 = sbr.rel (!%p14_p2) target bundleno = 3 (0x3), region = 216 }

</bundles_post_ra>
